<compile_context>
chip_gen: v5e
topology: v5e:2x2
jax: 0.10.0
libtpu: 0.0.40
codegen_flags: <defaults>
</compile_context>

<pallas_src>
import jax
import jax.numpy as jnp
from jax import lax
from jax.experimental import pallas as pl
from jax.experimental.pallas import tpu as pltpu


def _fused_msa_kernel(x_ref, a_ref, c_ref, wvo_ref, b_ref, out_ref):
    """One query tile of the fully fused multi-scale self-attention.

    x_ref  : (L, E)  full raw sequence, VMEM-resident (constant block index)
    a_ref  : (E, E)  folded q/k weight   A = Wq^T Wk / sqrt(E)            (f32)
    c_ref  : (1, E)  folded q/k bias     c = bq Wk / sqrt(E)              (f32)
    wvo_ref: (C, E)  folded v-proj + out-proj + mean-over-scales weight   (f32)
    b_ref  : (C, 1)  folded v-proj + out-proj + mean-over-scales bias     (f32)
    out_ref: (C, TQ) channel-major output tile (lane-dense stores)
    """
    tq = out_ref.shape[1]
    i = pl.program_id(0)
    start = pl.multiple_of(i * tq, tq)

    x_all = x_ref[...]                                   # (L, E) resident sequence
    xq = x_ref[pl.ds(start, tq), :]                      # (TQ, E) query view of it

    # Effective query: folds Wq, Wk, bq and the 1/sqrt(E) scale (shift-invariant form).
    q = jnp.dot(xq, a_ref[...], preferred_element_type=jnp.float32) + c_ref[...]
    q = q.astype(x_all.dtype)

    # scores (TQ, L) = q_eff @ x^T   (the K projection is folded away entirely)
    s = lax.dot_general(q, x_all, (((1,), (1,)), ((), ())),
                        preferred_element_type=jnp.float32)

    # Full-row softmax: whole key axis is resident, no online-softmax state needed.
    m = jnp.max(s, axis=-1, keepdims=True)
    p = jnp.exp(s - m)
    denom = jnp.sum(p, axis=-1, keepdims=True)

    # context (TQ, E) = p @ x (V projection folded into wvo); normalize after the dot
    # (tq*E multiplies instead of tq*L).  Exact reciprocal keeps the 1e-4 tolerance.
    ctx = jnp.dot(p.astype(x_all.dtype), x_all, preferred_element_type=jnp.float32)
    ctx = ctx * pl.reciprocal(denom, approx=False)

    # (C, TQ) = W_vo @ ctx^T + b : v-proj, out-proj, mean-over-scales, biases folded.
    out = lax.dot_general(wvo_ref[...], ctx, (((1,), (1,)), ((), ())),
                          preferred_element_type=jnp.float32) + b_ref[...]
    out_ref[...] = out.astype(out_ref.dtype)


def _pick_query_tile(L, desired):
    """Largest tile <= desired that divides L and keeps 128-lane-aligned output stores."""
    t = min(desired, L)
    if L % t == 0 and (t == L or t % 128 == 0):
        return t
    cand = (min(desired, L) // 128) * 128
    while cand >= 128:
        if L % cand == 0:
            return cand
        cand -= 128
    return L   # single-tile fallback for awkward L


def multiscale_attention_fusion(inputs_list, in_proj_w, in_proj_b,
                                out_proj_w, out_proj_b, *, tq=256):
    """inputs_list: S tensors, each NCHW (B, C, H, W). Returns (B, C, H, W)."""
    x = jnp.stack(inputs_list)                        # (S, B, C, H, W)
    S, B, C, H, W = x.shape
    E = S * C
    L = B * H * W
    dtype = x.dtype

    tq = _pick_query_tile(L, tq)

    # (S,B,C,H,W) -> (B,H,W,S,C) -> (L, E)   [XLA glue; single fused copy]
    # TODO(synk): fold this permute into the kernel via a 5-D BlockSpec gather to save
    # one HBM pass over the sequence; kept as wrapper glue here.
    x_seq = jnp.transpose(x, (1, 3, 4, 0, 2)).reshape(L, E)

    # ---- Trace-time weight folding (all f32 for accuracy) --------------------------
    f32 = jnp.float32
    scale = 1.0 / float(E) ** 0.5
    wq = in_proj_w[0:E].astype(f32)                    # (E, E)
    wk = in_proj_w[E:2 * E].astype(f32)                # (E, E)
    wv = in_proj_w[2 * E:].astype(f32)                 # (E, E)
    bq = in_proj_b[0:E].astype(f32)                    # (E,)
    bv = in_proj_b[2 * E:].astype(f32)                 # (E,)
    # bk only shifts every score in a query row by a constant -> softmax-invariant.
    a_fold = (wq.T @ wk) * scale                       # (E, E)
    c_fold = (bq @ wk * scale).reshape(1, E)           # (1, E)
    wo_red = jnp.mean(out_proj_w.astype(f32).reshape(S, C, E), axis=0)   # (C, E)
    bo_red = jnp.mean(out_proj_b.astype(f32).reshape(S, C), axis=0)      # (C,)
    wvo = wo_red @ wv                                  # (C, E)
    b_fold = (wo_red @ bv + bo_red).reshape(C, 1)      # (C, 1)

    # ---- Explicit VMEM budget (resident x + per-tile temporaries) ------------------
    itemsize = jnp.dtype(dtype).itemsize
    est = (L * E * itemsize                 # resident raw sequence
           + 2 * tq * L * 4                 # scores + exp(p) f32 temporaries
           + 4 * tq * E * 4                 # q_eff / ctx / dtype casts
           + 2 * C * tq * 4                 # double-buffered output tile
           + (E * E + E + C * E + C) * 4)   # folded weights
    vmem_limit = int(min(max(4 * est, 16 * 1024 * 1024), 40 * 1024 * 1024))

    out_cl = pl.pallas_call(
        _fused_msa_kernel,
        out_shape=jax.ShapeDtypeStruct((C, L), dtype),
        grid=(L // tq,),
        in_specs=[
            pl.BlockSpec((L, E), lambda i: (0, 0)),        # resident raw sequence
            pl.BlockSpec((E, E), lambda i: (0, 0)),        # A = Wq^T Wk / sqrt(E)
            pl.BlockSpec((1, E), lambda i: (0, 0)),        # c = bq Wk / sqrt(E)
            pl.BlockSpec((C, E), lambda i: (0, 0)),        # W_vo (v+out+mean folded)
            pl.BlockSpec((C, 1), lambda i: (0, 0)),        # folded bias
        ],
        out_specs=pl.BlockSpec((C, tq), lambda i: (0, i)),
        compiler_params=pltpu.CompilerParams(
            dimension_semantics=("parallel",),
            vmem_limit_bytes=vmem_limit),
    )(x_seq, a_fold, c_fold, wvo, b_fold)

    # (C, L) -> (C, B, H, W) -> (B, C, H, W)      [glue]
    return jnp.transpose(out_cl.reshape(C, B, H, W), (1, 0, 2, 3))


def _reference(inputs_list, in_proj_w, in_proj_b, out_proj_w, out_proj_b):
    """Pure-JAX reference of the PyTorch forward."""
    x = jnp.stack(inputs_list)
    S, B, C, H, W = x.shape
    E = S * C
    L = B * H * W
    seq = jnp.transpose(x, (1, 3, 4, 0, 2)).reshape(L, E)
    q = seq @ in_proj_w[0:E].T + in_proj_b[0:E]
    k = seq @ in_proj_w[E:2 * E].T + in_proj_b[E:2 * E]
    v = seq @ in_proj_w[2 * E:].T + in_proj_b[2 * E:]
    scores = (q @ k.T) / jnp.sqrt(jnp.float32(E))
    p = jax.nn.softmax(scores, axis=-1)
    attn = p @ v @ out_proj_w.T + out_proj_b                     # (L, E)
    attn = attn.reshape(B, H, W, S, C)
    attn = jnp.transpose(attn, (0, 3, 4, 1, 2))                  # (B, S, C, H, W)
    return jnp.mean(attn, axis=1)                                # (B, C, H, W)


if __name__ == "__main__":
    key = jax.random.PRNGKey(0)
    S, B, C, H, W = 4, 2, 8, 16, 16          # 4 scales, NCHW inputs (2, 8, 16, 16)
    E = S * C                                # embed_dim (input_dim) = 32

    ks = jax.random.split(key, 8)
    inputs_list = [jax.random.normal(ks[i], (B, C, H, W), dtype=jnp.float32)
                   for i in range(S)]

    # MultiheadAttention parameters (deterministic synthetic init).
    in_proj_w = jax.random.normal(ks[4], (3 * E, E), dtype=jnp.float32) * 0.1
    in_proj_b = jax.random.normal(ks[5], (3 * E,), dtype=jnp.float32) * 0.1
    out_proj_w = jax.random.normal(ks[6], (E, E), dtype=jnp.float32) * 0.1
    out_proj_b = jax.random.normal(ks[7], (E,), dtype=jnp.float32) * 0.1
    # TODO(synk): self.fc (nn.Linear(input_dim, output_dim)) is created by __init__ but
    # never used in forward, so it is intentionally not materialized here.

    out = multiscale_attention_fusion(inputs_list, in_proj_w, in_proj_b,
                                      out_proj_w, out_proj_b)
    out = jax.block_until_ready(out)

    ref = _reference(inputs_list, in_proj_w, in_proj_b, out_proj_w, out_proj_b)
    assert out.shape == (B, C, H, W), out.shape
    assert jnp.allclose(out, ref, atol=1e-4, rtol=1e-4), \
        float(jnp.max(jnp.abs(out - ref)))
    print("KERNEL_OK")
</pallas_src>

<mosaic_0001>
module attributes {stable_mosaic.version = 11 : i64} {
  func.func @_fused_msa_kernel(%arg0: i32, %arg1: memref<512x32xf32, #tpu.memory_space<vmem>>, %arg2: memref<32x32xf32, #tpu.memory_space<vmem>>, %arg3: memref<1x32xf32, #tpu.memory_space<vmem>>, %arg4: memref<8x32xf32, #tpu.memory_space<vmem>>, %arg5: memref<8x1xf32, #tpu.memory_space<vmem>>, %arg6: memref<8x256xf32, #tpu.memory_space<vmem>>) attributes {dimension_semantics = [#tpu.dimension_semantics<parallel>], iteration_bounds = array<i64: 2>, scalar_prefetch = 0 : i64, scratch_operands = 0 : i64, tpu.core_type = #tpu.core_type<tc>, window_params = [{pipeline_mode = #tpu.pipeline_mode<synchronous>, transform_indices = @transform_0, window_bounds = array<i64: 512, 32>}, {pipeline_mode = #tpu.pipeline_mode<synchronous>, transform_indices = @transform_1, window_bounds = array<i64: 32, 32>}, {pipeline_mode = #tpu.pipeline_mode<synchronous>, transform_indices = @transform_2, window_bounds = array<i64: 1, 32>}, {pipeline_mode = #tpu.pipeline_mode<synchronous>, transform_indices = @transform_3, window_bounds = array<i64: 8, 32>}, {pipeline_mode = #tpu.pipeline_mode<synchronous>, transform_indices = @transform_4, window_bounds = array<i64: 8, 1>}, {transform_indices = @transform_5, window_bounds = array<i64: 8, 256>}]} {
    %c256_i32 = arith.constant 256 : i32
    %0 = arith.muli %arg0, %c256_i32 : i32
    %1 = tpu.assume_multiple %0, 256 : i32
    %c0 = arith.constant 0 : index
    %c0_0 = arith.constant 0 : index
    %2 = vector.load %arg1[%c0, %c0_0] : memref<512x32xf32, #tpu.memory_space<vmem>>, vector<512x32xf32>
    %3 = arith.index_cast %1 : i32 to index
    %c0_1 = arith.constant 0 : index
    %4 = vector.load %arg1[%3, %c0_1] : memref<512x32xf32, #tpu.memory_space<vmem>>, vector<256x32xf32>
    %c0_2 = arith.constant 0 : index
    %c0_3 = arith.constant 0 : index
    %5 = vector.load %arg2[%c0_2, %c0_3] : memref<32x32xf32, #tpu.memory_space<vmem>>, vector<32x32xf32>
    %cst = arith.constant dense<0.000000e+00> : vector<256x32xf32>
    %6 = tpu.matmul %4, %5, %cst {dimension_numbers = #tpu.dot_dimension_numbers<[1], [0], [0], [1], [0, 0, 1, 1], [], []>} : vector<256x32xf32>, vector<32x32xf32>, vector<256x32xf32> -> vector<256x32xf32>
    %c0_4 = arith.constant 0 : index
    %c0_5 = arith.constant 0 : index
    %7 = vector.load %arg3[%c0_4, %c0_5] : memref<1x32xf32, #tpu.memory_space<vmem>>, vector<1x32xf32>
    %8 = vector.broadcast %7 : vector<1x32xf32> to vector<256x32xf32>
    %9 = arith.addf %6, %8 : vector<256x32xf32>
    %cst_6 = arith.constant dense<0.000000e+00> : vector<256x512xf32>
    %10 = tpu.matmul %9, %2, %cst_6 {dimension_numbers = #tpu.dot_dimension_numbers<[1], [1], [0], [0], [0, 0, 1, 0], [], []>} : vector<256x32xf32>, vector<512x32xf32>, vector<256x512xf32> -> vector<256x512xf32>
    %cst_7 = arith.constant dense<0xFF800000> : vector<256xf32>
    %11 = vector.multi_reduction <maximumf>, %10, %cst_7 [1] : vector<256x512xf32> to vector<256xf32>
    %12 = vector.shape_cast %11 : vector<256xf32> to vector<256x1xf32>
    %13 = vector.broadcast %12 : vector<256x1xf32> to vector<256x512xf32>
    %14 = arith.subf %10, %13 : vector<256x512xf32>
    %15 = math.exp %14 : vector<256x512xf32>
    %cst_8 = arith.constant dense<0.000000e+00> : vector<256xf32>
    %16 = vector.multi_reduction <add>, %15, %cst_8 [1] : vector<256x512xf32> to vector<256xf32>
    %17 = vector.shape_cast %16 : vector<256xf32> to vector<256x1xf32>
    %cst_9 = arith.constant dense<0.000000e+00> : vector<256x32xf32>
    %18 = tpu.matmul %15, %2, %cst_9 {dimension_numbers = #tpu.dot_dimension_numbers<[1], [0], [0], [1], [0, 0, 1, 1], [], []>} : vector<256x512xf32>, vector<512x32xf32>, vector<256x32xf32> -> vector<256x32xf32>
    %19 = tpu.reciprocal %17 : vector<256x1xf32> -> vector<256x1xf32>
    %20 = vector.broadcast %19 : vector<256x1xf32> to vector<256x32xf32>
    %21 = arith.mulf %18, %20 : vector<256x32xf32>
    %c0_10 = arith.constant 0 : index
    %c0_11 = arith.constant 0 : index
    %22 = vector.load %arg4[%c0_10, %c0_11] : memref<8x32xf32, #tpu.memory_space<vmem>>, vector<8x32xf32>
    %cst_12 = arith.constant dense<0.000000e+00> : vector<8x256xf32>
    %23 = tpu.matmul %22, %21, %cst_12 {dimension_numbers = #tpu.dot_dimension_numbers<[1], [1], [0], [0], [0, 0, 1, 0], [], []>} : vector<8x32xf32>, vector<256x32xf32>, vector<8x256xf32> -> vector<8x256xf32>
    %c0_13 = arith.constant 0 : index
    %c0_14 = arith.constant 0 : index
    %24 = vector.load %arg5[%c0_13, %c0_14] : memref<8x1xf32, #tpu.memory_space<vmem>>, vector<8x1xf32>
    %25 = vector.broadcast %24 : vector<8x1xf32> to vector<8x256xf32>
    %26 = arith.addf %23, %25 : vector<8x256xf32>
    %c0_15 = arith.constant 0 : index
    %c0_16 = arith.constant 0 : index
    %27 = vector.load %arg6[%c0_15, %c0_16] : memref<8x256xf32, #tpu.memory_space<vmem>>, vector<8x256xf32>
    tpu.vector_store %arg6[%c0_15, %c0_16], %26 {strides = array<i32>} : memref<8x256xf32, #tpu.memory_space<vmem>>, vector<8x256xf32>,
    return
  }
  func.func @transform_0(%arg0: i32) -> (i32, i32) {
    %c0_i32 = arith.constant 0 : i32
    %c0_i32_0 = arith.constant 0 : i32
    %c0_i32_1 = arith.constant 0 : i32
    return %c0_i32, %c0_i32_0 : i32, i32
  }
  func.func @transform_1(%arg0: i32) -> (i32, i32) {
    %c0_i32 = arith.constant 0 : i32
    %c0_i32_0 = arith.constant 0 : i32
    %c0_i32_1 = arith.constant 0 : i32
    return %c0_i32, %c0_i32_0 : i32, i32
  }
  func.func @transform_2(%arg0: i32) -> (i32, i32) {
    %c0_i32 = arith.constant 0 : i32
    %c0_i32_0 = arith.constant 0 : i32
    %c0_i32_1 = arith.constant 0 : i32
    return %c0_i32, %c0_i32_0 : i32, i32
  }
  func.func @transform_3(%arg0: i32) -> (i32, i32) {
    %c0_i32 = arith.constant 0 : i32
    %c0_i32_0 = arith.constant 0 : i32
    %c0_i32_1 = arith.constant 0 : i32
    return %c0_i32, %c0_i32_0 : i32, i32
  }
  func.func @transform_4(%arg0: i32) -> (i32, i32) {
    %c0_i32 = arith.constant 0 : i32
    %c0_i32_0 = arith.constant 0 : i32
    %c0_i32_1 = arith.constant 0 : i32
    return %c0_i32, %c0_i32_0 : i32, i32
  }
  func.func @transform_5(%arg0: i32) -> (i32, i32) {
    %c0_i32 = arith.constant 0 : i32
    %c0_i32_0 = arith.constant 0 : i32
    return %c0_i32, %arg0 : i32, i32
  }
}

</mosaic_0001>

<bundles_post_ra>
// kernel: tpu_custom_call.1
= control target key start
LH: loop header
LB: loop body
LE: loop exit
PB: predicated region body
PF: predicated region fallthrough
CT: control target
= control target key end

     0   :  { %10 = vsyncpa [#allocation3], 0  ;;  %s6421_s0 = inlined_call_operand.vmem [shape: f32[512,32], index: 0, kind: input, shape index: {}]   ;;  %s6422_s1 = inlined_call_operand.vmem [shape: f32[32,32], index: 1, kind: input, shape index: {}]   ;;  %s6423_s2 = inlined_call_operand.vmem [shape: f32[1,32], index: 2, kind: input, shape index: {}]   ;;  %s6424_s3 = inlined_call_operand.vmem [shape: f32[8,32], index: 3, kind: input, shape index: {}]   ;;  %s6425_s4 = inlined_call_operand.vmem [shape: f32[8,1], index: 4, kind: input, shape index: {}]   ;;  %s6426_s5 = inlined_call_operand.hbm [shape: f32[8,512], index: 5, kind: output, shape index: {}]  }
   0x1   :  { %12 = vsyncpa [#allocation3 + $0x1], 0  ;;  %s3849_s18 = smov 0   ;;  %s3851_s19 = smov 0  }
   0x2   :  { %s3853_s20 = smov 0   ;;  %s3855_s21 = smov 0  }
   0x3 LB: > { %s3870_s22 = sadd.s32 4294967295, %s3816_s21   ;;  %s3110_s23 = sadd.s32 4294967294, %s3816_s21   ;;  %s3816_s21 = sphi %s3855_s21, %s6734_s21   ;;  %s3812_s20 = sphi %s3853_s20, %s6733_s20   ;;  %s3808_s19 = sphi %s3851_s19, %s6732_s19   ;;  %s3804_s18 = sphi %s3849_s18, %s6731_s18  }
   0x4   : > { %s3874_s24 = sadd.s32 1, %s3816_s21   ;;  %s130_s25 = sadd.s32 1, %s3812_s20 }
   0x5   : > { %s127_s26 = ssub.s32 %s3816_s21, %s3874_s24  ;;  %p140_p0 = scmp.ne.s32.totalorder %s3812_s20, %s3808_s19 }
   0x6   : > { %p128_p1 = scmp.eq.s32.totalorder %s127_s26, 0  ;;  %p141_p2 = scmp.eq.s32.totalorder %s3870_s22, 1 }
   0x7   : > { %p146_p3 = scmp.ne.s32.totalorder %s3808_s19, %s3804_s18  ;;  %p147_p4 = scmp.eq.s32.totalorder %s3110_s23, 1 }
   0x8   : > { %s3885_s27 = scalar_select %p128_p1, %s3812_s20, %s130_s25  }
   0x9   : > { %p3887_p5 = por %p141_p2, %p140_p0  ;;  %p3891_p6 = por %p147_p4, %p146_p3 }
   0xa   : > { %p3112_p7 = scmp.ge.s32.totalorder %s3816_s21, 1  ;;  %p180_p8 = scmp.lt.s32.totalorder %s3816_s21, 3 }
   0xc   : > { %p181_p9 = pnand %p3112_p7, %p180_p8 }
   0xe   : > { %184 = sbr.rel (%p181_p9) target bundleno = 1030 (0x406), region = 40 }
  0x13   : > { %v305_v0 = vld [vmem:[%s6422_s1 + $0x18] sm:$0xff]  ;;  %v304_v1 = vld [vmem:[%s6422_s1 + $0x10] sm:$0xff]  ;;  %s3114_s9 = sshll.u32 %s3870_s22, 8  ;;  %v303_v2 = vld [vmem:[%s6422_s1 + $0x8] sm:$0xff]  ;;  %vm310_vm0 = vcmask 261120   ;;  %s200_s15 = sand.u32 1, %s3808_s19  }
  0x14   : > { %419 = vmatpush.msra.mxu0 %v305_v0  ;;  %3381 = vmatpush.msra.mxu3 %v305_v0  ;;  %s3910_s14 = scalar_lea.vmem %s6421_s0, %s3114_s9  ;;  %v302_v3 = vld [vmem:[%s6422_s1] sm:$0xff]  ;;  %v3933_v12 = vld [vmem:[%s6421_s0 + $0x78] sm:$0xff]  ;;  %v3960_v16 = vld [vmem:[%s6421_s0 + $0x70] sm:$0xff]  ;;  %s3113_s16 = sshll.u32 %s200_s15, 4 }
  0x15   : > { %3379 = vmatpush.msra.mxu1 %v305_v0  ;;  %3380 = vmatpush.msra.mxu2 %v305_v0  ;;  %v270_v4 = vld [vmem:[%s3910_s14] sm:$0xff]  ;;  %v271_v5 = vld [vmem:[%s3910_s14 + $0x8] sm:$0xff]  ;;  %v272_v7 = vld [vmem:[%s3910_s14 + $0x10] sm:$0xff]  ;;  %s3378_s17 = sshll.u32 %s3870_s22, 4  ;;  %s202_s30 = scalar_lea.vmem [#allocation2], %s3113_s16 }
  0x16   : > { %420 = vmatpush.msra.mxu0 %v304_v1  ;;  %3384 = vmatpush.msra.mxu3 %v304_v1  ;;  %v291_v6 = vld [vmem:[%s3910_s14 + $0xa8] sm:$0xff]  ;;  %v292_v8 = vld [vmem:[%s3910_s14 + $0xb0] sm:$0xff]  ;;  %v273_v9 = vld [vmem:[%s3910_s14 + $0x18] sm:$0xff]  ;;  %s3056_s26 = scalar_lea.hbm %s6426_s5, %s3378_s17  ;;  %s3058_s6 = sshll.u32 %s202_s30, 4  ;;  %s3059_s6 = int_to_ptr.vmem [resolvable:$true] %s3058_s6 }
  0x17   : > { %3382 = vmatpush.msra.mxu1 %v304_v1  ;;  %3383 = vmatpush.msra.mxu2 %v304_v1  ;;  %v278_v10 = vld [vmem:[%s3910_s14 + $0x40] sm:$0xff]  ;;  %v293_v11 = vld [vmem:[%s3910_s14 + $0xb8] sm:$0xff]  ;;  %v3967_v17 = vld [vmem:[%s6421_s0 + $0xf0] sm:$0xff]  ;;  %s3045_s7 = scalar_lea.sflag [#allocation3], %s200_s15  ;;  %s3774_s11 = scalar_lea.hbm %s6426_s5, 32 }
  0x18   : > { %421 = vmatpush.msra.mxu0 %v303_v2  ;;  %3387 = vmatpush.msra.mxu3 %v303_v2  ;;  %v3941_v13 = vld [vmem:[%s6421_s0 + $0xf8] sm:$0xff]  ;;  %v3972_v18 = vld [vmem:[%s6421_s0 + $0x170] sm:$0xff]  ;;  %v274_v20 = vld [vmem:[%s3910_s14 + $0x20] sm:$0xff] }
  0x19   : > { %3385 = vmatpush.msra.mxu1 %v303_v2  ;;  %3386 = vmatpush.msra.mxu2 %v303_v2  ;;  %v3946_v14 = vld [vmem:[%s6421_s0 + $0x178] sm:$0xff]  ;;  %v3977_v19 = vld [vmem:[%s6421_s0 + $0x1f0] sm:$0xff]  ;;  %v279_v21 = vld [vmem:[%s3910_s14 + $0x48] sm:$0xff] }
  0x1a   : > { %422 = vmatpush.msra.mxu0 %v302_v3  ;;  %3390 = vmatpush.msra.mxu3 %v302_v3  ;;  %v3951_v15 = vld [vmem:[%s6421_s0 + $0x1f8] sm:$0xff]  ;;  %v294_v22 = vld [vmem:[%s3910_s14 + $0xc0] sm:$0xff]  ;;  %v3991_v23 = vld [vmem:[%s6421_s0 + $0x68] sm:$0xff] }
  0x1b   : > { %3115 = vmatmul.msk.f32.vlgmr.msra.gmra.mxu0 %vm310_vm0, %v270_v4  ;;  %3388 = vmatpush.msra.mxu1 %v302_v3  ;;  %v3998_v24 = vld [vmem:[%s6421_s0 + $0xe8] sm:$0xff]  ;;  %v4022_v27 = vld [vmem:[%s6421_s0 + $0x60] sm:$0xff]  ;;  %v280_v32 = vld [vmem:[%s3910_s14 + $0x50] sm:$0xff] }
  0x1c   : > { %3389 = vmatpush.msra.mxu2 %v302_v3  ;;  %3136 = vmatmul.msk.f32.vlgmr.msra.gmra.mxu3 %vm310_vm0, %v291_v6  ;;  %v4003_v25 = vld [vmem:[%s6421_s0 + $0x168] sm:$0xff]  ;;  %v4029_v28 = vld [vmem:[%s6421_s0 + $0xe0] sm:$0xff]  ;;  %v4054_v35 = vld [vmem:[%s6421_s0 + $0x58] sm:$0xff] }
  0x1d   : > { %3123 = vmatmul.msk.f32.vlgmr.msra.gmra.mxu1 %vm310_vm0, %v278_v10  ;;  %3243 = vmatpush.xpose.msk.msrb.mxu3 %vm310_vm0, %v3946_v14  ;;  %v4010_v26 = vld [vmem:[%s6421_s0 + $0x1e8] sm:$0xff]  ;;  %v4034_v29 = vld [vmem:[%s6421_s0 + $0x160] sm:$0xff]  ;;  %v4061_v36 = vld [vmem:[%s6421_s0 + $0xd8] sm:$0xff] }
  0x1e   : > { %3147 = vmatpush.xpose.msk.msrb.mxu1 %vm310_vm0, %v3933_v12  ;;  %3195 = vmatpush.xpose.msk.msrb.mxu2 %vm310_vm0, %v3941_v13  ;;  %v4039_v30 = vld [vmem:[%s6421_s0 + $0x1e0] sm:$0xff]  ;;  %v275_v31 = vld [vmem:[%s3910_s14 + $0x28] sm:$0xff]  ;;  %v4066_v37 = vld [vmem:[%s6421_s0 + $0x158] sm:$0xff] }
  0x1f   : > { %3291 = vmatpush.xpose.msk.msrb.mxu0 %vm310_vm0, %v3951_v15  ;;  %v287_v33 = vld [vmem:[%s3910_s14 + $0x88] sm:$0xff]  ;;  %v4074_v38 = vld [vmem:[%s6421_s0 + $0x1d8] sm:$0xff]  ;;  %v4086_v39 = vld [vmem:[%s6421_s0 + $0x50] sm:$0xff] }
  0x20   : > { %v295_v34 = vld [vmem:[%s3910_s14 + $0xc8] sm:$0xff]  ;;  %3132 = vmatmul.msk.f32.vlgmr.msra.gmra.mxu2 %vm310_vm0, %v287_v33  ;;  %v4093_v40 = vld [vmem:[%s6421_s0 + $0xd0] sm:$0xff]  ;;  %v281_v45 = vld [vmem:[%s3910_s14 + $0x58] sm:$0xff] }
  0x21   : > { %3244 = vmatpush.xpose.msk.msrb.mxu3 %vm310_vm0, %v3972_v18  ;;  %v4098_v41 = vld [vmem:[%s6421_s0 + $0x150] sm:$0xff]  ;;  %v4118_v47 = vld [vmem:[%s6421_s0 + $0x48] sm:$0xff]  ;;  %v4150_v51 = vld [vmem:[%s6421_s0 + $0x40] sm:$0xff] }
  0x22   : > { %3148 = vmatpush.xpose.msk.msrb.mxu1 %vm310_vm0, %v3960_v16  ;;  %3196 = vmatpush.xpose.msk.msrb.mxu2 %vm310_vm0, %v3967_v17  ;;  %v4103_v42 = vld [vmem:[%s6421_s0 + $0x1d0] sm:$0xff]  ;;  %v4125_v48 = vld [vmem:[%s6421_s0 + $0xc8] sm:$0xff]  ;;  %v4157_v52 = vld [vmem:[%s6421_s0 + $0xc0] sm:$0xff] }
  0x23   : > { %3116 = vmatmul.msk.f32.gmra.mxu0 %vm310_vm0, %v271_v5  ;;  %v288_v43 = vld [vmem:[%s3910_s14 + $0x90] sm:$0xff]  ;;  %v4130_v49 = vld [vmem:[%s6421_s0 + $0x148] sm:$0xff]  ;;  %v4162_v53 = vld [vmem:[%s6421_s0 + $0x140] sm:$0xff] }
  0x24   : > { %3137 = vmatmul.msk.f32.gmra.mxu3 %vm310_vm0, %v292_v8  ;;  %3292 = vmatpush.xpose.msk.msrb.mxu0 %vm310_vm0, %v3977_v19  ;;  %v276_v44 = vld [vmem:[%s3910_s14 + $0x30] sm:$0xff]  ;;  %v4138_v50 = vld [vmem:[%s6421_s0 + $0x1c8] sm:$0xff]  ;;  %v4167_v54 = vld [vmem:[%s6421_s0 + $0x1c0] sm:$0xff] }
  0x25   : > { %3124 = vmatmul.msk.f32.gmra.mxu1 %vm310_vm0, %v279_v21  ;;  %3245 = vmatpush.xpose.msk.msrb.mxu3 %vm310_vm0, %v4003_v25  ;;  %v296_v46 = vld [vmem:[%s3910_s14 + $0xd0] sm:$0xff]  ;;  %v289_v55 = vld [vmem:[%s3910_s14 + $0x98] sm:$0xff]  ;;  %v282_v57 = vld [vmem:[%s3910_s14 + $0x60] sm:$0xff] }
  0x26   : > { %3149 = vmatpush.xpose.msk.msrb.mxu1 %vm310_vm0, %v3991_v23  ;;  %3197 = vmatpush.xpose.msk.msrb.mxu2 %vm310_vm0, %v3998_v24  ;;  %v277_v56 = vld [vmem:[%s3910_s14 + $0x38] sm:$0xff]  ;;  %v4214_v63 = vld [vmem:[%s6421_s0 + $0x30] sm:$0xff]  ;;  %v290_v3 = vld [vmem:[%s3910_s14 + $0xa0] sm:$0xff] }
  0x27   : > { %v297_v58 = vld [vmem:[%s3910_s14 + $0xd8] sm:$0xff]  ;;  %v4221_v0 = vld [vmem:[%s6421_s0 + $0xb0] sm:$0xff]  ;;  %v283_v4 = vld [vmem:[%s3910_s14 + $0x68] sm:$0xff] }
  0x28   : > { %3293 = vmatpush.xpose.msk.msrb.mxu0 %vm310_vm0, %v4010_v26  ;;  %3133 = vmatmul.msk.f32.gmra.mxu2 %vm310_vm0, %v288_v43  ;;  %v4182_v59 = vld [vmem:[%s6421_s0 + $0x38] sm:$0xff]  ;;  %v4226_v1 = vld [vmem:[%s6421_s0 + $0x130] sm:$0xff]  ;;  %v298_v5 = vld [vmem:[%s3910_s14 + $0xe0] sm:$0xff] }
  0x29   : > { %3246 = vmatpush.xpose.msk.msrb.mxu3 %vm310_vm0, %v4034_v29  ;;  %v4189_v60 = vld [vmem:[%s6421_s0 + $0xb8] sm:$0xff]  ;;  %v4231_v2 = vld [vmem:[%s6421_s0 + $0x1b0] sm:$0xff]  ;;  %v4245_v6 = vld [vmem:[%s6421_s0 + $0x28] sm:$0xff] }
  0x2a   : > { %3150 = vmatpush.xpose.msk.msrb.mxu1 %vm310_vm0, %v4022_v27  ;;  %3198 = vmatpush.xpose.msk.msrb.mxu2 %vm310_vm0, %v4029_v28  ;;  %v4194_v61 = vld [vmem:[%s6421_s0 + $0x138] sm:$0xff]  ;;  %v4257_v8 = vld [vmem:[%s6421_s0 + $0x128] sm:$0xff]  ;;  %v4276_v10 = vld [vmem:[%s6421_s0 + $0x20] sm:$0xff] }
  0x2b   : > { %3117 = vmatmul.msk.f32.gmra.mxu0 %vm310_vm0, %v272_v7  ;;  %v4202_v62 = vld [vmem:[%s6421_s0 + $0x1b8] sm:$0xff]  ;;  %v4252_v7 = vld [vmem:[%s6421_s0 + $0xa8] sm:$0xff]  ;;  %v4293_v21 = vld [vmem:[%s6421_s0 + $0x1a0] sm:$0xff] }
  0x2c   : > { %3138 = vmatmul.msk.f32.gmra.mxu3 %vm310_vm0, %v293_v11  ;;  %3294 = vmatpush.xpose.msk.msrb.mxu0 %vm310_vm0, %v4039_v30  ;;  %v4283_v11 = vld [vmem:[%s6421_s0 + $0xa0] sm:$0xff]  ;;  %v4313_v33 = vld [vmem:[%s6421_s0 + $0x98] sm:$0xff] }
  0x2d   : > { %3125 = vmatmul.msk.f32.gmra.mxu1 %vm310_vm0, %v280_v32  ;;  %3247 = vmatpush.xpose.msk.msrb.mxu3 %vm310_vm0, %v4066_v37  ;;  %v4306_v32 = vld [vmem:[%s6421_s0 + $0x18] sm:$0xff] }
  0x2e   : > { %3151 = vmatpush.xpose.msk.msrb.mxu1 %vm310_vm0, %v4054_v35  ;;  %3199 = vmatpush.xpose.msk.msrb.mxu2 %vm310_vm0, %v4061_v36  ;;  %v4324_v43 = vld [vmem:[%s6421_s0 + $0x198] sm:$0xff] }
  0x30   : > { %3295 = vmatpush.xpose.msk.msrb.mxu0 %vm310_vm0, %v4074_v38  ;;  %3134 = vmatmul.msk.f32.gmra.mxu2 %vm310_vm0, %v289_v55  ;;  %v4353_v55 = vld [vmem:[%s6421_s0 + $0x190] sm:$0xff] }
  0x31   : > { %3248 = vmatpush.xpose.msk.msrb.mxu3 %vm310_vm0, %v4098_v41 }
  0x32   : > { %3152 = vmatpush.xpose.msk.msrb.mxu1 %vm310_vm0, %v4086_v39  ;;  %3200 = vmatpush.xpose.msk.msrb.mxu2 %vm310_vm0, %v4093_v40 }
  0x33   : > { %3118 = vmatmul.msk.f32.gmra.mxu0 %vm310_vm0, %v273_v9  ;;  %v4264_v9 = vld [vmem:[%s6421_s0 + $0x1a8] sm:$0xff] }
  0x34   : > { %3139 = vmatmul.msk.f32.gmra.mxu3 %vm310_vm0, %v294_v22  ;;  %3296 = vmatpush.xpose.msk.msrb.mxu0 %vm310_vm0, %v4103_v42  ;;  %v284_v22 = vld [vmem:[%s3910_s14 + $0x70] sm:$0xff] }
  0x35   : > { %3126 = vmatmul.msk.f32.gmra.mxu1 %vm310_vm0, %v281_v45  ;;  %3249 = vmatpush.xpose.msk.msrb.mxu3 %vm310_vm0, %v4130_v49  ;;  %v4343_v45 = vld [vmem:[%s6421_s0 + $0x90] sm:$0xff] }
  0x36   : > { %3153 = vmatpush.xpose.msk.msrb.mxu1 %vm310_vm0, %v4118_v47  ;;  %3201 = vmatpush.xpose.msk.msrb.mxu2 %vm310_vm0, %v4125_v48 }
  0x38   : > { %3297 = vmatpush.xpose.msk.msrb.mxu0 %vm310_vm0, %v4138_v50  ;;  %3135 = vmatmul.msk.f32.gmra.mxu2 %vm310_vm0, %v290_v3  ;;  %v4373_v3 = vld [vmem:[%s6421_s0 + $0x88] sm:$0xff] }
  0x39   : > { %3250 = vmatpush.xpose.msk.msrb.mxu3 %vm310_vm0, %v4162_v53 }
  0x3a   : > { %3154 = vmatpush.xpose.msk.msrb.mxu1 %vm310_vm0, %v4150_v51  ;;  %3202 = vmatpush.xpose.msk.msrb.mxu2 %vm310_vm0, %v4157_v52 }
  0x3b   : > { %3119 = vmatmul.msk.f32.gmra.mxu0 %vm310_vm0, %v274_v20  ;;  %v4288_v20 = vld [vmem:[%s6421_s0 + $0x120] sm:$0xff] }
  0x3c   : > { %3140 = vmatmul.msk.f32.gmra.mxu3 %vm310_vm0, %v295_v34  ;;  %3298 = vmatpush.xpose.msk.msrb.mxu0 %vm310_vm0, %v4167_v54  ;;  %v4318_v34 = vld [vmem:[%s6421_s0 + $0x118] sm:$0xff] }
  0x3d   : > { %3127 = vmatmul.msk.f32.gmra.mxu1 %vm310_vm0, %v282_v57  ;;  %3251 = vmatpush.xpose.msk.msrb.mxu3 %vm310_vm0, %v4194_v61  ;;  %v300_v57 = vld [vmem:[%s3910_s14 + $0xf0] sm:$0xff] }
  0x3e   : > { %3155 = vmatpush.xpose.msk.msrb.mxu1 %vm310_vm0, %v4182_v59  ;;  %3203 = vmatpush.xpose.msk.msrb.mxu2 %vm310_vm0, %v4189_v60 }
  0x40   : > { %3299 = vmatpush.xpose.msk.msrb.mxu0 %vm310_vm0, %v4202_v62 }
  0x41   : > { %3252 = vmatpush.xpose.msk.msrb.mxu3 %vm310_vm0, %v4226_v1 }
  0x42   : > { %3156 = vmatpush.xpose.msk.msrb.mxu1 %vm310_vm0, %v4214_v63  ;;  %3204 = vmatpush.xpose.msk.msrb.mxu2 %vm310_vm0, %v4221_v0 }
  0x43   : > { %3120 = vmatmul.msk.f32.gmra.mxu0 %vm310_vm0, %v275_v31  ;;  %v299_v31 = vld [vmem:[%s3910_s14 + $0xe8] sm:$0xff] }
  0x44   : > { %3141 = vmatmul.msk.f32.gmra.mxu3 %vm310_vm0, %v296_v46  ;;  %3300 = vmatpush.xpose.msk.msrb.mxu0 %vm310_vm0, %v4231_v2  ;;  %v4348_v46 = vld [vmem:[%s6421_s0 + $0x110] sm:$0xff] }
  0x45   : > { %3128 = vmatmul.msk.f32.gmra.mxu1 %vm310_vm0, %v283_v4  ;;  %3253 = vmatpush.xpose.msk.msrb.mxu3 %vm310_vm0, %v4257_v8  ;;  %v4378_v4 = vld [vmem:[%s6421_s0 + $0x108] sm:$0xff] }
  0x46   : > { %3157 = vmatpush.xpose.msk.msrb.mxu1 %vm310_vm0, %v4245_v6  ;;  %3205 = vmatpush.xpose.msk.msrb.mxu2 %vm310_vm0, %v4252_v7 }
  0x48   : > { %3301 = vmatpush.xpose.msk.msrb.mxu0 %vm310_vm0, %v4264_v9 }
  0x49   : > { %3254 = vmatpush.xpose.msk.msrb.mxu3 %vm310_vm0, %v4288_v20 }
  0x4a   : > { %3158 = vmatpush.xpose.msk.msrb.mxu1 %vm310_vm0, %v4276_v10  ;;  %3206 = vmatpush.xpose.msk.msrb.mxu2 %vm310_vm0, %v4283_v11 }
  0x4b   : > { %3121 = vmatmul.msk.f32.gmra.mxu0 %vm310_vm0, %v276_v44  ;;  %v4336_v44 = vld [vmem:[%s6421_s0 + $0x10] sm:$0xff] }
  0x4c   : > { %3142 = vmatmul.msk.f32.gmra.mxu3 %vm310_vm0, %v297_v58  ;;  %3302 = vmatpush.xpose.msk.msrb.mxu0 %vm310_vm0, %v4293_v21  ;;  %v4366_v58 = vld [vmem:[%s6421_s0 + $0x8] sm:$0xff] }
  0x4d   : > { %3129 = vmatmul.msk.f32.gmra.mxu1 %vm310_vm0, %v284_v22  ;;  %3255 = vmatpush.xpose.msk.msrb.mxu3 %vm310_vm0, %v4318_v34  ;;  %v286_v22 = vld [vmem:[%s3910_s14 + $0x80] sm:$0xff] }
  0x4e   : > { %3159 = vmatpush.xpose.msk.msrb.mxu1 %vm310_vm0, %v4306_v32  ;;  %3207 = vmatpush.xpose.msk.msrb.mxu2 %vm310_vm0, %v4313_v33 }
  0x50   : > { %3303 = vmatpush.xpose.msk.msrb.mxu0 %vm310_vm0, %v4324_v43 }
  0x51   : > { %3256 = vmatpush.xpose.msk.msrb.mxu3 %vm310_vm0, %v4348_v46 }
  0x52   : > { %3160 = vmatpush.xpose.msk.msrb.mxu1 %vm310_vm0, %v4336_v44  ;;  %3208 = vmatpush.xpose.msk.msrb.mxu2 %vm310_vm0, %v4343_v45 }
  0x53   : > { %3122 = vmatmul.msk.f32.gmra.mxu0 %vm310_vm0, %v277_v56  ;;  %v285_v56 = vld [vmem:[%s3910_s14 + $0x78] sm:$0xff] }
  0x54   : > { %3143 = vmatmul.msk.f32.gmra.mxu3 %vm310_vm0, %v298_v5  ;;  %3304 = vmatpush.xpose.msk.msrb.mxu0 %vm310_vm0, %v4353_v55  ;;  %v4384_v5 = vld [vmem:[%s6421_s0 + $0x188] sm:$0xff] }
  0x55   : > { %3130 = vmatmul.msk.f32.gmra.mxu1 %vm310_vm0, %v285_v56  ;;  %6470 = vst [vmem:[#allocation5_spill] sm:$0xff] %v4384_v5  ;;  %3257 = vmatpush.xpose.msk.msrb.mxu3 %vm310_vm0, %v4378_v4  ;;  %v4402_v56 = vld [vmem:[%s6421_s0] sm:$0xff] }
  0x56   : > { %3161 = vmatpush.xpose.msk.msrb.mxu1 %vm310_vm0, %v4366_v58  ;;  %3209 = vmatpush.xpose.msk.msrb.mxu2 %vm310_vm0, %v4373_v3 }
  0x58   : > { %3305 = vmatpush.xpose.msk.msrb.mxu0 %vm310_vm0, %v4384_v5  ;;  %v4412_v5 = vld [vmem:[%s6421_s0 + $0x100] sm:$0xff] }
  0x59   : > { %3258 = vmatpush.xpose.msk.msrb.mxu3 %vm310_vm0, %v4412_v5 }
  0x5a   : > { %3162 = vmatpush.xpose.msk.msrb.mxu1 %vm310_vm0, %v4402_v56 }
  0x5c   : > { %3144 = vmatmul.msk.f32.gmra.mxu3 %vm310_vm0, %v299_v31  ;;  %v301_v31 = vld [vmem:[%s3910_s14 + $0xf8] sm:$0xff]  ;;  %s3060_s14 = sshll.u32 %s3056_s26, 4  ;;  %s3061_s14 = int_to_ptr.hbm [resolvable:$true] %s3060_s14 }
  0x5d   : > { %3131 = vmatmul.msk.f32.gmra.mxu1 %vm310_vm0, %v286_v22  ;;  %v4421_v22 = vld [vmem:[%s6421_s0 + $0x180] sm:$0xff]  ;;  %2190 = vmatpush.msra.mxu3 %v3946_v14  ;;  %s3768_s8 = sshra.s32 %s3061_s14, 4  ;;  %s3769_s8 = int_to_ptr.hbm [resolvable:$true] %s3768_s8 }
  0x5e   : > { %3306 = vmatpush.xpose.msk.msrb.mxu0 %vm310_vm0, %v4421_v22  ;;  %1964 = vmatpush.msra.mxu1 %v3933_v12  ;;  %v4484_v12 = vld [vmem:[%s6423_s2] ss:$0 sm:$0xff]  ;;  %s3770_s22 = scalar_lea.hbm %s3769_s8, 16  ;;  %p3775_p13 = scmp.lt.s32.totalorder %s3769_s8, %s6426_s5 }
  0x5f   : > { %2191 = vmatpush.msra.mxu3 %v3972_v18  ;;  %p3771_p10 = scmp.ne.s32.totalorder %s3769_s8, %s3770_s22  ;;  %p3776_p0 = scmp.lt.s32.totalorder %s3774_s11, %s3770_s22 }
  0x60   : > { %1965 = vmatpush.msra.mxu1 %v3960_v16 }
  0x61   : > { %2192 = vmatpush.msra.mxu3 %v4003_v25  ;;  %p3772_p11 = pnand %p3771_p10, %p3887_p5  ;;  %p3777_p1 = por %p3776_p0, %p3775_p13 }
  0x62   : > { %2303 = vmatpush.msra.mxu0 %v3951_v15  ;;  %1966 = vmatpush.msra.mxu1 %v3991_v23 }
  0x63   : > { %2193 = vmatpush.msra.mxu3 %v4034_v29  ;;  %p3773_p12 = pneg %p3772_p11 }
  0x64   : > { %3145 = vmatmul.msk.f32.gmra.mxu3 %vm310_vm0, %v300_v57  ;;  %v4407_v57 = vld [vmem:[%s6421_s0 + $0x80] sm:$0xff]  ;;  %2304 = vmatpush.msra.mxu0 %v3977_v19 }
  0x65   : > { %3210 = vmatpush.xpose.msk.msrb.mxu2 %vm310_vm0, %v4407_v57  ;;  %1967 = vmatpush.msra.mxu1 %v4022_v27  ;;  %p3778_p2 = pnand %p3777_p1, %p3773_p12 }
  0x66   : > { %2305 = vmatpush.msra.mxu0 %v4010_v26  ;;  %2194 = vmatpush.msra.mxu3 %v4066_v37 }
  0x67   : > { %1968 = vmatpush.msra.mxu1 %v4054_v35 }
  0x68   : > { %2306 = vmatpush.msra.mxu0 %v4039_v30  ;;  %2195 = vmatpush.msra.mxu3 %v4098_v41 }
  0x69   : > { %2077 = vmatpush.msra.mxu2 %v3941_v13  ;;  %1969 = vmatpush.msra.mxu1 %v4086_v39  ;;  %v6471_v13 = vld [vmem:[#allocation5_spill] sm:$0xff] }
  0x6a   : > { %2307 = vmatpush.msra.mxu0 %v4074_v38  ;;  %2196 = vmatpush.msra.mxu3 %v4130_v49 }
  0x6b   : > { %2078 = vmatpush.msra.mxu2 %v3967_v17  ;;  %1970 = vmatpush.msra.mxu1 %v4118_v47 }
  0x6c   : > { %3146 = vmatmul.msk.f32.gmra.mxu3 %vm310_vm0, %v301_v31  ;;  %2308 = vmatpush.msra.mxu0 %v4103_v42 }
  0x6d   : > { %2079 = vmatpush.msra.mxu2 %v3998_v24  ;;  %2197 = vmatpush.msra.mxu3 %v4162_v53 }
  0x6e   : > { %2309 = vmatpush.msra.mxu0 %v4138_v50  ;;  %1971 = vmatpush.msra.mxu1 %v4150_v51 }
  0x6f   : > { %2080 = vmatpush.msra.mxu2 %v4029_v28  ;;  %2198 = vmatpush.msra.mxu3 %v4194_v61 }
  0x70   : > { %2310 = vmatpush.msra.mxu0 %v4167_v54  ;;  %1972 = vmatpush.msra.mxu1 %v4182_v59 }
  0x71   : > { %2081 = vmatpush.msra.mxu2 %v4061_v36  ;;  %2199 = vmatpush.msra.mxu3 %v4226_v1 }
  0x72   : > { %2311 = vmatpush.msra.mxu0 %v4202_v62  ;;  %1973 = vmatpush.msra.mxu1 %v4214_v63 }
  0x73   : > { %2082 = vmatpush.msra.mxu2 %v4093_v40  ;;  %2200 = vmatpush.msra.mxu3 %v4257_v8 }
  0x74   : > { %2312 = vmatpush.msra.mxu0 %v4231_v2  ;;  %1974 = vmatpush.msra.mxu1 %v4245_v6 }
  0x75   : > { %2083 = vmatpush.msra.mxu2 %v4125_v48  ;;  %2201 = vmatpush.msra.mxu3 %v4288_v20 }
  0x76   : > { %2313 = vmatpush.msra.mxu0 %v4264_v9  ;;  %1975 = vmatpush.msra.mxu1 %v4276_v10 }
  0x77   : > { %2084 = vmatpush.msra.mxu2 %v4157_v52  ;;  %2202 = vmatpush.msra.mxu3 %v4318_v34 }
  0x78   : > { %2314 = vmatpush.msra.mxu0 %v4293_v21  ;;  %1976 = vmatpush.msra.mxu1 %v4306_v32 }
  0x79   : > { %2085 = vmatpush.msra.mxu2 %v4189_v60  ;;  %2203 = vmatpush.msra.mxu3 %v4348_v46 }
  0x7a   : > { %2315 = vmatpush.msra.mxu0 %v4324_v43  ;;  %1977 = vmatpush.msra.mxu1 %v4336_v44 }
  0x7b   : > { %2086 = vmatpush.msra.mxu2 %v4221_v0  ;;  %2204 = vmatpush.msra.mxu3 %v4378_v4 }
  0x7c   : > { %2316 = vmatpush.msra.mxu0 %v4353_v55  ;;  %1978 = vmatpush.msra.mxu1 %v4366_v58 }
  0x7d   : > { %2087 = vmatpush.msra.mxu2 %v4252_v7  ;;  %2205 = vmatpush.msra.mxu3 %v4412_v5 }
  0x7e   : > { %2317 = vmatpush.msra.mxu0 %v6471_v13  ;;  %1979 = vmatpush.msra.mxu1 %v4402_v56 }
  0x7f   : > { %2088 = vmatpush.msra.mxu2 %v4283_v11 }
  0x80   : > { %2318 = vmatpush.msra.mxu0 %v4421_v22 }
  0x81   : > { %2089 = vmatpush.msra.mxu2 %v4313_v33 }
  0x83   : > { %2090 = vmatpush.msra.mxu2 %v4343_v45 }
  0x85   : > { %2091 = vmatpush.msra.mxu2 %v4373_v3 }
  0x87   : > { %2092 = vmatpush.msra.mxu2 %v4407_v57 }
  0x98   : > { %v424_v14 = vpop.f32.mrf.mxu0 }
  0x99   : > { %v425_v15 = vadd.f32 %v4484_v12, %v424_v14 }
  0x9a   : > { %v448_v29 = vpop.f32.mrf.mxu1 }
  0x9b   : > { %3163 = vmatmul.msk.f32.vlgmr.msrb.gmra.mxu1 %vm310_vm0, %v425_v15  ;;  %3211 = vmatmul.msk.f32.vlgmr.msrb.gmra.mxu2 %vm310_vm0, %v425_v15  ;;  %v449_v48 = vadd.f32 %v4484_v12, %v448_v29 }
  0x9c   : > { %3259 = vmatmul.msk.f32.vlgmr.msrb.gmra.mxu3 %vm310_vm0, %v425_v15  ;;  %3307 = vmatmul.msk.f32.vlgmr.msrb.gmra.mxu0 %vm310_vm0, %v425_v15 }
  0x9f   : > { %v4512_v25 = vpop.f32.mrf.mxu3 }
  0xa0   : > { %v427_v16 = vpop.f32.mrf.mxu0 }
  0xa1   : > { %v428_v17 = vadd.f32 %v4484_v12, %v427_v16 }
  0xa2   : > { %v451_v38 = vpop.f32.mrf.mxu1 }
  0xa3   : > { %3164 = vmatmul.msk.f32.gmra.mxu1 %vm310_vm0, %v428_v17  ;;  %3212 = vmatmul.msk.f32.gmra.mxu2 %vm310_vm0, %v428_v17  ;;  %v452_v51 = vadd.f32 %v4484_v12, %v451_v38  ;;  %v475_v62 = vpop.f32.mrf.mxu2 }
  0xa4   : > { %3260 = vmatmul.msk.f32.gmra.mxu3 %vm310_vm0, %v428_v17  ;;  %3308 = vmatmul.msk.f32.gmra.mxu0 %vm310_vm0, %v428_v17  ;;  %v476_v3 = vadd.f32 %v4484_v12, %v475_v62 }
  0xa7   : > { %v4521_v28 = vpop.f32.mrf.mxu3 }
  0xa8   : > { %v430_v18 = vpop.f32.mrf.mxu0 }
  0xa9   : > { %v431_v19 = vadd.f32 %v4484_v12, %v430_v18 }
  0xaa   : > { %v454_v47 = vpop.f32.mrf.mxu1 }
  0xab   : > { %3165 = vmatmul.msk.f32.gmra.mxu1 %vm310_vm0, %v431_v19  ;;  %3213 = vmatmul.msk.f32.gmra.mxu2 %vm310_vm0, %v431_v19  ;;  %v455_v54 = vadd.f32 %v4484_v12, %v454_v47  ;;  %v478_v2 = vpop.f32.mrf.mxu2 }
  0xac   : > { %3261 = vmatmul.msk.f32.gmra.mxu3 %vm310_vm0, %v431_v19  ;;  %3309 = vmatmul.msk.f32.gmra.mxu0 %vm310_vm0, %v431_v19  ;;  %v479_v14 = vadd.f32 %v4484_v12, %v478_v2 }
  0xaf   : > { %v4530_v36 = vpop.f32.mrf.mxu3 }
  0xb0   : > { %v433_v23 = vpop.f32.mrf.mxu0 }
  0xb1   : > { %v434_v24 = vadd.f32 %v4484_v12, %v433_v23 }
  0xb2   : > { %v457_v50 = vpop.f32.mrf.mxu1 }
  0xb3   : > { %3166 = vmatmul.msk.f32.gmra.mxu1 %vm310_vm0, %v434_v24  ;;  %3214 = vmatmul.msk.f32.gmra.mxu2 %vm310_vm0, %v434_v24  ;;  %v458_v61 = vadd.f32 %v4484_v12, %v457_v50  ;;  %v481_v10 = vpop.f32.mrf.mxu2 }
  0xb4   : > { %3262 = vmatmul.msk.f32.gmra.mxu3 %vm310_vm0, %v434_v24  ;;  %3310 = vmatmul.msk.f32.gmra.mxu0 %vm310_vm0, %v434_v24 }
  0xb7   : > { %v4537_v40 = vpop.f32.mrf.mxu3 }
  0xb8   : > { %v436_v26 = vpop.f32.mrf.mxu0 }
  0xb9   : > { %v437_v27 = vadd.f32 %v4484_v12, %v436_v26  ;;  %v482_v26 = vadd.f32 %v4484_v12, %v481_v10 }
  0xba   : > { %v460_v53 = vpop.f32.mrf.mxu1 }
  0xbb   : > { %3167 = vmatmul.msk.f32.gmra.mxu1 %vm310_vm0, %v437_v27  ;;  %3215 = vmatmul.msk.f32.gmra.mxu2 %vm310_vm0, %v437_v27  ;;  %v461_v0 = vadd.f32 %v4484_v12, %v460_v53  ;;  %v484_v32 = vpop.f32.mrf.mxu2 }
  0xbc   : > { %3263 = vmatmul.msk.f32.gmra.mxu3 %vm310_vm0, %v437_v27  ;;  %3311 = vmatmul.msk.f32.gmra.mxu0 %vm310_vm0, %v437_v27 }
  0xbf   : > { %v4545_v49 = vpop.f32.mrf.mxu3 }
  0xc0   : > { %v439_v30 = vpop.f32.mrf.mxu0 }
  0xc1   : > { %v440_v35 = vadd.f32 %v4484_v12, %v439_v30 }
  0xc2   : > { %v463_v60 = vpop.f32.mrf.mxu1 }
  0xc3   : > { %3168 = vmatmul.msk.f32.gmra.mxu1 %vm310_vm0, %v440_v35  ;;  %3216 = vmatmul.msk.f32.gmra.mxu2 %vm310_vm0, %v440_v35  ;;  %v464_v6 = vadd.f32 %v4484_v12, %v463_v60  ;;  %v488_v60 = vadd.f32 %v4484_v12, %v4512_v25 }
  0xc4   : > { %3264 = vmatmul.msk.f32.gmra.mxu3 %vm310_vm0, %v440_v35  ;;  %3312 = vmatmul.msk.f32.gmra.mxu0 %vm310_vm0, %v440_v35 }
  0xc7   : > { %v4554_v52 = vpop.f32.mrf.mxu3 }
  0xc8   : > { %v442_v37 = vpop.f32.mrf.mxu0 }
  0xc9   : > { %v443_v39 = vadd.f32 %v4484_v12, %v442_v37 }
  0xca   : > { %v466_v1 = vpop.f32.mrf.mxu1 }
  0xcb   : > { %3169 = vmatmul.msk.f32.gmra.mxu1 %vm310_vm0, %v443_v39  ;;  %3217 = vmatmul.msk.f32.gmra.mxu2 %vm310_vm0, %v443_v39  ;;  %v467_v9 = vadd.f32 %v4484_v12, %v466_v1 }
  0xcc   : > { %3265 = vmatmul.msk.f32.gmra.mxu3 %vm310_vm0, %v443_v39  ;;  %3313 = vmatmul.msk.f32.gmra.mxu0 %vm310_vm0, %v443_v39 }
  0xcf   : > { %v4563_v59 = vpop.f32.mrf.mxu3 }
  0xd0   : > { %v445_v41 = vpop.f32.mrf.mxu0 }
  0xd1   : > { %v446_v42 = vadd.f32 %v4484_v12, %v445_v41  ;;  %v485_v41 = vadd.f32 %v4484_v12, %v484_v32 }
  0xd2   : > { %v469_v8 = vpop.f32.mrf.mxu1 }
  0xd3   : > { %3170 = vmatmul.msk.f32.gmra.mxu1 %vm310_vm0, %v446_v42  ;;  %3218 = vmatmul.msk.f32.gmra.mxu2 %vm310_vm0, %v446_v42  ;;  %v470_v21 = vadd.f32 %v4484_v12, %v469_v8  ;;  %v491_v8 = vadd.f32 %v4484_v12, %v4521_v28 }
  0xd4   : > { %3266 = vmatmul.msk.f32.gmra.mxu3 %vm310_vm0, %v446_v42  ;;  %3314 = vmatmul.msk.f32.gmra.mxu0 %vm310_vm0, %v446_v42 }
  0xd7   : > { %v4570_v63 = vpop.f32.mrf.mxu3 }
  0xda   : > { %v472_v20 = vpop.f32.mrf.mxu1 }
  0xdb   : > { %3171 = vmatmul.msk.f32.gmra.mxu1 %vm310_vm0, %v449_v48  ;;  %3219 = vmatmul.msk.f32.gmra.mxu2 %vm310_vm0, %v449_v48  ;;  %v473_v43 = vadd.f32 %v4484_v12, %v472_v20 }
  0xdc   : > { %3267 = vmatmul.msk.f32.gmra.mxu3 %vm310_vm0, %v449_v48  ;;  %3315 = vmatmul.msk.f32.gmra.mxu0 %vm310_vm0, %v449_v48 }
  0xdf   : > { %v4578_v7 = vpop.f32.mrf.mxu3 }
  0xe3   : > { %3172 = vmatmul.msk.f32.gmra.mxu1 %vm310_vm0, %v452_v51  ;;  %3220 = vmatmul.msk.f32.gmra.mxu2 %vm310_vm0, %v452_v51 }
  0xe4   : > { %3268 = vmatmul.msk.f32.gmra.mxu3 %vm310_vm0, %v452_v51  ;;  %3316 = vmatmul.msk.f32.gmra.mxu0 %vm310_vm0, %v452_v51 }
  0xe7   : > { %v4587_v11 = vpop.f32.mrf.mxu3 }
  0xeb   : > { %3173 = vmatmul.msk.f32.gmra.mxu1 %vm310_vm0, %v455_v54  ;;  %3221 = vmatmul.msk.f32.gmra.mxu2 %vm310_vm0, %v455_v54 }
  0xec   : > { %3269 = vmatmul.msk.f32.gmra.mxu3 %vm310_vm0, %v455_v54  ;;  %3317 = vmatmul.msk.f32.gmra.mxu0 %vm310_vm0, %v455_v54 }
  0xef   : > { %v4596_v33 = vpop.f32.mrf.mxu3 }
  0xf3   : > { %3174 = vmatmul.msk.f32.gmra.mxu1 %vm310_vm0, %v458_v61  ;;  %3222 = vmatmul.msk.f32.gmra.mxu2 %vm310_vm0, %v458_v61 }
  0xf4   : > { %3270 = vmatmul.msk.f32.gmra.mxu3 %vm310_vm0, %v458_v61  ;;  %3318 = vmatmul.msk.f32.gmra.mxu0 %vm310_vm0, %v458_v61 }
  0xfb   : > { %3175 = vmatmul.msk.f32.gmra.mxu1 %vm310_vm0, %v461_v0  ;;  %3223 = vmatmul.msk.f32.gmra.mxu2 %vm310_vm0, %v461_v0 }
  0xfc   : > { %3271 = vmatmul.msk.f32.gmra.mxu3 %vm310_vm0, %v461_v0  ;;  %3319 = vmatmul.msk.f32.gmra.mxu0 %vm310_vm0, %v461_v0 }
 0x103   : > { %3176 = vmatmul.msk.f32.gmra.mxu1 %vm310_vm0, %v464_v6  ;;  %3224 = vmatmul.msk.f32.gmra.mxu2 %vm310_vm0, %v464_v6 }
 0x104   : > { %3272 = vmatmul.msk.f32.gmra.mxu3 %vm310_vm0, %v464_v6  ;;  %3320 = vmatmul.msk.f32.gmra.mxu0 %vm310_vm0, %v464_v6 }
 0x10b   : > { %3177 = vmatmul.msk.f32.gmra.mxu1 %vm310_vm0, %v467_v9  ;;  %3225 = vmatmul.msk.f32.gmra.mxu2 %vm310_vm0, %v467_v9 }
 0x10c   : > { %3273 = vmatmul.msk.f32.gmra.mxu3 %vm310_vm0, %v467_v9  ;;  %3321 = vmatmul.msk.f32.gmra.mxu0 %vm310_vm0, %v467_v9 }
 0x113   : > { %3178 = vmatmul.msk.f32.gmra.mxu1 %vm310_vm0, %v470_v21  ;;  %3226 = vmatmul.msk.f32.gmra.mxu2 %vm310_vm0, %v470_v21 }
 0x114   : > { %3274 = vmatmul.msk.f32.gmra.mxu3 %vm310_vm0, %v470_v21  ;;  %3322 = vmatmul.msk.f32.gmra.mxu0 %vm310_vm0, %v470_v21 }
 0x118   : > { %v4598_v34 = vpop.f32.mrf.mxu1 }
 0x119   : > { %v4601_v44 = vpop.f32.mrf.mxu0 }
 0x11b   : > { %3179 = vmatmul.msk.f32.gmra.mxu1 %vm310_vm0, %v473_v43  ;;  %3227 = vmatmul.msk.f32.gmra.mxu2 %vm310_vm0, %v473_v43 }
 0x11c   : > { %3275 = vmatmul.msk.f32.gmra.mxu3 %vm310_vm0, %v473_v43  ;;  %3323 = vmatmul.msk.f32.gmra.mxu0 %vm310_vm0, %v473_v43 }
 0x11e   : > { %v4607_v45 = vpop.f32.mrf.mxu2 }
 0x11f   : > { %v1260_v46 = vmax.f32 %v4598_v34, %v4607_v45  ;;  %v4611_v55 = vpop.f32.mrf.mxu3 }
 0x120   : > { %v4613_v58 = vpop.f32.mrf.mxu1 }
 0x121   : > { %v4616_v4 = vpop.f32.mrf.mxu0  ;;  %v1261_v5 = vmax.f32 %v1260_v46, %v4611_v55  ;;  %v494_v46 = vadd.f32 %v4484_v12, %v4530_v36 }
 0x123   : > { %3180 = vmatmul.msk.f32.gmra.mxu1 %vm310_vm0, %v476_v3  ;;  %3228 = vmatmul.msk.f32.gmra.mxu2 %vm310_vm0, %v476_v3  ;;  %v1262_v31 = vmax.f32 %v1261_v5, %v4601_v44 }
 0x124   : > { %3276 = vmatmul.msk.f32.gmra.mxu3 %vm310_vm0, %v476_v3  ;;  %3324 = vmatmul.msk.f32.gmra.mxu0 %vm310_vm0, %v476_v3 }
 0x125   : > { %1263 = vmax.xlane.f32.xlu0 %v1262_v31 }
 0x126   : > { %v4624_v56 = vpop.f32.mrf.mxu2 }
 0x127   : > { %v1265_v57 = vmax.f32 %v4613_v58, %v4624_v56  ;;  %v4628_v22 = vpop.f32.mrf.mxu3 }
 0x128   : > { %v4630_v13 = vpop.f32.mrf.mxu1 }
 0x129   : > { %v4633_v15 = vpop.f32.mrf.mxu0  ;;  %v1266_v16 = vmax.f32 %v1265_v57, %v4628_v22 }
 0x12b   : > { %3181 = vmatmul.msk.f32.gmra.mxu1 %vm310_vm0, %v479_v14  ;;  %3229 = vmatmul.msk.f32.gmra.mxu2 %vm310_vm0, %v479_v14  ;;  %v1267_v17 = vmax.f32 %v1266_v16, %v4616_v4 }
 0x12c   : > { %3277 = vmatmul.msk.f32.gmra.mxu3 %vm310_vm0, %v479_v14  ;;  %3325 = vmatmul.msk.f32.gmra.mxu0 %vm310_vm0, %v479_v14 }
 0x12d   : > { %1268 = vmax.xlane.f32.xlu0 %v1267_v17  ;;  %v497_v17 = vadd.f32 %v4484_v12, %v4537_v40 }
 0x12e   : > { %v4641_v18 = vpop.f32.mrf.mxu2 }
 0x12f   : > { %v1270_v19 = vmax.f32 %v4630_v13, %v4641_v18  ;;  %v4645_v23 = vpop.f32.mrf.mxu3 }
 0x130   : > { %v4647_v24 = vpop.f32.mrf.mxu1 }
 0x131   : > { %v4650_v27 = vpop.f32.mrf.mxu0  ;;  %v1271_v29 = vmax.f32 %v1270_v19, %v4645_v23 }
 0x133   : > { %3182 = vmatmul.msk.f32.gmra.mxu1 %vm310_vm0, %v482_v26  ;;  %3230 = vmatmul.msk.f32.gmra.mxu2 %vm310_vm0, %v482_v26  ;;  %v1272_v30 = vmax.f32 %v1271_v29, %v4633_v15 }
 0x134   : > { %3278 = vmatmul.msk.f32.gmra.mxu3 %vm310_vm0, %v482_v26  ;;  %3326 = vmatmul.msk.f32.gmra.mxu0 %vm310_vm0, %v482_v26 }
 0x135   : > { %1273 = vmax.xlane.f32.xlu1 %v1272_v30 }
 0x136   : > { %v4658_v35 = vpop.f32.mrf.mxu2 }
 0x137   : > { %v1275_v37 = vmax.f32 %v4647_v24, %v4658_v35  ;;  %v4662_v38 = vpop.f32.mrf.mxu3 }
 0x138   : > { %v4664_v39 = vpop.f32.mrf.mxu1 }
 0x139   : > { %v4667_v42 = vpop.f32.mrf.mxu0  ;;  %v1276_v47 = vmax.f32 %v1275_v37, %v4662_v38 }
 0x13b   : > { %3183 = vmatmul.msk.f32.gmra.mxu1 %vm310_vm0, %v485_v41  ;;  %3231 = vmatmul.msk.f32.gmra.mxu2 %vm310_vm0, %v485_v41  ;;  %v1277_v48 = vmax.f32 %v1276_v47, %v4650_v27  ;;  %v500_v47 = vadd.f32 %v4484_v12, %v4545_v49 }
 0x13c   : > { %3279 = vmatmul.msk.f32.gmra.mxu3 %vm310_vm0, %v485_v41  ;;  %3327 = vmatmul.msk.f32.gmra.mxu0 %vm310_vm0, %v485_v41 }
 0x13d   : > { %1278 = vmax.xlane.f32.xlu1 %v1277_v48 }
 0x13e   : > { %v4675_v50 = vpop.f32.mrf.mxu2 }
 0x13f   : > { %v1280_v51 = vmax.f32 %v4664_v39, %v4675_v50  ;;  %v4679_v53 = vpop.f32.mrf.mxu3 }
 0x140   : > { %v4681_v54 = vpop.f32.mrf.mxu1 }
 0x141   : > { %v4685_v61 = vpop.f32.mrf.mxu0  ;;  %v1281_v62 = vmax.f32 %v1280_v51, %v4679_v53 }
 0x143   : > { %3184 = vmatmul.msk.f32.gmra.mxu1 %vm310_vm0, %v488_v60  ;;  %3232 = vmatmul.msk.f32.gmra.mxu2 %vm310_vm0, %v488_v60  ;;  %v1282_v0 = vmax.f32 %v1281_v62, %v4667_v42 }
 0x144   : > { %3280 = vmatmul.msk.f32.gmra.mxu3 %vm310_vm0, %v488_v60  ;;  %3328 = vmatmul.msk.f32.gmra.mxu0 %vm310_vm0, %v488_v60 }
 0x145   : > { %1283 = vmax.xlane.f32.xlu2 %v1282_v0 }
 0x146   : > { %v4693_v1 = vpop.f32.mrf.mxu2 }
 0x147   : > { %v1285_v25 = vmax.f32 %v4681_v54, %v4693_v1  ;;  %v4697_v2 = vpop.f32.mrf.mxu3 }
 0x148   : > { %v4699_v6 = vpop.f32.mrf.mxu1 }
 0x149   : > { %v4703_v9 = vpop.f32.mrf.mxu0  ;;  %v1286_v10 = vmax.f32 %v1285_v25, %v4697_v2 }
 0x14b   : > { %3185 = vmatmul.msk.f32.gmra.mxu1 %vm310_vm0, %v491_v8  ;;  %3233 = vmatmul.msk.f32.gmra.mxu2 %vm310_vm0, %v491_v8  ;;  %v1287_v20 = vmax.f32 %v1286_v10, %v4685_v61 }
 0x14c   : > { %3281 = vmatmul.msk.f32.gmra.mxu3 %vm310_vm0, %v491_v8  ;;  %3329 = vmatmul.msk.f32.gmra.mxu0 %vm310_vm0, %v491_v8  ;;  %v503_v8 = vadd.f32 %v4484_v12, %v4554_v52 }
 0x14d   : > { %1288 = vmax.xlane.f32.xlu2 %v1287_v20 }
 0x14e   : > { %v4711_v21 = vpop.f32.mrf.mxu2 }
 0x14f   : > { %v1290_v28 = vmax.f32 %v4699_v6, %v4711_v21  ;;  %v4715_v32 = vpop.f32.mrf.mxu3 }
 0x150   : > { %v4717_v43 = vpop.f32.mrf.mxu1 }
 0x151   : > { %v4721_v3 = vpop.f32.mrf.mxu0  ;;  %v1291_v5 = vmax.f32 %v1290_v28, %v4715_v32 }
 0x153   : > { %3186 = vmatmul.msk.f32.gmra.mxu1 %vm310_vm0, %v494_v46  ;;  %3234 = vmatmul.msk.f32.gmra.mxu2 %vm310_vm0, %v494_v46  ;;  %v1292_v31 = vmax.f32 %v1291_v5, %v4703_v9 }
 0x154   : > { %3282 = vmatmul.msk.f32.gmra.mxu3 %vm310_vm0, %v494_v46  ;;  %3330 = vmatmul.msk.f32.gmra.mxu0 %vm310_vm0, %v494_v46 }
 0x155   : > { %1293 = vmax.xlane.f32.xlu0 %v1292_v31 }
 0x156   : > { %v4729_v57 = vpop.f32.mrf.mxu2 }
 0x157   : > { %v1295_v36 = vmax.f32 %v4717_v43, %v4729_v57  ;;  %v4733_v14 = vpop.f32.mrf.mxu3 }
 0x158   : > { %v4735_v16 = vpop.f32.mrf.mxu1 }
 0x159   : > { %v4739_v19 = vpop.f32.mrf.mxu0  ;;  %v1296_v26 = vmax.f32 %v1295_v36, %v4733_v14  ;;  %v506_v36 = vadd.f32 %v4484_v12, %v4563_v59 }
 0x15b   : > { %3187 = vmatmul.msk.f32.gmra.mxu1 %vm310_vm0, %v497_v17  ;;  %3235 = vmatmul.msk.f32.gmra.mxu2 %vm310_vm0, %v497_v17  ;;  %v1297_v29 = vmax.f32 %v1296_v26, %v4721_v3 }
 0x15c   : > { %3283 = vmatmul.msk.f32.gmra.mxu3 %vm310_vm0, %v497_v17  ;;  %3331 = vmatmul.msk.f32.gmra.mxu0 %vm310_vm0, %v497_v17 }
 0x15d   : > { %1298 = vmax.xlane.f32.xlu1 %v1297_v29 }
 0x15e   : > { %v4747_v30 = vpop.f32.mrf.mxu2 }
 0x15f   : > { %v1300_v40 = vmax.f32 %v4735_v16, %v4747_v30  ;;  %v4751_v37 = vpop.f32.mrf.mxu3 }
 0x160   : > { %v4753_v41 = vpop.f32.mrf.mxu1 }
 0x161   : > { %v4757_v48 = vpop.f32.mrf.mxu0  ;;  %v1301_v51 = vmax.f32 %v1300_v40, %v4751_v37 }
 0x163   : > { %3188 = vmatmul.msk.f32.gmra.mxu1 %vm310_vm0, %v500_v47  ;;  %3236 = vmatmul.msk.f32.gmra.mxu2 %vm310_vm0, %v500_v47  ;;  %v1302_v60 = vmax.f32 %v1301_v51, %v4739_v19 }
 0x164   : > { %3284 = vmatmul.msk.f32.gmra.mxu3 %vm310_vm0, %v500_v47  ;;  %3332 = vmatmul.msk.f32.gmra.mxu0 %vm310_vm0, %v500_v47 }
 0x165   : > { %1303 = vmax.xlane.f32.xlu2 %v1302_v60  ;;  %v509_v60 = vadd.f32 %v4484_v12, %v4570_v63 }
 0x166   : > { %v4765_v62 = vpop.f32.mrf.mxu2 }
 0x167   : > { %v1305_v49 = vmax.f32 %v4753_v41, %v4765_v62  ;;  %v4769_v0 = vpop.f32.mrf.mxu3 }
 0x168   : > { %v4771_v25 = vpop.f32.mrf.mxu1 }
 0x169   : > { %v4775_v10 = vpop.f32.mrf.mxu0  ;;  %v1306_v20 = vmax.f32 %v1305_v49, %v4769_v0 }
 0x16b   : > { %3189 = vmatmul.msk.f32.gmra.mxu1 %vm310_vm0, %v503_v8  ;;  %3237 = vmatmul.msk.f32.gmra.mxu2 %vm310_vm0, %v503_v8  ;;  %v1307_v28 = vmax.f32 %v1306_v20, %v4757_v48 }
 0x16c   : > { %3285 = vmatmul.msk.f32.gmra.mxu3 %vm310_vm0, %v503_v8  ;;  %3333 = vmatmul.msk.f32.gmra.mxu0 %vm310_vm0, %v503_v8 }
 0x16d   : > { %1308 = vmax.xlane.f32.xlu0 %v1307_v28 }
 0x16e   : > { %v4783_v46 = vpop.f32.mrf.mxu2 }
 0x16f   : > { %v1310_v52 = vmax.f32 %v4771_v25, %v4783_v46  ;;  %v4787_v5 = vpop.f32.mrf.mxu3 }
 0x170   : > { %v4789_v31 = vpop.f32.mrf.mxu1 }
 0x171   : > { %v4793_v17 = vpop.f32.mrf.mxu0  ;;  %v1311_v26 = vmax.f32 %v1310_v52, %v4787_v5 }
 0x172   : > { %6472 = vst [vmem:[#allocation5_spill] sm:$0xff] %v4793_v17 }
 0x173   : > { %3190 = vmatmul.msk.f32.gmra.mxu1 %vm310_vm0, %v506_v36  ;;  %3238 = vmatmul.msk.f32.gmra.mxu2 %vm310_vm0, %v506_v36  ;;  %v1312_v29 = vmax.f32 %v1311_v26, %v4775_v10  ;;  %v512_v26 = vadd.f32 %v4484_v12, %v4578_v7 }
 0x174   : > { %3286 = vmatmul.msk.f32.gmra.mxu3 %vm310_vm0, %v506_v36  ;;  %3334 = vmatmul.msk.f32.gmra.mxu0 %vm310_vm0, %v506_v36 }
 0x175   : > { %1313 = vmax.xlane.f32.xlu1 %v1312_v29 }
 0x176   : > { %v4801_v40 = vpop.f32.mrf.mxu2 }
 0x177   : > { %v1315_v59 = vmax.f32 %v4789_v31, %v4801_v40  ;;  %v4805_v47 = vpop.f32.mrf.mxu3 }
 0x178   : > { %v4807_v51 = vpop.f32.mrf.mxu1 }
 0x179   : > { %6473 = vst [vmem:[#allocation6_spill] sm:$0xff] %v4807_v51  ;;  %v4811_v49 = vpop.f32.mrf.mxu0  ;;  %v1316_v8 = vmax.f32 %v1315_v59, %v4805_v47 }
 0x17a   : > { %6474 = vst [vmem:[#allocation7_spill] sm:$0xff] %v4811_v49 }
 0x17b   : > { %3191 = vmatmul.msk.f32.gmra.mxu1 %vm310_vm0, %v509_v60  ;;  %3239 = vmatmul.msk.f32.gmra.mxu2 %vm310_vm0, %v509_v60  ;;  %v1317_v20 = vmax.f32 %v1316_v8, %v4793_v17 }
 0x17c   : > { %3287 = vmatmul.msk.f32.gmra.mxu3 %vm310_vm0, %v509_v60  ;;  %3335 = vmatmul.msk.f32.gmra.mxu0 %vm310_vm0, %v509_v60 }
 0x17d   : > { %1318 = vmax.xlane.f32.xlu2 %v1317_v20 }
 0x17e   : > { %v4819_v28 = vpop.f32.mrf.mxu2 }
 0x17f   : > { %6475 = vst [vmem:[#allocation8_spill] sm:$0xff] %v4819_v28  ;;  %v1320_v63 = vmax.f32 %v4807_v51, %v4819_v28  ;;  %v4823_v52 = vpop.f32.mrf.mxu3 }
 0x180   : > { %6476 = vst [vmem:[#allocation9_spill] sm:$0xff] %v4823_v52  ;;  %v4825_v36 = vpop.f32.mrf.mxu1 }
 0x181   : > { %6477 = vst [vmem:[#allocation10_spill] sm:$0xff] %v4825_v36  ;;  %v4829_v29 = vpop.f32.mrf.mxu0  ;;  %v1321_v59 = vmax.f32 %v1320_v63, %v4823_v52  ;;  %v515_v63 = vadd.f32 %v4484_v12, %v4587_v11 }
 0x182   : > { %6478 = vst [vmem:[#allocation11_spill] sm:$0xff] %v4829_v29 }
 0x183   : > { %3192 = vmatmul.msk.f32.gmra.mxu1 %vm310_vm0, %v512_v26  ;;  %3240 = vmatmul.msk.f32.gmra.mxu2 %vm310_vm0, %v512_v26  ;;  %v1322_v60 = vmax.f32 %v1321_v59, %v4811_v49 }
 0x184   : > { %3288 = vmatmul.msk.f32.gmra.mxu3 %vm310_vm0, %v512_v26  ;;  %3336 = vmatmul.msk.f32.gmra.mxu0 %vm310_vm0, %v512_v26 }
 0x185   : > { %1323 = vmax.xlane.f32.xlu0 %v1322_v60 }
 0x186   : > { %v4837_v8 = vpop.f32.mrf.mxu2 }
 0x187   : > { %6479 = vst [vmem:[#allocation12_spill] sm:$0xff] %v4837_v8  ;;  %v1325_v7 = vmax.f32 %v4825_v36, %v4837_v8  ;;  %v4841_v20 = vpop.f32.mrf.mxu3 }
 0x188   : > { %6480 = vst [vmem:[#allocation13_spill] sm:$0xff] %v4841_v20  ;;  %v4843_v28 = vpop.f32.mrf.mxu1 }
 0x189   : > { %6481 = vst [vmem:[#allocation14_spill] sm:$0xff] %v4843_v28  ;;  %v4847_v52 = vpop.f32.mrf.mxu0  ;;  %v1326_v59 = vmax.f32 %v1325_v7, %v4841_v20  ;;  %v518_v7 = vadd.f32 %v4484_v12, %v4596_v33 }
 0x18a   : > { %6482 = vst [vmem:[#allocation15_spill] sm:$0xff] %v4847_v52 }
 0x18b   : > { %3193 = vmatmul.msk.f32.gmra.mxu1 %vm310_vm0, %v515_v63  ;;  %3241 = vmatmul.msk.f32.gmra.mxu2 %vm310_vm0, %v515_v63  ;;  %v1327_v26 = vmax.f32 %v1326_v59, %v4829_v29 }
 0x18c   : > { %3289 = vmatmul.msk.f32.gmra.mxu3 %vm310_vm0, %v515_v63  ;;  %3337 = vmatmul.msk.f32.gmra.mxu0 %vm310_vm0, %v515_v63 }
 0x18d   : > { %1328 = vmax.xlane.f32.xlu1 %v1327_v26 }
 0x18e   : > { %v4855_v60 = vpop.f32.mrf.mxu2 }
 0x18f   : > { %6483 = vst [vmem:[#allocation16_spill] sm:$0xff] %v4855_v60  ;;  %v1330_v11 = vmax.f32 %v4843_v28, %v4855_v60  ;;  %v4859_v8 = vpop.f32.mrf.mxu3 }
 0x190   : > { %6484 = vst [vmem:[#allocation17_spill] sm:$0xff] %v4859_v8  ;;  %v4861_v36 = vpop.f32.mrf.mxu1 }
 0x191   : > { %6485 = vst [vmem:[#allocation18_spill] sm:$0xff] %v4861_v36  ;;  %v4865_v20 = vpop.f32.mrf.mxu0  ;;  %v1331_v59 = vmax.f32 %v1330_v11, %v4859_v8 }
 0x193   : > { %3194 = vmatmul.msk.f32.gmra.mxu1 %vm310_vm0, %v518_v7  ;;  %3242 = vmatmul.msk.f32.gmra.mxu2 %vm310_vm0, %v518_v7  ;;  %v1332_v63 = vmax.f32 %v1331_v59, %v4847_v52 }
 0x194   : > { %3290 = vmatmul.msk.f32.gmra.mxu3 %vm310_vm0, %v518_v7  ;;  %3338 = vmatmul.msk.f32.gmra.mxu0 %vm310_vm0, %v518_v7 }
 0x195   : > { %1333 = vmax.xlane.f32.xlu2 %v1332_v63 }
 0x196   : > { %v4873_v26 = vpop.f32.mrf.mxu2 }
 0x197   : > { %6486 = vst [vmem:[#allocation19_spill] sm:$0xff] %v4873_v26  ;;  %v1335_v12 = vmax.f32 %v4861_v36, %v4873_v26  ;;  %v4877_v33 = vpop.f32.mrf.mxu3 }
 0x198   : > { %v1264_v60 = vpop.xlane.xlu0 %1263  ;;  %v4879_v11 = vpop.f32.mrf.mxu1 }
 0x199   : > { %6487 = vst [vmem:[#allocation20_spill] sm:$0xff] %v4879_v11  ;;  %v4881_v8 = vpop.f32.mrf.mxu0  ;;  %v1420_v28 = vsub.f32 %v4598_v34, %v1264_v60  ;;  %v1421_v59 = vsub.f32 %v4607_v45, %v1264_v60  ;;  %v1422_v52 = vsub.f32 %v4611_v55, %v1264_v60  ;;  %v1423_v7 = vsub.f32 %v4601_v44, %v1264_v60 }
 0x19a   : > { %v1336_v63 = vmax.f32 %v1335_v12, %v4877_v33 }
 0x19b   : > { %v1548_v29 = vmul.f32 1.442695, %v1420_v28  ;;  %v1550_v49 = vmul.f32 1.442695, %v1421_v59  ;;  %v1552_v26 = vmul.f32 1.442695, %v1422_v52 }
 0x19c   : > { %v1554_v36 = vmul.f32 1.442695, %v1423_v7  ;;  %v1337_v51 = vmax.f32 %v1336_v63, %v4865_v20 }
 0x19d   : > { %3434 = vpow2.f32 %v1548_v29 }
 0x19e   : > { %3436 = vpow2.f32 %v1550_v49  ;;  %1338 = vmax.xlane.f32.xlu0 %v1337_v51  ;;  %v4889_v17 = vpop.f32.mrf.mxu2 }
 0x19f   : > { %6488 = vst [vmem:[#allocation21_spill] sm:$0xff] %v4889_v17  ;;  %3438 = vpow2.f32 %v1552_v26  ;;  %v1340_v34 = vmax.f32 %v4879_v11, %v4889_v17  ;;  %v4893_v45 = vpop.f32.mrf.mxu3 }
 0x1a0   : > { %3440 = vpow2.f32 %v1554_v36  ;;  %v1269_v44 = vpop.xlane.xlu0 %1268  ;;  %v4895_v55 = vpop.f32.mrf.mxu1 }
 0x1a1   : > { %6489 = vst [vmem:[#allocation22_spill] sm:$0xff] %v4895_v55  ;;  %v4897_v28 = vpop.f32.mrf.mxu0  ;;  %v1424_v52 = vsub.f32 %v4613_v58, %v1269_v44  ;;  %v1425_v29 = vsub.f32 %v4624_v56, %v1269_v44  ;;  %v1426_v51 = vsub.f32 %v4628_v22, %v1269_v44  ;;  %v1427_v49 = vsub.f32 %v4616_v4, %v1269_v44 }
 0x1a2   : > { %v1341_v60 = vmax.f32 %v1340_v34, %v4893_v45 }
 0x1a3   : > { %v3435_v26 = vpop.eup %3434  ;;  %v1556_v12 = vmul.f32 1.442695, %v1424_v52  ;;  %v1558_v59 = vmul.f32 1.442695, %v1425_v29  ;;  %v1560_v7 = vmul.f32 1.442695, %v1426_v51 }
 0x1a4   : > { %v3437_v36 = vpop.eup %3436  ;;  %v1562_v63 = vmul.f32 1.442695, %v1427_v49  ;;  %1980 = vmatmul.f32.vlgmr.msra.gmra.mxu1 %v3435_v26  ;;  %v1342_v17 = vmax.f32 %v1341_v60, %v4881_v8 }
 0x1a5   : > { %v3439_v11 = vpop.eup %3438  ;;  %3442 = vpow2.f32 %v1556_v12  ;;  %2093 = vmatmul.f32.vlgmr.msra.gmra.mxu2 %v3437_v36  ;;  %v1804_v58 = vadd.f32 %v3437_v36, %v3435_v26 }
 0x1a6   : > { %v3441_v56 = vpop.eup %3440  ;;  %3444 = vpow2.f32 %v1558_v59  ;;  %2206 = vmatmul.f32.vlgmr.msra.gmra.mxu3 %v3439_v11  ;;  %1343 = vmax.xlane.f32.xlu1 %v1342_v17  ;;  %v4905_v4 = vpop.f32.mrf.mxu2 }
 0x1a7   : > { %6490 = vst [vmem:[#allocation23_spill] sm:$0xff] %v4905_v4  ;;  %3446 = vpow2.f32 %v1560_v7  ;;  %2319 = vmatmul.f32.vlgmr.msra.gmra.mxu0 %v3441_v56  ;;  %v1345_v22 = vmax.f32 %v4895_v55, %v4905_v4  ;;  %v4909_v34 = vpop.f32.mrf.mxu3  ;;  %v1805_v44 = vadd.f32 %v3439_v11, %v1804_v58 }
 0x1a8   : > { %3448 = vpow2.f32 %v1562_v63  ;;  %v1274_v52 = vpop.xlane.xlu1 %1273  ;;  %v4911_v29 = vpop.f32.mrf.mxu1 }
 0x1a9   : > { %v4913_v51 = vpop.f32.mrf.mxu0  ;;  %v1428_v49 = vsub.f32 %v4630_v13, %v1274_v52  ;;  %v1429_v17 = vsub.f32 %v4641_v18, %v1274_v52  ;;  %v1430_v60 = vsub.f32 %v4645_v23, %v1274_v52  ;;  %v1431_v26 = vsub.f32 %v4633_v15, %v1274_v52 }
 0x1aa   : > { %v1346_v12 = vmax.f32 %v1345_v22, %v4909_v34  ;;  %v4920_v59 = vadd.f32 %v3441_v56, %v1805_v44 }
 0x1ab   : > { %v3443_v7 = vpop.eup %3442  ;;  %v1564_v11 = vmul.f32 1.442695, %v1428_v49  ;;  %v1566_v36 = vmul.f32 1.442695, %v1429_v17  ;;  %v1568_v63 = vmul.f32 1.442695, %v1430_v60 }
 0x1ac   : > { %6491 = vst [vmem:[#allocation24_spill] sm:$0xff] %v4920_v59  ;;  %v3445_v58 = vpop.eup %3444  ;;  %v1570_v4 = vmul.f32 1.442695, %v1431_v26  ;;  %1983 = vmatmul.f32.gmra.mxu1 %v3443_v7  ;;  %v1347_v55 = vmax.f32 %v1346_v12, %v4897_v28 }
 0x1ad   : > { %v3447_v13 = vpop.eup %3446  ;;  %3450 = vpow2.f32 %v1564_v11  ;;  %2096 = vmatmul.f32.gmra.mxu2 %v3445_v58  ;;  %v1809_v18 = vadd.f32 %v3445_v58, %v3443_v7 }
 0x1ae   : > { %v3449_v23 = vpop.eup %3448  ;;  %3452 = vpow2.f32 %v1566_v36  ;;  %2209 = vmatmul.f32.gmra.mxu3 %v3447_v13  ;;  %1348 = vmax.xlane.f32.xlu2 %v1347_v55  ;;  %v4923_v15 = vpop.f32.mrf.mxu2 }
 0x1af   : > { %3454 = vpow2.f32 %v1568_v63  ;;  %2322 = vmatmul.f32.gmra.mxu0 %v3449_v23  ;;  %v1350_v56 = vmax.f32 %v4911_v29, %v4923_v15  ;;  %v4927_v22 = vpop.f32.mrf.mxu3  ;;  %v1810_v44 = vadd.f32 %v3447_v13, %v1809_v18 }
 0x1b0   : > { %3456 = vpow2.f32 %v1570_v4  ;;  %v1279_v52 = vpop.xlane.xlu1 %1278  ;;  %v4929_v49 = vpop.f32.mrf.mxu1 }
 0x1b1   : > { %v4931_v17 = vpop.f32.mrf.mxu0  ;;  %v1432_v60 = vsub.f32 %v4647_v24, %v1279_v52  ;;  %v1433_v55 = vsub.f32 %v4658_v35, %v1279_v52  ;;  %v1434_v26 = vsub.f32 %v4662_v38, %v1279_v52  ;;  %v1435_v12 = vsub.f32 %v4650_v27, %v1279_v52 }
 0x1b2   : > { %v1351_v7 = vmax.f32 %v1350_v56, %v4927_v22  ;;  %v4938_v11 = vadd.f32 %v3449_v23, %v1810_v44 }
 0x1b3   : > { %v3451_v36 = vpop.eup %3450  ;;  %v1572_v63 = vmul.f32 1.442695, %v1432_v60  ;;  %v1574_v4 = vmul.f32 1.442695, %v1433_v55  ;;  %v1576_v58 = vmul.f32 1.442695, %v1434_v26 }
 0x1b4   : > { %6492 = vst [vmem:[#allocation25_spill] sm:$0xff] %v4938_v11  ;;  %v3453_v13 = vpop.eup %3452  ;;  %v1578_v18 = vmul.f32 1.442695, %v1435_v12  ;;  %1986 = vmatmul.f32.gmra.mxu1 %v3451_v36  ;;  %v1352_v59 = vmax.f32 %v1351_v7, %v4913_v51 }
 0x1b5   : > { %v3455_v24 = vpop.eup %3454  ;;  %3458 = vpow2.f32 %v1572_v63  ;;  %2099 = vmatmul.f32.gmra.mxu2 %v3453_v13  ;;  %v1814_v35 = vadd.f32 %v3453_v13, %v3451_v36 }
 0x1b6   : > { %v3457_v38 = vpop.eup %3456  ;;  %3460 = vpow2.f32 %v1574_v4  ;;  %2212 = vmatmul.f32.gmra.mxu3 %v3455_v24  ;;  %1353 = vmax.xlane.f32.xlu0 %v1352_v59  ;;  %v4941_v27 = vpop.f32.mrf.mxu2 }
 0x1b7   : > { %3462 = vpow2.f32 %v1576_v58  ;;  %2325 = vmatmul.f32.gmra.mxu0 %v3457_v38  ;;  %v1355_v23 = vmax.f32 %v4929_v49, %v4941_v27  ;;  %v4945_v56 = vpop.f32.mrf.mxu3  ;;  %v1815_v44 = vadd.f32 %v3455_v24, %v1814_v35 }
 0x1b8   : > { %3464 = vpow2.f32 %v1578_v18  ;;  %v1284_v52 = vpop.xlane.xlu2 %1283  ;;  %v4947_v60 = vpop.f32.mrf.mxu1 }
 0x1b9   : > { %v4949_v55 = vpop.f32.mrf.mxu0  ;;  %v1436_v26 = vsub.f32 %v4664_v39, %v1284_v52  ;;  %v1437_v59 = vsub.f32 %v4675_v50, %v1284_v52  ;;  %v1438_v12 = vsub.f32 %v4679_v53, %v1284_v52  ;;  %v1439_v7 = vsub.f32 %v4667_v42, %v1284_v52 }
 0x1ba   : > { %v1356_v36 = vmax.f32 %v1355_v23, %v4945_v56  ;;  %v4956_v63 = vadd.f32 %v3457_v38, %v1815_v44 }
 0x1bb   : > { %v3459_v4 = vpop.eup %3458  ;;  %v1580_v58 = vmul.f32 1.442695, %v1436_v26  ;;  %v1582_v13 = vmul.f32 1.442695, %v1437_v59  ;;  %v1584_v18 = vmul.f32 1.442695, %v1438_v12 }
 0x1bc   : > { %6493 = vst [vmem:[#allocation26_spill] sm:$0xff] %v4956_v63  ;;  %v3461_v24 = vpop.eup %3460  ;;  %v1586_v35 = vmul.f32 1.442695, %v1439_v7  ;;  %1989 = vmatmul.f32.gmra.mxu1 %v3459_v4  ;;  %v1357_v11 = vmax.f32 %v1356_v36, %v4931_v17 }
 0x1bd   : > { %v3463_v39 = vpop.eup %3462  ;;  %3466 = vpow2.f32 %v1580_v58  ;;  %2102 = vmatmul.f32.gmra.mxu2 %v3461_v24  ;;  %v1819_v50 = vadd.f32 %v3461_v24, %v3459_v4 }
 0x1be   : > { %v3465_v53 = vpop.eup %3464  ;;  %3468 = vpow2.f32 %v1582_v13  ;;  %2215 = vmatmul.f32.gmra.mxu3 %v3463_v39  ;;  %1358 = vmax.xlane.f32.xlu1 %v1357_v11  ;;  %v4959_v42 = vpop.f32.mrf.mxu2 }
 0x1bf   : > { %3470 = vpow2.f32 %v1584_v18  ;;  %2328 = vmatmul.f32.gmra.mxu0 %v3465_v53  ;;  %v1360_v38 = vmax.f32 %v4947_v60, %v4959_v42  ;;  %v4963_v23 = vpop.f32.mrf.mxu3  ;;  %v1820_v44 = vadd.f32 %v3463_v39, %v1819_v50 }
 0x1c0   : > { %3472 = vpow2.f32 %v1586_v35  ;;  %v1289_v52 = vpop.xlane.xlu2 %1288  ;;  %v4965_v26 = vpop.f32.mrf.mxu1 }
 0x1c1   : > { %v4967_v59 = vpop.f32.mrf.mxu0  ;;  %v1440_v12 = vsub.f32 %v4681_v54, %v1289_v52  ;;  %v1441_v11 = vsub.f32 %v4693_v1, %v1289_v52  ;;  %v1442_v7 = vsub.f32 %v4697_v2, %v1289_v52  ;;  %v1443_v36 = vsub.f32 %v4685_v61, %v1289_v52 }
 0x1c2   : > { %v1361_v4 = vmax.f32 %v1360_v38, %v4963_v23  ;;  %v4974_v58 = vadd.f32 %v3465_v53, %v1820_v44 }
 0x1c3   : > { %v3467_v13 = vpop.eup %3466  ;;  %v1588_v18 = vmul.f32 1.442695, %v1440_v12  ;;  %v1590_v24 = vmul.f32 1.442695, %v1441_v11  ;;  %v1592_v35 = vmul.f32 1.442695, %v1442_v7 }
 0x1c4   : > { %6494 = vst [vmem:[#allocation27_spill] sm:$0xff] %v4974_v58  ;;  %v3469_v39 = vpop.eup %3468  ;;  %v1594_v50 = vmul.f32 1.442695, %v1443_v36  ;;  %1992 = vmatmul.f32.gmra.mxu1 %v3467_v13  ;;  %v1362_v63 = vmax.f32 %v1361_v4, %v4949_v55 }
 0x1c5   : > { %v3471_v54 = vpop.eup %3470  ;;  %3474 = vpow2.f32 %v1588_v18  ;;  %2105 = vmatmul.f32.gmra.mxu2 %v3469_v39  ;;  %v1824_v1 = vadd.f32 %v3469_v39, %v3467_v13 }
 0x1c6   : > { %v3473_v2 = vpop.eup %3472  ;;  %3476 = vpow2.f32 %v1590_v24  ;;  %2218 = vmatmul.f32.gmra.mxu3 %v3471_v54  ;;  %1363 = vmax.xlane.f32.xlu2 %v1362_v63  ;;  %v4977_v61 = vpop.f32.mrf.mxu2 }
 0x1c7   : > { %3478 = vpow2.f32 %v1592_v35  ;;  %2331 = vmatmul.f32.gmra.mxu0 %v3473_v2  ;;  %v1365_v53 = vmax.f32 %v4965_v26, %v4977_v61  ;;  %v4981_v38 = vpop.f32.mrf.mxu3  ;;  %v1825_v44 = vadd.f32 %v3471_v54, %v1824_v1 }
 0x1c8   : > { %3480 = vpow2.f32 %v1594_v50  ;;  %v1294_v52 = vpop.xlane.xlu0 %1293  ;;  %v4983_v12 = vpop.f32.mrf.mxu1 }
 0x1c9   : > { %v4985_v11 = vpop.f32.mrf.mxu0  ;;  %v1444_v7 = vsub.f32 %v4699_v6, %v1294_v52  ;;  %v1445_v63 = vsub.f32 %v4711_v21, %v1294_v52  ;;  %v1446_v36 = vsub.f32 %v4715_v32, %v1294_v52  ;;  %v1447_v4 = vsub.f32 %v4703_v9, %v1294_v52 }
 0x1ca   : > { %v1366_v13 = vmax.f32 %v1365_v53, %v4981_v38  ;;  %v4992_v18 = vadd.f32 %v3473_v2, %v1825_v44 }
 0x1cb   : > { %v3475_v24 = vpop.eup %3474  ;;  %v1596_v35 = vmul.f32 1.442695, %v1444_v7  ;;  %v1598_v39 = vmul.f32 1.442695, %v1445_v63  ;;  %v1600_v50 = vmul.f32 1.442695, %v1446_v36 }
 0x1cc   : > { %6495 = vst [vmem:[#allocation28_spill] sm:$0xff] %v4992_v18  ;;  %v3477_v54 = vpop.eup %3476  ;;  %v1602_v1 = vmul.f32 1.442695, %v1447_v4  ;;  %1995 = vmatmul.f32.gmra.mxu1 %v3475_v24  ;;  %v1367_v58 = vmax.f32 %v1366_v13, %v4967_v59 }
 0x1cd   : > { %v3479_v6 = vpop.eup %3478  ;;  %3482 = vpow2.f32 %v1596_v35  ;;  %2108 = vmatmul.f32.gmra.mxu2 %v3477_v54  ;;  %v1829_v21 = vadd.f32 %v3477_v54, %v3475_v24 }
 0x1ce   : > { %v3481_v32 = vpop.eup %3480  ;;  %3484 = vpow2.f32 %v1598_v39  ;;  %2221 = vmatmul.f32.gmra.mxu3 %v3479_v6  ;;  %1368 = vmax.xlane.f32.xlu0 %v1367_v58  ;;  %v4995_v9 = vpop.f32.mrf.mxu2 }
 0x1cf   : > { %3486 = vpow2.f32 %v1600_v50  ;;  %2334 = vmatmul.f32.gmra.mxu0 %v3481_v32  ;;  %v1370_v2 = vmax.f32 %v4983_v12, %v4995_v9  ;;  %v4999_v53 = vpop.f32.mrf.mxu3  ;;  %v1830_v44 = vadd.f32 %v3479_v6, %v1829_v21 }
 0x1d0   : > { %3488 = vpow2.f32 %v1602_v1  ;;  %v1299_v52 = vpop.xlane.xlu1 %1298  ;;  %v5001_v7 = vpop.f32.mrf.mxu1 }
 0x1d1   : > { %v5003_v63 = vpop.f32.mrf.mxu0  ;;  %v1448_v36 = vsub.f32 %v4717_v43, %v1299_v52  ;;  %v1449_v58 = vsub.f32 %v4729_v57, %v1299_v52  ;;  %v1450_v4 = vsub.f32 %v4733_v14, %v1299_v52  ;;  %v1451_v13 = vsub.f32 %v4721_v3, %v1299_v52 }
 0x1d2   : > { %v1371_v24 = vmax.f32 %v1370_v2, %v4999_v53  ;;  %v5010_v35 = vadd.f32 %v3481_v32, %v1830_v44 }
 0x1d3   : > { %v3483_v39 = vpop.eup %3482  ;;  %v1604_v50 = vmul.f32 1.442695, %v1448_v36  ;;  %v1606_v54 = vmul.f32 1.442695, %v1449_v58  ;;  %v1608_v1 = vmul.f32 1.442695, %v1450_v4 }
 0x1d4   : > { %6496 = vst [vmem:[#allocation29_spill] sm:$0xff] %v5010_v35  ;;  %v3485_v6 = vpop.eup %3484  ;;  %v1610_v21 = vmul.f32 1.442695, %v1451_v13  ;;  %1998 = vmatmul.f32.gmra.mxu1 %v3483_v39  ;;  %v1372_v18 = vmax.f32 %v1371_v24, %v4985_v11 }
 0x1d5   : > { %v3487_v43 = vpop.eup %3486  ;;  %3490 = vpow2.f32 %v1604_v50  ;;  %2111 = vmatmul.f32.gmra.mxu2 %v3485_v6  ;;  %v1834_v57 = vadd.f32 %v3485_v6, %v3483_v39 }
 0x1d6   : > { %v3489_v14 = vpop.eup %3488  ;;  %3492 = vpow2.f32 %v1606_v54  ;;  %2224 = vmatmul.f32.gmra.mxu3 %v3487_v43  ;;  %1373 = vmax.xlane.f32.xlu1 %v1372_v18  ;;  %v5013_v3 = vpop.f32.mrf.mxu2 }
 0x1d7   : > { %3494 = vpow2.f32 %v1608_v1  ;;  %2337 = vmatmul.f32.gmra.mxu0 %v3489_v14  ;;  %v1375_v32 = vmax.f32 %v5001_v7, %v5013_v3  ;;  %v5017_v2 = vpop.f32.mrf.mxu3  ;;  %v1835_v44 = vadd.f32 %v3487_v43, %v1834_v57 }
 0x1d8   : > { %3496 = vpow2.f32 %v1610_v21  ;;  %v1304_v52 = vpop.xlane.xlu2 %1303  ;;  %v5019_v36 = vpop.f32.mrf.mxu1 }
 0x1d9   : > { %v5021_v58 = vpop.f32.mrf.mxu0  ;;  %v1452_v4 = vsub.f32 %v4735_v16, %v1304_v52  ;;  %v1453_v18 = vsub.f32 %v4747_v30, %v1304_v52  ;;  %v1454_v13 = vsub.f32 %v4751_v37, %v1304_v52  ;;  %v1455_v24 = vsub.f32 %v4739_v19, %v1304_v52 }
 0x1da   : > { %v1376_v39 = vmax.f32 %v1375_v32, %v5017_v2  ;;  %v5028_v50 = vadd.f32 %v3489_v14, %v1835_v44 }
 0x1db   : > { %v3491_v54 = vpop.eup %3490  ;;  %v1612_v1 = vmul.f32 1.442695, %v1452_v4  ;;  %v1614_v6 = vmul.f32 1.442695, %v1453_v18  ;;  %v1616_v21 = vmul.f32 1.442695, %v1454_v13 }
 0x1dc   : > { %6497 = vst [vmem:[#allocation30_spill] sm:$0xff] %v5028_v50  ;;  %v3493_v43 = vpop.eup %3492  ;;  %v1618_v57 = vmul.f32 1.442695, %v1455_v24  ;;  %2001 = vmatmul.f32.gmra.mxu1 %v3491_v54  ;;  %v1377_v35 = vmax.f32 %v1376_v39, %v5003_v63 }
 0x1dd   : > { %v3495_v16 = vpop.eup %3494  ;;  %3498 = vpow2.f32 %v1612_v1  ;;  %2114 = vmatmul.f32.gmra.mxu2 %v3493_v43  ;;  %v1839_v30 = vadd.f32 %v3493_v43, %v3491_v54 }
 0x1de   : > { %v3497_v37 = vpop.eup %3496  ;;  %3500 = vpow2.f32 %v1614_v6  ;;  %2227 = vmatmul.f32.gmra.mxu3 %v3495_v16  ;;  %1378 = vmax.xlane.f32.xlu2 %v1377_v35  ;;  %v5031_v19 = vpop.f32.mrf.mxu2 }
 0x1df   : > { %3502 = vpow2.f32 %v1616_v21  ;;  %2340 = vmatmul.f32.gmra.mxu0 %v3497_v37  ;;  %v1380_v14 = vmax.f32 %v5019_v36, %v5031_v19  ;;  %v5035_v32 = vpop.f32.mrf.mxu3  ;;  %v1840_v44 = vadd.f32 %v3495_v16, %v1839_v30 }
 0x1e0   : > { %3504 = vpow2.f32 %v1618_v57  ;;  %v1309_v52 = vpop.xlane.xlu0 %1308  ;;  %v5037_v4 = vpop.f32.mrf.mxu1 }
 0x1e1   : > { %v5039_v18 = vpop.f32.mrf.mxu0  ;;  %v1456_v13 = vsub.f32 %v4753_v41, %v1309_v52  ;;  %v1457_v35 = vsub.f32 %v4765_v62, %v1309_v52  ;;  %v1458_v24 = vsub.f32 %v4769_v0, %v1309_v52  ;;  %v1459_v39 = vsub.f32 %v4757_v48, %v1309_v52 }
 0x1e2   : > { %v1381_v54 = vmax.f32 %v1380_v14, %v5035_v32  ;;  %v5046_v1 = vadd.f32 %v3497_v37, %v1840_v44 }
 0x1e3   : > { %v3499_v6 = vpop.eup %3498  ;;  %v1620_v21 = vmul.f32 1.442695, %v1456_v13  ;;  %v1622_v43 = vmul.f32 1.442695, %v1457_v35  ;;  %v1624_v57 = vmul.f32 1.442695, %v1458_v24 }
 0x1e4   : > { %6498 = vst [vmem:[#allocation31_spill] sm:$0xff] %v5046_v1  ;;  %v3501_v16 = vpop.eup %3500  ;;  %v1626_v30 = vmul.f32 1.442695, %v1459_v39  ;;  %2004 = vmatmul.f32.gmra.mxu1 %v3499_v6  ;;  %v1382_v50 = vmax.f32 %v1381_v54, %v5021_v58 }
 0x1e5   : > { %v3503_v41 = vpop.eup %3502  ;;  %3506 = vpow2.f32 %v1620_v21  ;;  %2117 = vmatmul.f32.gmra.mxu2 %v3501_v16  ;;  %v1844_v62 = vadd.f32 %v3501_v16, %v3499_v6 }
 0x1e6   : > { %v3505_v0 = vpop.eup %3504  ;;  %3508 = vpow2.f32 %v1622_v43  ;;  %2230 = vmatmul.f32.gmra.mxu3 %v3503_v41  ;;  %1383 = vmax.xlane.f32.xlu0 %v1382_v50  ;;  %v5049_v48 = vpop.f32.mrf.mxu2 }
 0x1e7   : > { %3510 = vpow2.f32 %v1624_v57  ;;  %2343 = vmatmul.f32.gmra.mxu0 %v3505_v0  ;;  %v1385_v37 = vmax.f32 %v5037_v4, %v5049_v48  ;;  %v5053_v14 = vpop.f32.mrf.mxu3  ;;  %v1845_v44 = vadd.f32 %v3503_v41, %v1844_v62 }
 0x1e8   : > { %3512 = vpow2.f32 %v1626_v30  ;;  %v1314_v52 = vpop.xlane.xlu1 %1313  ;;  %v5055_v13 = vpop.f32.mrf.mxu1 }
 0x1e9   : > { %6499 = vst [vmem:[#allocation32_spill] sm:$0xff] %v5055_v13  ;;  %v5057_v35 = vpop.f32.mrf.mxu0  ;;  %v1460_v24 = vsub.f32 %v4771_v25, %v1314_v52  ;;  %v1461_v50 = vsub.f32 %v4783_v46, %v1314_v52  ;;  %v1462_v39 = vsub.f32 %v4787_v5, %v1314_v52  ;;  %v1463_v54 = vsub.f32 %v4775_v10, %v1314_v52 }
 0x1ea   : > { %6500 = vst [vmem:[#allocation33_spill] sm:$0xff] %v5057_v35  ;;  %v1386_v6 = vmax.f32 %v1385_v37, %v5053_v14  ;;  %v5064_v21 = vadd.f32 %v3505_v0, %v1845_v44 }
 0x1eb   : > { %v3507_v43 = vpop.eup %3506  ;;  %v1628_v57 = vmul.f32 1.442695, %v1460_v24  ;;  %v1630_v16 = vmul.f32 1.442695, %v1461_v50  ;;  %v1632_v30 = vmul.f32 1.442695, %v1462_v39 }
 0x1ec   : > { %6501 = vst [vmem:[#allocation34_spill] sm:$0xff] %v5064_v21  ;;  %v3509_v41 = vpop.eup %3508  ;;  %v1634_v62 = vmul.f32 1.442695, %v1463_v54  ;;  %2007 = vmatmul.f32.gmra.mxu1 %v3507_v43  ;;  %v1387_v1 = vmax.f32 %v1386_v6, %v5039_v18  ;;  %v6505_v54 = vld [vmem:[#allocation5_spill] sm:$0xff] }
 0x1ed   : > { %v3511_v25 = vpop.eup %3510  ;;  %3514 = vpow2.f32 %v1628_v57  ;;  %2120 = vmatmul.f32.gmra.mxu2 %v3509_v41  ;;  %v1849_v46 = vadd.f32 %v3509_v41, %v3507_v43 }
 0x1ee   : > { %v3513_v5 = vpop.eup %3512  ;;  %3516 = vpow2.f32 %v1630_v16  ;;  %2233 = vmatmul.f32.gmra.mxu3 %v3511_v25  ;;  %1388 = vmax.xlane.f32.xlu1 %v1387_v1  ;;  %v5067_v10 = vpop.f32.mrf.mxu2 }
 0x1ef   : > { %6502 = vst [vmem:[#allocation35_spill] sm:$0xff] %v5067_v10  ;;  %3518 = vpow2.f32 %v1632_v30  ;;  %2346 = vmatmul.f32.gmra.mxu0 %v3513_v5  ;;  %v1390_v0 = vmax.f32 %v5055_v13, %v5067_v10  ;;  %v5071_v37 = vpop.f32.mrf.mxu3  ;;  %v1850_v44 = vadd.f32 %v3511_v25, %v1849_v46 }
 0x1f0   : > { %6503 = vst [vmem:[#allocation36_spill] sm:$0xff] %v5071_v37  ;;  %3520 = vpow2.f32 %v1634_v62  ;;  %v1319_v52 = vpop.xlane.xlu2 %1318  ;;  %v5073_v24 = vpop.f32.mrf.mxu1 }
 0x1f1   : > { %6504 = vst [vmem:[#allocation37_spill] sm:$0xff] %v5073_v24  ;;  %v1464_v50 = vsub.f32 %v4789_v31, %v1319_v52  ;;  %v1465_v39 = vsub.f32 %v4801_v40, %v1319_v52  ;;  %v1466_v1 = vsub.f32 %v4805_v47, %v1319_v52  ;;  %v1467_v6 = vsub.f32 %v6505_v54, %v1319_v52  ;;  %v5079_v43 = vpop.f32.mrf.mxu0  ;;  %v6511_v54 = vld [vmem:[#allocation6_spill] sm:$0xff] }
 0x1f2   : > { %6506 = vst [vmem:[#allocation5_spill] sm:$0xff] %v5079_v43  ;;  %v1391_v57 = vmax.f32 %v1390_v0, %v5071_v37  ;;  %v5082_v16 = vadd.f32 %v3513_v5, %v1850_v44 }
 0x1f3   : > { %v3515_v30 = vpop.eup %3514  ;;  %v1636_v41 = vmul.f32 1.442695, %v1464_v50  ;;  %v1638_v62 = vmul.f32 1.442695, %v1465_v39  ;;  %v1640_v25 = vmul.f32 1.442695, %v1466_v1 }
 0x1f4   : > { %6507 = vst [vmem:[#allocation38_spill] sm:$0xff] %v5082_v16  ;;  %v3517_v46 = vpop.eup %3516  ;;  %v1642_v21 = vmul.f32 1.442695, %v1467_v6  ;;  %2010 = vmatmul.f32.gmra.mxu1 %v3515_v30  ;;  %v1392_v31 = vmax.f32 %v1391_v57, %v5057_v35  ;;  %v6512_v57 = vld [vmem:[#allocation8_spill] sm:$0xff] }
 0x1f5   : > { %v3519_v40 = vpop.eup %3518  ;;  %3522 = vpow2.f32 %v1636_v41  ;;  %2123 = vmatmul.f32.gmra.mxu2 %v3517_v46  ;;  %v1854_v47 = vadd.f32 %v3517_v46, %v3515_v30  ;;  %v6513_v41 = vld [vmem:[#allocation9_spill] sm:$0xff]  ;;  %v6514_v46 = vld [vmem:[#allocation7_spill] sm:$0xff] }
 0x1f6   : > { %v3521_v52 = vpop.eup %3520  ;;  %3524 = vpow2.f32 %v1638_v62  ;;  %2236 = vmatmul.f32.gmra.mxu3 %v3519_v40  ;;  %1393 = vmax.xlane.f32.xlu2 %v1392_v31  ;;  %v5085_v0 = vpop.f32.mrf.mxu2 }
 0x1f7   : > { %6508 = vst [vmem:[#allocation39_spill] sm:$0xff] %v5085_v0  ;;  %3526 = vpow2.f32 %v1640_v25  ;;  %2349 = vmatmul.f32.gmra.mxu0 %v3521_v52  ;;  %v1395_v5 = vmax.f32 %v5073_v24, %v5085_v0  ;;  %v5089_v44 = vpop.f32.mrf.mxu3  ;;  %v1855_v50 = vadd.f32 %v3519_v40, %v1854_v47 }
 0x1f8   : > { %6509 = vst [vmem:[#allocation40_spill] sm:$0xff] %v5089_v44  ;;  %3528 = vpow2.f32 %v1642_v21  ;;  %v1324_v39 = vpop.xlane.xlu0 %1323  ;;  %v5091_v1 = vpop.f32.mrf.mxu1 }
 0x1f9   : > { %6510 = vst [vmem:[#allocation41_spill] sm:$0xff] %v5091_v1  ;;  %v1468_v6 = vsub.f32 %v6511_v54, %v1324_v39  ;;  %v1469_v30 = vsub.f32 %v6512_v57, %v1324_v39  ;;  %v1470_v62 = vsub.f32 %v6513_v41, %v1324_v39  ;;  %v1471_v31 = vsub.f32 %v6514_v46, %v1324_v39  ;;  %v5100_v47 = vpop.f32.mrf.mxu0  ;;  %v6520_v46 = vld [vmem:[#allocation12_spill] sm:$0xff] }
 0x1fa   : > { %v1396_v25 = vmax.f32 %v1395_v5, %v5089_v44  ;;  %v5098_v16 = vadd.f32 %v3521_v52, %v1855_v50  ;;  %6516 = vst [vmem:[#allocation8_spill] sm:$0xff] %v5100_v47 }
 0x1fb   : > { %v3523_v0 = vpop.eup %3522  ;;  %v1644_v24 = vmul.f32 1.442695, %v1468_v6  ;;  %v1646_v35 = vmul.f32 1.442695, %v1469_v30  ;;  %v1648_v40 = vmul.f32 1.442695, %v1470_v62 }
 0x1fc   : > { %6515 = vst [vmem:[#allocation6_spill] sm:$0xff] %v5098_v16  ;;  %v3525_v21 = vpop.eup %3524  ;;  %v1650_v37 = vmul.f32 1.442695, %v1471_v31  ;;  %2013 = vmatmul.f32.gmra.mxu1 %v3523_v0  ;;  %v1397_v54 = vmax.f32 %v1396_v25, %v5079_v43  ;;  %v6519_v62 = vld [vmem:[#allocation10_spill] sm:$0xff]  ;;  %v6521_v31 = vld [vmem:[#allocation13_spill] sm:$0xff]  ;;  %v6522_v25 = vld [vmem:[#allocation11_spill] sm:$0xff] }
 0x1fd   : > { %v3527_v57 = vpop.eup %3526  ;;  %3530 = vpow2.f32 %v1644_v24  ;;  %2126 = vmatmul.f32.gmra.mxu2 %v3525_v21  ;;  %v1859_v41 = vadd.f32 %v3525_v21, %v3523_v0 }
 0x1fe   : > { %v3529_v39 = vpop.eup %3528  ;;  %3532 = vpow2.f32 %v1646_v35  ;;  %2239 = vmatmul.f32.gmra.mxu3 %v3527_v57  ;;  %1398 = vmax.xlane.f32.xlu0 %v1397_v54  ;;  %v5103_v52 = vpop.f32.mrf.mxu2 }
 0x1ff   : > { %6517 = vst [vmem:[#allocation9_spill] sm:$0xff] %v5103_v52  ;;  %3534 = vpow2.f32 %v1648_v40  ;;  %2352 = vmatmul.f32.gmra.mxu0 %v3529_v39  ;;  %v1400_v5 = vmax.f32 %v5091_v1, %v5103_v52  ;;  %v5107_v50 = vpop.f32.mrf.mxu3  ;;  %v1860_v6 = vadd.f32 %v3527_v57, %v1859_v41 }
 0x200   : > { %6518 = vst [vmem:[#allocation7_spill] sm:$0xff] %v5107_v50  ;;  %3536 = vpow2.f32 %v1650_v37  ;;  %v1329_v30 = vpop.xlane.xlu1 %1328  ;;  %v5113_v54 = vpop.f32.mrf.mxu1 }
 0x201   : > { %v1472_v24 = vsub.f32 %v6519_v62, %v1329_v30  ;;  %v1473_v0 = vsub.f32 %v6520_v46, %v1329_v30  ;;  %v1474_v35 = vsub.f32 %v6521_v31, %v1329_v30  ;;  %v1475_v21 = vsub.f32 %v6522_v25, %v1329_v30  ;;  %6523 = vst [vmem:[#allocation10_spill] sm:$0xff] %v5113_v54  ;;  %v6529_v25 = vld [vmem:[#allocation16_spill] sm:$0xff] }
 0x202   : > { %v1401_v40 = vmax.f32 %v1400_v5, %v5107_v50  ;;  %v5116_v16 = vadd.f32 %v3529_v39, %v1860_v6  ;;  %v5129_v39 = vpop.f32.mrf.mxu0 }
 0x203   : > { %v5118_v52 = vpop.eup %3530  ;;  %v1652_v1 = vmul.f32 1.442695, %v1472_v24  ;;  %v1654_v57 = vmul.f32 1.442695, %v1473_v0  ;;  %v1656_v37 = vmul.f32 1.442695, %v1474_v35 }
 0x204   : > { %6524 = vst [vmem:[#allocation12_spill] sm:$0xff] %v5116_v16  ;;  %v5120_v41 = vpop.eup %3532  ;;  %v1658_v62 = vmul.f32 1.442695, %v1475_v21  ;;  %2016 = vmatmul.f32.gmra.mxu1 %v5118_v52  ;;  %v1402_v46 = vmax.f32 %v1401_v40, %v5100_v47  ;;  %v6528_v0 = vld [vmem:[#allocation14_spill] sm:$0xff]  ;;  %v6530_v40 = vld [vmem:[#allocation17_spill] sm:$0xff]  ;;  %v6531_v16 = vld [vmem:[#allocation15_spill] sm:$0xff] }
 0x205   : > { %v5124_v31 = vpop.eup %3534  ;;  %3538 = vpow2.f32 %v1652_v1  ;;  %2129 = vmatmul.f32.gmra.mxu2 %v5120_v41  ;;  %6525 = vst [vmem:[#allocation13_spill] sm:$0xff] %v5129_v39 }
 0x206   : > { %v5127_v5 = vpop.eup %3536  ;;  %3540 = vpow2.f32 %v1654_v57  ;;  %2242 = vmatmul.f32.gmra.mxu3 %v5124_v31  ;;  %1403 = vmax.xlane.f32.xlu1 %v1402_v46  ;;  %v5132_v6 = vpop.f32.mrf.mxu2 }
 0x207   : > { %6526 = vst [vmem:[#allocation11_spill] sm:$0xff] %v5132_v6  ;;  %3542 = vpow2.f32 %v1656_v37  ;;  %2355 = vmatmul.f32.gmra.mxu0 %v5127_v5  ;;  %v1405_v30 = vmax.f32 %v5113_v54, %v5132_v6  ;;  %v5137_v24 = vpop.f32.mrf.mxu3 }
 0x208   : > { %6527 = vst [vmem:[#allocation42_spill] sm:$0xff] %v5137_v24  ;;  %3544 = vpow2.f32 %v1658_v62  ;;  %v1334_v1 = vpop.xlane.xlu2 %1333  ;;  %v5144_v54 = vpop.f32.mrf.mxu1 }
 0x209   : > { %v1476_v35 = vsub.f32 %v6528_v0, %v1334_v1  ;;  %v1477_v21 = vsub.f32 %v6529_v25, %v1334_v1  ;;  %v1478_v57 = vsub.f32 %v6530_v40, %v1334_v1  ;;  %v1479_v46 = vsub.f32 %v6531_v16, %v1334_v1  ;;  %6532 = vst [vmem:[#allocation14_spill] sm:$0xff] %v5144_v54 }
 0x20a   : > { %v1406_v47 = vmax.f32 %v1405_v30, %v5137_v24 }
 0x20b   : > { %v3539_v37 = vpop.eup %3538  ;;  %v1660_v50 = vmul.f32 1.442695, %v1476_v35  ;;  %v1662_v43 = vmul.f32 1.442695, %v1477_v21  ;;  %v1664_v44 = vmul.f32 1.442695, %v1478_v57  ;;  %v5153_v35 = vpop.f32.mrf.mxu0 }
 0x20c   : > { %v3541_v10 = vpop.eup %3540  ;;  %v1666_v6 = vmul.f32 1.442695, %v1479_v46  ;;  %2019 = vmatmul.f32.gmra.mxu1 %v3539_v37  ;;  %v1407_v62 = vmax.f32 %v1406_v47, %v5129_v39  ;;  %v6534_v21 = vld [vmem:[#allocation18_spill] sm:$0xff]  ;;  %v6535_v57 = vld [vmem:[#allocation19_spill] sm:$0xff] }
 0x20d   : > { %v3543_v0 = vpop.eup %3542  ;;  %3546 = vpow2.f32 %v1660_v50  ;;  %2132 = vmatmul.f32.gmra.mxu2 %v3541_v10  ;;  %v1869_v25 = vadd.f32 %v3541_v10, %v3539_v37 }
 0x20e   : > { %v3545_v40 = vpop.eup %3544  ;;  %3548 = vpow2.f32 %v1662_v43  ;;  %2245 = vmatmul.f32.gmra.mxu3 %v3543_v0  ;;  %1408 = vmax.xlane.f32.xlu2 %v1407_v62  ;;  %v5147_v16 = vpop.f32.mrf.mxu2 }
 0x20f   : > { %6533 = vst [vmem:[#allocation16_spill] sm:$0xff] %v5147_v16  ;;  %3550 = vpow2.f32 %v1664_v44  ;;  %2358 = vmatmul.f32.gmra.mxu0 %v3545_v40  ;;  %v1410_v30 = vmax.f32 %v5144_v54, %v5147_v16  ;;  %v5151_v1 = vpop.f32.mrf.mxu3  ;;  %v1870_v47 = vadd.f32 %v3543_v0, %v1869_v25 }
 0x210   : > { %3552 = vpow2.f32 %v1666_v6 }
 0x211   : > { %v1339_v50 = vpop.xlane.xlu0 %1338  ;;  %v1411_v10 = vmax.f32 %v1410_v30, %v5151_v1  ;;  %v1871_v6 = vadd.f32 %v3545_v40, %v1870_v47  ;;  %v6537_v47 = vld [vmem:[#allocation20_spill] sm:$0xff] }
 0x212   : > { %v1480_v43 = vsub.f32 %v6534_v21, %v1339_v50  ;;  %v1481_v46 = vsub.f32 %v6535_v57, %v1339_v50  ;;  %v1482_v37 = vsub.f32 %v4877_v33, %v1339_v50  ;;  %v1483_v44 = vsub.f32 %v4865_v20, %v1339_v50  ;;  %v5161_v57 = vpop.f32.mrf.mxu1 }
 0x213   : > { %v3547_v62 = vpop.eup %3546  ;;  %v1412_v16 = vmax.f32 %v1411_v10, %v5153_v35 }
 0x214   : > { %v3549_v54 = vpop.eup %3548  ;;  %v1668_v39 = vmul.f32 1.442695, %v1480_v43  ;;  %v1670_v24 = vmul.f32 1.442695, %v1481_v46  ;;  %v1672_v13 = vmul.f32 1.442695, %v1482_v37  ;;  %2022 = vmatmul.f32.gmra.mxu1 %v3547_v62 }
 0x215   : > { %v3551_v0 = vpop.eup %3550  ;;  %v1674_v25 = vmul.f32 1.442695, %v1483_v44  ;;  %2135 = vmatmul.f32.gmra.mxu2 %v3549_v54  ;;  %1413 = vmax.xlane.f32.xlu0 %v1412_v16  ;;  %v1874_v30 = vadd.f32 %v3549_v54, %v3547_v62  ;;  %v6538_v43 = vld [vmem:[#allocation21_spill] sm:$0xff] }
 0x216   : > { %v3553_v21 = vpop.eup %3552  ;;  %3554 = vpow2.f32 %v1668_v39  ;;  %2248 = vmatmul.f32.gmra.mxu3 %v3551_v0  ;;  %1872 = vadd.xlane.f32.xlu2 %v1871_v6  ;;  %v5163_v20 = vpop.f32.mrf.mxu2 }
 0x217   : > { %3556 = vpow2.f32 %v1670_v24  ;;  %2361 = vmatmul.f32.gmra.mxu0 %v3553_v21  ;;  %v1415_v33 = vmax.f32 %v5161_v57, %v5163_v20  ;;  %v1875_v50 = vadd.f32 %v3551_v0, %v1874_v30  ;;  %v5167_v40 = vpop.f32.mrf.mxu3  ;;  %v5170_v39 = vpop.f32.mrf.mxu0 }
 0x218   : > { %3558 = vpow2.f32 %v1672_v13  ;;  %6536 = vst [vmem:[#allocation17_spill] sm:$0xff] %v5167_v40  ;;  %v1864_v13 = vadd.f32 %v5120_v41, %v5118_v52 }
 0x219   : > { %3560 = vpow2.f32 %v1674_v25  ;;  %v1344_v16 = vpop.xlane.xlu1 %1343  ;;  %v1416_v54 = vmax.f32 %v1415_v33, %v5167_v40  ;;  %v1876_v44 = vadd.f32 %v3553_v21, %v1875_v50  ;;  %v6539_v21 = vld [vmem:[#allocation22_spill] sm:$0xff] }
 0x21a   : > { %v1484_v10 = vsub.f32 %v6537_v47, %v1344_v16  ;;  %v1485_v46 = vsub.f32 %v6538_v43, %v1344_v16  ;;  %v1486_v24 = vsub.f32 %v4893_v45, %v1344_v16  ;;  %v1487_v37 = vsub.f32 %v4881_v8, %v1344_v16  ;;  %v6540_v16 = vld [vmem:[#allocation23_spill] sm:$0xff] }
 0x21b   : > { %v1417_v62 = vmax.f32 %v1416_v54, %v5170_v39  ;;  %v1865_v8 = vadd.f32 %v5124_v31, %v1864_v13 }
 0x21c   : > { %v3555_v6 = vpop.eup %3554  ;;  %v1676_v0 = vmul.f32 1.442695, %v1484_v10  ;;  %v1678_v25 = vmul.f32 1.442695, %v1485_v46  ;;  %v1680_v30 = vmul.f32 1.442695, %v1486_v24 }
 0x21d   : > { %v3557_v33 = vpop.eup %3556  ;;  %v1682_v40 = vmul.f32 1.442695, %v1487_v37  ;;  %2025 = vmatmul.f32.gmra.mxu1 %v3555_v6  ;;  %1877 = vadd.xlane.f32.xlu0 %v1876_v44  ;;  %v1866_v46 = vadd.f32 %v5127_v5, %v1865_v8 }
 0x21e   : > { %v3559_v47 = vpop.eup %3558  ;;  %3562 = vpow2.f32 %v1676_v0  ;;  %2138 = vmatmul.f32.gmra.mxu2 %v3557_v33  ;;  %1418 = vmax.xlane.f32.xlu1 %v1417_v62  ;;  %v1879_v13 = vadd.f32 %v3557_v33, %v3555_v6 }
 0x21f   : > { %v3561_v45 = vpop.eup %3560  ;;  %3564 = vpow2.f32 %v1678_v25  ;;  %2251 = vmatmul.f32.gmra.mxu3 %v3559_v47 }
 0x220   : > { %3566 = vpow2.f32 %v1680_v30  ;;  %2364 = vmatmul.f32.gmra.mxu0 %v3561_v45 }
 0x221   : > { %3568 = vpow2.f32 %v1682_v40  ;;  %v1349_v52 = vpop.xlane.xlu2 %1348  ;;  %v1981_v41 = vpop.f32.mrf.mxu1 }
 0x222   : > { %v1488_v50 = vsub.f32 %v6539_v21, %v1349_v52  ;;  %v1489_v54 = vsub.f32 %v6540_v16, %v1349_v52  ;;  %v1490_v10 = vsub.f32 %v4909_v34, %v1349_v52  ;;  %v1491_v43 = vsub.f32 %v4897_v28, %v1349_v52 }
 0x223   : > { %v1880_v34 = vadd.f32 %v3559_v47, %v1879_v13 }
 0x224   : > { %v3563_v24 = vpop.eup %3562  ;;  %v1684_v37 = vmul.f32 1.442695, %v1488_v50  ;;  %v1686_v44 = vmul.f32 1.442695, %v1489_v54  ;;  %v1688_v62 = vmul.f32 1.442695, %v1490_v10  ;;  %v2320_v31 = vpop.f32.mrf.mxu0 }
 0x225   : > { %v3565_v0 = vpop.eup %3564  ;;  %v1690_v40 = vmul.f32 1.442695, %v1491_v43  ;;  %2028 = vmatmul.f32.gmra.mxu1 %v3563_v24 }
 0x226   : > { %v3567_v25 = vpop.eup %3566  ;;  %3570 = vpow2.f32 %v1684_v37  ;;  %2141 = vmatmul.f32.gmra.mxu2 %v3565_v0  ;;  %1867 = vadd.xlane.f32.xlu1 %v1866_v46  ;;  %v1884_v30 = vadd.f32 %v3565_v0, %v3563_v24 }
 0x227   : > { %v3569_v21 = vpop.eup %3568  ;;  %3572 = vpow2.f32 %v1686_v44  ;;  %2254 = vmatmul.f32.gmra.mxu3 %v3567_v25 }
 0x228   : > { %3574 = vpow2.f32 %v1688_v62  ;;  %2367 = vmatmul.f32.gmra.mxu0 %v3569_v21  ;;  %v2094_v28 = vpop.f32.mrf.mxu2  ;;  %v1885_v5 = vadd.f32 %v3567_v25, %v1884_v30 }
 0x229   : > { %3576 = vpow2.f32 %v1690_v40  ;;  %v2095_v8 = vadd.f32 %v2094_v28, %v1981_v41  ;;  %v2207_v52 = vpop.f32.mrf.mxu3  ;;  %v1354_v6 = vpop.xlane.xlu0 %1353  ;;  %v1881_v41 = vadd.f32 %v3561_v45, %v1880_v34 }
 0x22a   : > { %v1492_v33 = vsub.f32 %v4911_v29, %v1354_v6  ;;  %v1493_v50 = vsub.f32 %v4923_v15, %v1354_v6  ;;  %v1494_v16 = vsub.f32 %v4927_v22, %v1354_v6  ;;  %v1495_v54 = vsub.f32 %v4913_v51, %v1354_v6  ;;  %v1984_v10 = vpop.f32.mrf.mxu1 }
 0x22b   : > { %v2208_v43 = vadd.f32 %v2207_v52, %v2095_v8  ;;  %v5189_v46 = vadd.f32 %v3569_v21, %v1885_v5 }
 0x22c   : > { %v3571_v24 = vpop.eup %3570  ;;  %v1692_v37 = vmul.f32 1.442695, %v1492_v33  ;;  %v1694_v47 = vmul.f32 1.442695, %v1493_v50  ;;  %v1696_v44 = vmul.f32 1.442695, %v1494_v16  ;;  %v2323_v62 = vpop.f32.mrf.mxu0 }
 0x22d   : > { %v3573_v13 = vpop.eup %3572  ;;  %v5191_v0 = vadd.f32 %v2320_v31, %v2208_v43  ;;  %v1698_v29 = vmul.f32 1.442695, %v1495_v54  ;;  %2031 = vmatmul.f32.gmra.mxu1 %v3571_v24 }
 0x22e   : > { %v3575_v15 = vpop.eup %3574  ;;  %3578 = vpow2.f32 %v1692_v37  ;;  %2144 = vmatmul.f32.gmra.mxu2 %v3573_v13  ;;  %1882 = vadd.xlane.f32.xlu1 %v1881_v41  ;;  %v1889_v51 = vadd.f32 %v3573_v13, %v3571_v24 }
 0x22f   : > { %6541 = vst [vmem:[#allocation15_spill] sm:$0xff] %v5191_v0  ;;  %v3577_v22 = vpop.eup %3576  ;;  %3580 = vpow2.f32 %v1694_v47  ;;  %2257 = vmatmul.f32.gmra.mxu3 %v3575_v15 }
 0x230   : > { %3582 = vpow2.f32 %v1696_v44  ;;  %2370 = vmatmul.f32.gmra.mxu0 %v3577_v22  ;;  %v2097_v40 = vpop.f32.mrf.mxu2  ;;  %v1890_v25 = vadd.f32 %v3575_v15, %v1889_v51 }
 0x231   : > { %3584 = vpow2.f32 %v1698_v29  ;;  %v2098_v30 = vadd.f32 %v2097_v40, %v1984_v10  ;;  %v2210_v45 = vpop.f32.mrf.mxu3  ;;  %v1359_v21 = vpop.xlane.xlu1 %1358 }
 0x232   : > { %v1496_v31 = vsub.f32 %v4929_v49, %v1359_v21  ;;  %v1497_v28 = vsub.f32 %v4941_v27, %v1359_v21  ;;  %v1498_v34 = vsub.f32 %v4945_v56, %v1359_v21  ;;  %v1499_v5 = vsub.f32 %v4931_v17, %v1359_v21  ;;  %v1987_v8 = vpop.f32.mrf.mxu1 }
 0x233   : > { %v2211_v52 = vadd.f32 %v2210_v45, %v2098_v30  ;;  %v5197_v6 = vadd.f32 %v3577_v22, %v1890_v25 }
 0x234   : > { %v3579_v33 = vpop.eup %3578  ;;  %v1700_v50 = vmul.f32 1.442695, %v1496_v31  ;;  %v1702_v16 = vmul.f32 1.442695, %v1497_v28  ;;  %v1704_v54 = vmul.f32 1.442695, %v1498_v34  ;;  %v2326_v43 = vpop.f32.mrf.mxu0 }
 0x235   : > { %v3581_v10 = vpop.eup %3580  ;;  %v5199_v24 = vadd.f32 %v2323_v62, %v2211_v52  ;;  %v1706_v37 = vmul.f32 1.442695, %v1499_v5  ;;  %2034 = vmatmul.f32.gmra.mxu1 %v3579_v33 }
 0x236   : > { %v3583_v49 = vpop.eup %3582  ;;  %3586 = vpow2.f32 %v1700_v50  ;;  %2147 = vmatmul.f32.gmra.mxu2 %v3581_v10  ;;  %v1894_v27 = vadd.f32 %v3581_v10, %v3579_v33 }
 0x237   : > { %6542 = vst [vmem:[#allocation18_spill] sm:$0xff] %v5199_v24  ;;  %v3585_v56 = vpop.eup %3584  ;;  %3588 = vpow2.f32 %v1702_v16  ;;  %2260 = vmatmul.f32.gmra.mxu3 %v3583_v49 }
 0x238   : > { %3590 = vpow2.f32 %v1704_v54  ;;  %2373 = vmatmul.f32.gmra.mxu0 %v3585_v56  ;;  %v2100_v17 = vpop.f32.mrf.mxu2  ;;  %v1895_v47 = vadd.f32 %v3583_v49, %v1894_v27 }
 0x239   : > { %3592 = vpow2.f32 %v1706_v37  ;;  %v2101_v44 = vadd.f32 %v2100_v17, %v1987_v8  ;;  %v2213_v41 = vpop.f32.mrf.mxu3  ;;  %v1364_v13 = vpop.xlane.xlu2 %1363 }
 0x23a   : > { %v1500_v62 = vsub.f32 %v4947_v60, %v1364_v13  ;;  %v1501_v29 = vsub.f32 %v4959_v42, %v1364_v13  ;;  %v1502_v15 = vsub.f32 %v4963_v23, %v1364_v13  ;;  %v1503_v51 = vsub.f32 %v4949_v55, %v1364_v13  ;;  %v1990_v22 = vpop.f32.mrf.mxu1 }
 0x23b   : > { %v2214_v40 = vadd.f32 %v2213_v41, %v2101_v44  ;;  %v5205_v25 = vadd.f32 %v3585_v56, %v1895_v47 }
 0x23c   : > { %v3587_v30 = vpop.eup %3586  ;;  %v1708_v45 = vmul.f32 1.442695, %v1500_v62  ;;  %v1710_v21 = vmul.f32 1.442695, %v1501_v29  ;;  %v1712_v31 = vmul.f32 1.442695, %v1502_v15  ;;  %v2329_v28 = vpop.f32.mrf.mxu0 }
 0x23d   : > { %v3589_v34 = vpop.eup %3588  ;;  %v5207_v5 = vadd.f32 %v2326_v43, %v2214_v40  ;;  %v1714_v8 = vmul.f32 1.442695, %v1503_v51  ;;  %2037 = vmatmul.f32.gmra.mxu1 %v3587_v30 }
 0x23e   : > { %v3591_v60 = vpop.eup %3590  ;;  %3594 = vpow2.f32 %v1708_v45  ;;  %2150 = vmatmul.f32.gmra.mxu2 %v3589_v34  ;;  %v1899_v42 = vadd.f32 %v3589_v34, %v3587_v30 }
 0x23f   : > { %6543 = vst [vmem:[#allocation19_spill] sm:$0xff] %v5207_v5  ;;  %v3593_v23 = vpop.eup %3592  ;;  %3596 = vpow2.f32 %v1710_v21  ;;  %2263 = vmatmul.f32.gmra.mxu3 %v3591_v60 }
 0x240   : > { %3598 = vpow2.f32 %v1712_v31  ;;  %2376 = vmatmul.f32.gmra.mxu0 %v3593_v23  ;;  %v2103_v55 = vpop.f32.mrf.mxu2  ;;  %v1900_v52 = vadd.f32 %v3591_v60, %v1899_v42 }
 0x241   : > { %3600 = vpow2.f32 %v1714_v8  ;;  %v2104_v33 = vadd.f32 %v2103_v55, %v1990_v22  ;;  %v2216_v50 = vpop.f32.mrf.mxu3  ;;  %v1369_v16 = vpop.xlane.xlu0 %1368 }
 0x242   : > { %v1504_v54 = vsub.f32 %v4965_v26, %v1369_v16  ;;  %v1505_v43 = vsub.f32 %v4977_v61, %v1369_v16  ;;  %v1506_v10 = vsub.f32 %v4981_v38, %v1369_v16  ;;  %v1507_v37 = vsub.f32 %v4967_v59, %v1369_v16  ;;  %v1993_v49 = vpop.f32.mrf.mxu1 }
 0x243   : > { %v2217_v27 = vadd.f32 %v2216_v50, %v2104_v33  ;;  %v5213_v56 = vadd.f32 %v3593_v23, %v1900_v52 }
 0x244   : > { %v3595_v17 = vpop.eup %3594  ;;  %v1716_v47 = vmul.f32 1.442695, %v1504_v54  ;;  %v1718_v44 = vmul.f32 1.442695, %v1505_v43  ;;  %v1720_v41 = vmul.f32 1.442695, %v1506_v10  ;;  %v2332_v13 = vpop.f32.mrf.mxu0 }
 0x245   : > { %v3597_v62 = vpop.eup %3596  ;;  %v5215_v29 = vadd.f32 %v2329_v28, %v2217_v27  ;;  %v1722_v15 = vmul.f32 1.442695, %v1507_v37  ;;  %2040 = vmatmul.f32.gmra.mxu1 %v3595_v17 }
 0x246   : > { %v3599_v26 = vpop.eup %3598  ;;  %3602 = vpow2.f32 %v1716_v47  ;;  %2153 = vmatmul.f32.gmra.mxu2 %v3597_v62  ;;  %v1904_v61 = vadd.f32 %v3597_v62, %v3595_v17 }
 0x247   : > { %6544 = vst [vmem:[#allocation20_spill] sm:$0xff] %v5215_v29  ;;  %v3601_v38 = vpop.eup %3600  ;;  %3604 = vpow2.f32 %v1718_v44  ;;  %2266 = vmatmul.f32.gmra.mxu3 %v3599_v26 }
 0x248   : > { %3606 = vpow2.f32 %v1720_v41  ;;  %2379 = vmatmul.f32.gmra.mxu0 %v3601_v38  ;;  %v2106_v59 = vpop.f32.mrf.mxu2  ;;  %v1905_v51 = vadd.f32 %v3599_v26, %v1904_v61 }
 0x249   : > { %3608 = vpow2.f32 %v1722_v15  ;;  %v2107_v22 = vadd.f32 %v2106_v59, %v1993_v49  ;;  %v2219_v40 = vpop.f32.mrf.mxu3  ;;  %v1374_v30 = vpop.xlane.xlu1 %1373 }
 0x24a   : > { %v1508_v45 = vsub.f32 %v4983_v12, %v1374_v30  ;;  %v1509_v21 = vsub.f32 %v4995_v9, %v1374_v30  ;;  %v1510_v31 = vsub.f32 %v4999_v53, %v1374_v30  ;;  %v1511_v28 = vsub.f32 %v4985_v11, %v1374_v30  ;;  %v1996_v34 = vpop.f32.mrf.mxu1 }
 0x24b   : > { %v2220_v8 = vadd.f32 %v2219_v40, %v2107_v22  ;;  %v5221_v60 = vadd.f32 %v3601_v38, %v1905_v51 }
 0x24c   : > { %v3603_v42 = vpop.eup %3602  ;;  %v1724_v23 = vmul.f32 1.442695, %v1508_v45  ;;  %v1726_v55 = vmul.f32 1.442695, %v1509_v21  ;;  %v1728_v52 = vmul.f32 1.442695, %v1510_v31  ;;  %v2335_v33 = vpop.f32.mrf.mxu0 }
 0x24d   : > { %v3605_v50 = vpop.eup %3604  ;;  %v5223_v16 = vadd.f32 %v2332_v13, %v2220_v8  ;;  %v1730_v54 = vmul.f32 1.442695, %v1511_v28  ;;  %2043 = vmatmul.f32.gmra.mxu1 %v3603_v42 }
 0x24e   : > { %v3607_v12 = vpop.eup %3606  ;;  %3610 = vpow2.f32 %v1724_v23  ;;  %2156 = vmatmul.f32.gmra.mxu2 %v3605_v50  ;;  %v1909_v9 = vadd.f32 %v3605_v50, %v3603_v42 }
 0x24f   : > { %6545 = vst [vmem:[#allocation21_spill] sm:$0xff] %v5223_v16  ;;  %v3609_v53 = vpop.eup %3608  ;;  %3612 = vpow2.f32 %v1726_v55  ;;  %2269 = vmatmul.f32.gmra.mxu3 %v3607_v12 }
 0x250   : > { %3614 = vpow2.f32 %v1728_v52  ;;  %2382 = vmatmul.f32.gmra.mxu0 %v3609_v53  ;;  %v2109_v11 = vpop.f32.mrf.mxu2  ;;  %v1910_v43 = vadd.f32 %v3607_v12, %v1909_v9 }
 0x251   : > { %3616 = vpow2.f32 %v1730_v54  ;;  %v2110_v10 = vadd.f32 %v2109_v11, %v1996_v34  ;;  %v2222_v37 = vpop.f32.mrf.mxu3  ;;  %v1379_v49 = vpop.xlane.xlu2 %1378 }
 0x252   : > { %v1512_v27 = vsub.f32 %v5001_v7, %v1379_v49  ;;  %v1513_v17 = vsub.f32 %v5013_v3, %v1379_v49  ;;  %v1514_v47 = vsub.f32 %v5017_v2, %v1379_v49  ;;  %v1515_v44 = vsub.f32 %v5003_v63, %v1379_v49  ;;  %v1999_v41 = vpop.f32.mrf.mxu1 }
 0x253   : > { %v2223_v13 = vadd.f32 %v2222_v37, %v2110_v10  ;;  %v5229_v62 = vadd.f32 %v3609_v53, %v1910_v43 }
 0x254   : > { %v3611_v15 = vpop.eup %3610  ;;  %v1732_v26 = vmul.f32 1.442695, %v1512_v27  ;;  %v1734_v61 = vmul.f32 1.442695, %v1513_v17  ;;  %v1736_v38 = vmul.f32 1.442695, %v1514_v47  ;;  %v2338_v59 = vpop.f32.mrf.mxu0 }
 0x255   : > { %v3613_v51 = vpop.eup %3612  ;;  %v5231_v22 = vadd.f32 %v2335_v33, %v2223_v13  ;;  %v1738_v40 = vmul.f32 1.442695, %v1515_v44  ;;  %2046 = vmatmul.f32.gmra.mxu1 %v3611_v15 }
 0x256   : > { %v3615_v7 = vpop.eup %3614  ;;  %3618 = vpow2.f32 %v1732_v26  ;;  %2159 = vmatmul.f32.gmra.mxu2 %v3613_v51  ;;  %v1914_v3 = vadd.f32 %v3613_v51, %v3611_v15 }
 0x257   : > { %6546 = vst [vmem:[#allocation22_spill] sm:$0xff] %v5231_v22  ;;  %v3617_v2 = vpop.eup %3616  ;;  %3620 = vpow2.f32 %v1734_v61  ;;  %2272 = vmatmul.f32.gmra.mxu3 %v3615_v7 }
 0x258   : > { %3622 = vpow2.f32 %v1736_v38  ;;  %2385 = vmatmul.f32.gmra.mxu0 %v3617_v2  ;;  %v2112_v63 = vpop.f32.mrf.mxu2  ;;  %v1915_v30 = vadd.f32 %v3615_v7, %v1914_v3 }
 0x259   : > { %3624 = vpow2.f32 %v1738_v40  ;;  %v2113_v45 = vadd.f32 %v2112_v63, %v1999_v41  ;;  %v2225_v21 = vpop.f32.mrf.mxu3  ;;  %v1384_v31 = vpop.xlane.xlu0 %1383 }
 0x25a   : > { %v1516_v28 = vsub.f32 %v5019_v36, %v1384_v31  ;;  %v1517_v34 = vsub.f32 %v5031_v19, %v1384_v31  ;;  %v1518_v8 = vsub.f32 %v5035_v32, %v1384_v31  ;;  %v1519_v42 = vsub.f32 %v5021_v58, %v1384_v31  ;;  %v2002_v23 = vpop.f32.mrf.mxu1  ;;  %v6549_v31 = vld [vmem:[#allocation32_spill] sm:$0xff] }
 0x25b   : > { %v2226_v55 = vadd.f32 %v2225_v21, %v2113_v45  ;;  %v5237_v52 = vadd.f32 %v3617_v2, %v1915_v30 }
 0x25c   : > { %v3619_v33 = vpop.eup %3618  ;;  %v1740_v50 = vmul.f32 1.442695, %v1516_v28  ;;  %v1742_v54 = vmul.f32 1.442695, %v1517_v34  ;;  %v1744_v12 = vmul.f32 1.442695, %v1518_v8  ;;  %v2341_v9 = vpop.f32.mrf.mxu0 }
 0x25d   : > { %v3621_v53 = vpop.eup %3620  ;;  %v5239_v11 = vadd.f32 %v2338_v59, %v2226_v55  ;;  %v1746_v43 = vmul.f32 1.442695, %v1519_v42  ;;  %2049 = vmatmul.f32.gmra.mxu1 %v3619_v33  ;;  %v6550_v34 = vld [vmem:[#allocation35_spill] sm:$0xff]  ;;  %v6551_v42 = vld [vmem:[#allocation36_spill] sm:$0xff]  ;;  %v6552_v55 = vld [vmem:[#allocation33_spill] sm:$0xff] }
 0x25e   : > { %v3623_v36 = vpop.eup %3622  ;;  %3626 = vpow2.f32 %v1740_v50  ;;  %2162 = vmatmul.f32.gmra.mxu2 %v3621_v53  ;;  %v1919_v19 = vadd.f32 %v3621_v53, %v3619_v33 }
 0x25f   : > { %6547 = vst [vmem:[#allocation23_spill] sm:$0xff] %v5239_v11  ;;  %v3625_v32 = vpop.eup %3624  ;;  %3628 = vpow2.f32 %v1742_v54  ;;  %2275 = vmatmul.f32.gmra.mxu3 %v3623_v36 }
 0x260   : > { %3630 = vpow2.f32 %v1744_v12  ;;  %2388 = vmatmul.f32.gmra.mxu0 %v3625_v32  ;;  %v2115_v58 = vpop.f32.mrf.mxu2  ;;  %v1920_v10 = vadd.f32 %v3623_v36, %v1919_v19 }
 0x261   : > { %3632 = vpow2.f32 %v1746_v43  ;;  %v2116_v37 = vadd.f32 %v2115_v58, %v2002_v23  ;;  %v2228_v49 = vpop.f32.mrf.mxu3  ;;  %v1389_v27 = vpop.xlane.xlu1 %1388 }
 0x262   : > { %v1520_v17 = vsub.f32 %v5037_v4, %v1389_v27  ;;  %v1521_v47 = vsub.f32 %v5049_v48, %v1389_v27  ;;  %v1522_v44 = vsub.f32 %v5053_v14, %v1389_v27  ;;  %v1523_v41 = vsub.f32 %v5039_v18, %v1389_v27  ;;  %v2005_v13 = vpop.f32.mrf.mxu1 }
 0x263   : > { %v2229_v15 = vadd.f32 %v2228_v49, %v2116_v37  ;;  %v5245_v26 = vadd.f32 %v3625_v32, %v1920_v10 }
 0x264   : > { %v3627_v61 = vpop.eup %3626  ;;  %v1748_v38 = vmul.f32 1.442695, %v1520_v17  ;;  %v1750_v59 = vmul.f32 1.442695, %v1521_v47  ;;  %v1752_v51 = vmul.f32 1.442695, %v1522_v44  ;;  %v2344_v40 = vpop.f32.mrf.mxu0 }
 0x265   : > { %v3629_v7 = vpop.eup %3628  ;;  %v5247_v3 = vadd.f32 %v2341_v9, %v2229_v15  ;;  %v1754_v2 = vmul.f32 1.442695, %v1523_v41  ;;  %2052 = vmatmul.f32.gmra.mxu1 %v3627_v61  ;;  %v6553_v41 = vld [vmem:[#allocation37_spill] sm:$0xff]  ;;  %v6554_v15 = vld [vmem:[#allocation39_spill] sm:$0xff] }
 0x266   : > { %v3631_v4 = vpop.eup %3630  ;;  %3634 = vpow2.f32 %v1748_v38  ;;  %2165 = vmatmul.f32.gmra.mxu2 %v3629_v7  ;;  %v1924_v48 = vadd.f32 %v3629_v7, %v3627_v61  ;;  %v6555_v38 = vld [vmem:[#allocation40_spill] sm:$0xff] }
 0x267   : > { %6548 = vst [vmem:[#allocation43_spill] sm:$0xff] %v5247_v3  ;;  %v3633_v14 = vpop.eup %3632  ;;  %3636 = vpow2.f32 %v1750_v59  ;;  %2278 = vmatmul.f32.gmra.mxu3 %v3631_v4 }
 0x268   : > { %3638 = vpow2.f32 %v1752_v51  ;;  %2391 = vmatmul.f32.gmra.mxu0 %v3633_v14  ;;  %v2118_v18 = vpop.f32.mrf.mxu2  ;;  %v1925_v63 = vadd.f32 %v3631_v4, %v1924_v48  ;;  %v6556_v51 = vld [vmem:[#allocation5_spill] sm:$0xff] }
 0x269   : > { %3640 = vpow2.f32 %v1754_v2  ;;  %v2119_v30 = vadd.f32 %v2118_v18, %v2005_v13  ;;  %v2231_v45 = vpop.f32.mrf.mxu3  ;;  %v1394_v21 = vpop.xlane.xlu2 %1393 }
 0x26a   : > { %v1524_v28 = vsub.f32 %v6549_v31, %v1394_v21  ;;  %v1525_v8 = vsub.f32 %v6550_v34, %v1394_v21  ;;  %v1526_v23 = vsub.f32 %v6551_v42, %v1394_v21  ;;  %v1527_v33 = vsub.f32 %v6552_v55, %v1394_v21  ;;  %v2008_v50 = vpop.f32.mrf.mxu1  ;;  %v6557_v55 = vld [vmem:[#allocation41_spill] sm:$0xff] }
 0x26b   : > { %v2232_v54 = vadd.f32 %v2231_v45, %v2119_v30  ;;  %v5253_v12 = vadd.f32 %v3633_v14, %v1925_v63 }
 0x26c   : > { %v5255_v9 = vpop.eup %3634  ;;  %v1756_v53 = vmul.f32 1.442695, %v1524_v28  ;;  %v1758_v43 = vmul.f32 1.442695, %v1525_v8  ;;  %v1760_v36 = vmul.f32 1.442695, %v1526_v23  ;;  %v2347_v19 = vpop.f32.mrf.mxu0 }
 0x26d   : > { %v5257_v32 = vpop.eup %3636  ;;  %v5259_v58 = vadd.f32 %v2344_v40, %v2232_v54  ;;  %v1762_v10 = vmul.f32 1.442695, %v1527_v33  ;;  %2055 = vmatmul.f32.gmra.mxu1 %v5255_v9 }
 0x26e   : > { %v5262_v37 = vpop.eup %3638  ;;  %3642 = vpow2.f32 %v1756_v53  ;;  %2168 = vmatmul.f32.gmra.mxu2 %v5257_v32  ;;  %v6559_v53 = vld [vmem:[#allocation7_spill] sm:$0xff] }
 0x26f   : > { %v5265_v49 = vpop.eup %3640  ;;  %3644 = vpow2.f32 %v1758_v43  ;;  %2281 = vmatmul.f32.gmra.mxu3 %v5262_v37 }
 0x270   : > { %3646 = vpow2.f32 %v1760_v36  ;;  %2394 = vmatmul.f32.gmra.mxu0 %v5265_v49  ;;  %v2121_v27 = vpop.f32.mrf.mxu2  ;;  %v6560_v36 = vld [vmem:[#allocation8_spill] sm:$0xff] }
 0x271   : > { %3648 = vpow2.f32 %v1762_v10  ;;  %v2122_v17 = vadd.f32 %v2121_v27, %v2008_v50  ;;  %v2234_v47 = vpop.f32.mrf.mxu3  ;;  %v1399_v44 = vpop.xlane.xlu0 %1398  ;;  %v6558_v50 = vld [vmem:[#allocation9_spill] sm:$0xff] }
 0x272   : > { %v1528_v13 = vsub.f32 %v6553_v41, %v1399_v44  ;;  %v1529_v61 = vsub.f32 %v6554_v15, %v1399_v44  ;;  %v1530_v59 = vsub.f32 %v6555_v38, %v1399_v44  ;;  %v1531_v40 = vsub.f32 %v6556_v51, %v1399_v44  ;;  %v2011_v7 = vpop.f32.mrf.mxu1 }
 0x273   : > { %v2235_v2 = vadd.f32 %v2234_v47, %v2122_v17 }
 0x274   : > { %v5273_v4 = vpop.eup %3642  ;;  %v1764_v48 = vmul.f32 1.442695, %v1528_v13  ;;  %v1766_v14 = vmul.f32 1.442695, %v1529_v61  ;;  %v1768_v18 = vmul.f32 1.442695, %v1530_v59  ;;  %v2350_v63 = vpop.f32.mrf.mxu0 }
 0x275   : > { %v5275_v30 = vpop.eup %3644  ;;  %v5277_v45 = vadd.f32 %v2347_v19, %v2235_v2  ;;  %v1770_v21 = vmul.f32 1.442695, %v1531_v40  ;;  %2058 = vmatmul.f32.gmra.mxu1 %v5273_v4 }
 0x276   : > { %v5280_v31 = vpop.eup %3646  ;;  %3650 = vpow2.f32 %v1764_v48  ;;  %2171 = vmatmul.f32.gmra.mxu2 %v5275_v30 }
 0x277   : > { %v5283_v28 = vpop.eup %3648  ;;  %3652 = vpow2.f32 %v1766_v14  ;;  %2284 = vmatmul.f32.gmra.mxu3 %v5280_v31 }
 0x278   : > { %3654 = vpow2.f32 %v1768_v18  ;;  %2397 = vmatmul.f32.gmra.mxu0 %v5283_v28  ;;  %v2124_v34 = vpop.f32.mrf.mxu2 }
 0x279   : > { %3656 = vpow2.f32 %v1770_v21  ;;  %v2125_v8 = vadd.f32 %v2124_v34, %v2011_v7  ;;  %v2237_v42 = vpop.f32.mrf.mxu3  ;;  %v1404_v23 = vpop.xlane.xlu1 %1403  ;;  %v6561_v21 = vld [vmem:[#allocation10_spill] sm:$0xff]  ;;  %v6562_v34 = vld [vmem:[#allocation11_spill] sm:$0xff] }
 0x27a   : > { %v1532_v33 = vsub.f32 %v6557_v55, %v1404_v23  ;;  %v1533_v54 = vsub.f32 %v6558_v50, %v1404_v23  ;;  %v1534_v43 = vsub.f32 %v6559_v53, %v1404_v23  ;;  %v1535_v19 = vsub.f32 %v6560_v36, %v1404_v23  ;;  %v2014_v10 = vpop.f32.mrf.mxu1  ;;  %v6564_v55 = vld [vmem:[#allocation13_spill] sm:$0xff] }
 0x27b   : > { %v2238_v27 = vadd.f32 %v2237_v42, %v2125_v8  ;;  %v6563_v42 = vld [vmem:[#allocation42_spill] sm:$0xff] }
 0x27c   : > { %v3651_v17 = vpop.eup %3650  ;;  %v1772_v47 = vmul.f32 1.442695, %v1532_v33  ;;  %v1774_v44 = vmul.f32 1.442695, %v1533_v54  ;;  %v1776_v41 = vmul.f32 1.442695, %v1534_v43  ;;  %v2353_v13 = vpop.f32.mrf.mxu0 }
 0x27d   : > { %v3653_v15 = vpop.eup %3652  ;;  %v5291_v61 = vadd.f32 %v2350_v63, %v2238_v27  ;;  %v1778_v38 = vmul.f32 1.442695, %v1535_v19  ;;  %2061 = vmatmul.f32.gmra.mxu1 %v3651_v17 }
 0x27e   : > { %v3655_v59 = vpop.eup %3654  ;;  %3658 = vpow2.f32 %v1772_v47  ;;  %2174 = vmatmul.f32.gmra.mxu2 %v3653_v15  ;;  %v1939_v51 = vadd.f32 %v3653_v15, %v3651_v17 }
 0x27f   : > { %v3657_v40 = vpop.eup %3656  ;;  %3660 = vpow2.f32 %v1774_v44  ;;  %2287 = vmatmul.f32.gmra.mxu3 %v3655_v59 }
 0x280   : > { %3662 = vpow2.f32 %v1776_v41  ;;  %2400 = vmatmul.f32.gmra.mxu0 %v3657_v40  ;;  %v2127_v7 = vpop.f32.mrf.mxu2  ;;  %v1940_v2 = vadd.f32 %v3655_v59, %v1939_v51 }
 0x281   : > { %3664 = vpow2.f32 %v1778_v38  ;;  %v2128_v48 = vadd.f32 %v2127_v7, %v2014_v10  ;;  %v2240_v14 = vpop.f32.mrf.mxu3  ;;  %v1409_v18 = vpop.xlane.xlu2 %1408 }
 0x282   : > { %v1536_v63 = vsub.f32 %v6561_v21, %v1409_v18  ;;  %v1537_v8 = vsub.f32 %v6562_v34, %v1409_v18  ;;  %v1538_v23 = vsub.f32 %v6563_v42, %v1409_v18  ;;  %v1539_v33 = vsub.f32 %v6564_v55, %v1409_v18  ;;  %v5297_v50 = vpop.f32.mrf.mxu1 }
 0x283   : > { %v2241_v54 = vadd.f32 %v2240_v14, %v2128_v48  ;;  %v1941_v53 = vadd.f32 %v3657_v40, %v1940_v2  ;;  %v6566_v48 = vld [vmem:[#allocation16_spill] sm:$0xff] }
 0x284   : > { %v3659_v43 = vpop.eup %3658  ;;  %v1780_v36 = vmul.f32 1.442695, %v1536_v63  ;;  %v1782_v19 = vmul.f32 1.442695, %v1537_v8  ;;  %v1784_v27 = vmul.f32 1.442695, %v1538_v23  ;;  %v5299_v17 = vpop.f32.mrf.mxu0 }
 0x285   : > { %v3661_v10 = vpop.eup %3660  ;;  %v5301_v47 = vadd.f32 %v2353_v13, %v2241_v54  ;;  %v1786_v44 = vmul.f32 1.442695, %v1539_v33  ;;  %1942 = vadd.xlane.f32.xlu0 %v1941_v53  ;;  %2064 = vmatmul.f32.gmra.mxu1 %v3659_v43  ;;  %v6565_v13 = vld [vmem:[#allocation14_spill] sm:$0xff]  ;;  %v1929_v54 = vadd.f32 %v5257_v32, %v5255_v9 }
 0x286   : > { %v3663_v41 = vpop.eup %3662  ;;  %3666 = vpow2.f32 %v1780_v36  ;;  %2177 = vmatmul.f32.gmra.mxu2 %v3661_v10  ;;  %v1944_v15 = vadd.f32 %v3661_v10, %v3659_v43 }
 0x287   : > { %v3665_v38 = vpop.eup %3664  ;;  %3668 = vpow2.f32 %v1782_v19  ;;  %2290 = vmatmul.f32.gmra.mxu3 %v3663_v41  ;;  %v1930_v10 = vadd.f32 %v5262_v37, %v1929_v54 }
 0x288   : > { %3670 = vpow2.f32 %v1784_v27  ;;  %2403 = vmatmul.f32.gmra.mxu0 %v3665_v38  ;;  %v5303_v59 = vpop.f32.mrf.mxu2  ;;  %v1414_v51 = vpop.xlane.xlu0 %1413  ;;  %v1945_v40 = vadd.f32 %v3663_v41, %v1944_v15 }
 0x289   : > { %3672 = vpow2.f32 %v1786_v44  ;;  %v5305_v7 = vpop.f32.mrf.mxu3  ;;  %v1540_v2 = vsub.f32 %v6565_v13, %v1414_v51  ;;  %v1541_v14 = vsub.f32 %v6566_v48, %v1414_v51  ;;  %v1542_v18 = vsub.f32 %v5151_v1, %v1414_v51 }
 0x28a   : > { %v5310_v21 = vpop.f32.mrf.mxu1  ;;  %v1543_v63 = vsub.f32 %v5153_v35, %v1414_v51  ;;  %v1946_v33 = vadd.f32 %v3665_v38, %v1945_v40  ;;  %v6567_v40 = vld [vmem:[#allocation17_spill] sm:$0xff] }
 0x28b   : > { %v1788_v34 = vmul.f32 1.442695, %v1540_v2  ;;  %v1790_v8 = vmul.f32 1.442695, %v1541_v14  ;;  %v1792_v23 = vmul.f32 1.442695, %v1542_v18 }
 0x28c   : > { %v3667_v42 = vpop.eup %3666  ;;  %v5313_v55 = vpop.f32.mrf.mxu0  ;;  %v1794_v43 = vmul.f32 1.442695, %v1543_v63  ;;  %1947 = vadd.xlane.f32.xlu1 %v1946_v33 }
 0x28d   : > { %v3669_v53 = vpop.eup %3668  ;;  %3674 = vpow2.f32 %v1788_v34  ;;  %2067 = vmatmul.f32.gmra.mxu1 %v3667_v42  ;;  %v1931_v34 = vadd.f32 %v5265_v49, %v1930_v10 }
 0x28e   : > { %v3671_v36 = vpop.eup %3670  ;;  %3676 = vpow2.f32 %v1790_v8  ;;  %2180 = vmatmul.f32.gmra.mxu2 %v3669_v53  ;;  %v1949_v1 = vadd.f32 %v3669_v53, %v3667_v42 }
 0x28f   : > { %v3673_v35 = vpop.eup %3672  ;;  %3678 = vpow2.f32 %v1792_v23  ;;  %2293 = vmatmul.f32.gmra.mxu3 %v3671_v36 }
 0x290   : > { %3680 = vpow2.f32 %v1794_v43  ;;  %2406 = vmatmul.f32.gmra.mxu0 %v3673_v35  ;;  %v5317_v19 = vpop.f32.mrf.mxu2  ;;  %v1950_v27 = vadd.f32 %v3671_v36, %v1949_v1  ;;  %v5322_v44 = vpop.xlane.xlu0 %1877 }
 0x291   : > { %v5320_v9 = vpop.f32.mrf.mxu3  ;;  %v1419_v32 = vpop.xlane.xlu1 %1418  ;;  %3682 = vrcp.f32 %v5322_v44  ;;  %vm2617_vm4 = vweird.f32 %v5322_v44 }
 0x292   : > { %v1544_v41 = vsub.f32 %v5161_v57, %v1419_v32  ;;  %v1545_v15 = vsub.f32 %v5163_v20, %v1419_v32  ;;  %v5326_v38 = vpop.f32.mrf.mxu1  ;;  %v1546_v13 = vsub.f32 %v6567_v40, %v1419_v32  ;;  %v1547_v2 = vsub.f32 %v5170_v39, %v1419_v32  ;;  %v5334_v39 = vpop.xlane.xlu2 %1872 }
 0x293   : > { %v3675_v51 = vpop.eup %3674  ;;  %v1951_v63 = vadd.f32 %v3673_v35, %v1950_v27  ;;  %vm2603_vm9 = vweird.f32 %v5334_v39 }
 0x294   : > { %v3677_v48 = vpop.eup %3676  ;;  %v1796_v14 = vmul.f32 1.442695, %v1544_v41  ;;  %v1798_v18 = vmul.f32 1.442695, %v1545_v15  ;;  %v5330_v37 = vpop.f32.mrf.mxu0  ;;  %v1800_v57 = vmul.f32 1.442695, %v1546_v13  ;;  %1932 = vadd.xlane.f32.xlu1 %v1931_v34  ;;  %v1934_v34 = vadd.f32 %v5275_v30, %v5273_v4 }
 0x295   : > { %v3679_v8 = vpop.eup %3678  ;;  %v1802_v20 = vmul.f32 1.442695, %v1547_v2  ;;  %2070 = vmatmul.f32.gmra.mxu1 %v3675_v51  ;;  %1952 = vadd.xlane.f32.xlu2 %v1951_v63  ;;  %v1954_v23 = vadd.f32 %v3677_v48, %v3675_v51  ;;  %v6568_v41 = vld [vmem:[#allocation38_spill] sm:$0xff] }
 0x296   : > { %v3681_v42 = vpop.eup %3680  ;;  %3684 = vpow2.f32 %v1796_v14  ;;  %2183 = vmatmul.f32.gmra.mxu2 %v3677_v48 }
 0x297   : > { %3686 = vpow2.f32 %v1798_v18  ;;  %2296 = vmatmul.f32.gmra.mxu3 %v3679_v8  ;;  %v1955_v53 = vadd.f32 %v3679_v8, %v1954_v23  ;;  %v5341_v36 = vpop.eup %3682 }
 0x298   : > { %3688 = vpow2.f32 %v1800_v57  ;;  %2409 = vmatmul.f32.gmra.mxu0 %v3681_v42  ;;  %v2136_v33 = vpop.f32.mrf.mxu2  ;;  %v2613_v13 = vmul.f32 %v5341_v36, %v5322_v44  ;;  %vm2618_vm1 = vweird.f32 %v5341_v36 }
 0x299   : > { %3690 = vpow2.f32 %v1802_v20  ;;  %v5336_v49 = vpop.f32.mrf.mxu3  ;;  %v5338_v54 = vpop.xlane.xlu1 %1867  ;;  %v1956_v35 = vadd.f32 %v3681_v42, %v1955_v53  ;;  %v6569_v53 = vld [vmem:[#allocation12_spill] sm:$0xff]  ;;  %vm5379_vm5 = vmor %vm2617_vm4, %vm2618_vm1 }
 0x29a   : > { %3692 = vrcp.f32 %v5334_v39  ;;  %v2026_v43 = vpop.f32.mrf.mxu1  ;;  %v2614_v20 = vsub.f32 1.0, %v2613_v13  ;;  %vm2589_vm14 = vweird.f32 %v5338_v54 }
 0x29b   : > { %1957 = vadd.xlane.f32.xlu0 %v1956_v35  ;;  %3694 = vrcp.f32 %v5338_v54 }
 0x29c   : > { %v3685_v1 = vpop.eup %3684  ;;  %1852 = vadd.xlane.f32.xlu1 %v6568_v41 }
 0x29d   : > { %v3687_v27 = vpop.eup %3686  ;;  %v5343_v10 = vpop.f32.mrf.mxu0  ;;  %2073 = vmatmul.f32.gmra.mxu1 %v3685_v1 }
 0x29e   : > { %v3689_v32 = vpop.eup %3688  ;;  %v1959_v15 = vadd.f32 %v3687_v27, %v3685_v1  ;;  %2186 = vmatmul.f32.gmra.mxu2 %v3687_v27  ;;  %v1935_v1 = vadd.f32 %v5280_v31, %v1934_v34 }
 0x29f   : > { %v3691_v51 = vpop.eup %3690  ;;  %2299 = vmatmul.f32.gmra.mxu3 %v3689_v32 }
 0x2a0   : > { %v5347_v40 = vpop.eup %3692  ;;  %2412 = vmatmul.f32.gmra.mxu0 %v3691_v51  ;;  %v1960_v2 = vadd.f32 %v3689_v32, %v1959_v15  ;;  %v2615_v32 = vmul.f32 %v5341_v36, %v2614_v20 }
 0x2a1   : > { %v2139_v48 = vpop.f32.mrf.mxu2  ;;  %v1883_v14 = vpop.xlane.xlu1 %1882  ;;  %v2599_v8 = vmul.f32 %v5347_v40, %v5334_v39  ;;  %vm2604_vm3 = vweird.f32 %v5347_v40 }
 0x2a2   : > { %v2252_v18 = vpop.f32.mrf.mxu3  ;;  %3696 = vrcp.f32 %v1883_v14  ;;  %v2029_v63 = vpop.f32.mrf.mxu1  ;;  %v1961_v57 = vadd.f32 %v3691_v51, %v1960_v2  ;;  %v2140_v30 = vadd.f32 %v2139_v48, %v2026_v43  ;;  %v2616_v34 = vadd.f32 %v5341_v36, %v2615_v32  ;;  %vm5399_vm11 = vmor %vm2603_vm9, %vm2604_vm3 }
 0x2a3   : > { %v5355_v42 = vpop.eup %3694  ;;  %1862 = vadd.xlane.f32.xlu0 %v6569_v53  ;;  %v2600_v35 = vsub.f32 1.0, %v2599_v8  ;;  %v2637_v20 = vand.u32 2147483648, %v1883_v14  ;;  %vm2631_vm6 = vweird.f32 %v1883_v14 }
 0x2a4   : > { %1962 = vadd.xlane.f32.xlu2 %v1961_v57  ;;  %1917 = vadd.xlane.f32.xlu1 %v5237_v52  ;;  %v2585_v4 = vmul.f32 %v5355_v42, %v5338_v54  ;;  %v1936_v57 = vadd.f32 %v5283_v28, %v1935_v1  ;;  %v2137_v52 = vadd.f32 %v2136_v33, %v5326_v38  ;;  %v2623_v28 = vand.u32 2147483648, %v5322_v44  ;;  %v6571_v38 = vld [vmem:[#allocation30_spill] sm:$0xff] }
 0x2a5   : > { %v2368_v23 = vpop.f32.mrf.mxu0  ;;  %v2601_v53 = vmul.f32 %v5347_v40, %v2600_v35  ;;  %v2253_v43 = vadd.f32 %v2252_v18, %v2140_v30  ;;  %v2134_v33 = vadd.f32 %v5317_v19, %v5310_v21  ;;  %v2621_v35 = vand.u32 2147483647, %v5322_v44 }
 0x2a6   : > { %v2586_v8 = vsub.f32 1.0, %v2585_v4  ;;  %v2638_v21 = vor.u32 1.1754944e-38, %v2637_v20  ;;  %vm2590_vm12 = vweird.f32 %v5355_v42 }
 0x2a7   : > { %v2366_v4 = vadd.f32 %v5343_v10, %v2253_v43  ;;  %vm2622_vm10 = vcmp.eq.f32.partialorder %v2621_v35, 8.507059e+37  ;;  %vm2591_vm15 = vmor %vm2589_vm14, %vm2590_vm12 }
 0x2a8   : > { %v3697_v27 = vpop.eup %3696  ;;  %v2587_v19 = vmul.f32 %v5355_v42, %v2586_v8 }
 0x2a9   : > { %v2627_v41 = vmul.f32 %v3697_v27, %v1883_v14  ;;  %v2142_v15 = vpop.f32.mrf.mxu2  ;;  %vm2632_vm2 = vweird.f32 %v3697_v27 }
 0x2aa   : > { %v2143_v51 = vadd.f32 %v2142_v15, %v2029_v63  ;;  %v2255_v13 = vpop.f32.mrf.mxu3  ;;  %v2032_v2 = vpop.f32.mrf.mxu1  ;;  %v2635_v63 = vand.u32 2147483647, %v1883_v14  ;;  %vm2633_vm7 = vmor %vm2631_vm6, %vm2632_vm2  ;;  %v2609_v14 = vand.u32 2147483648, %v5334_v39  ;;  %v2588_v8 = vadd.f32 %v5355_v42, %v2587_v19 }
 0x2ab   : > { %v2628_v31 = vsub.f32 1.0, %v2627_v41  ;;  %1927 = vadd.xlane.f32.xlu0 %v5253_v12  ;;  %v2620_v12 = vsel %vm5379_vm5, %v5341_v36, %v2616_v34  ;;  %v2624_v41 = vor.u32 1.1754944e-38, %v2623_v28  ;;  %v2607_v36 = vand.u32 2147483647, %v5334_v39 }
 0x2ac   : > { %v2256_v0 = vadd.f32 %v2255_v13, %v2143_v51  ;;  %1937 = vadd.xlane.f32.xlu2 %v1936_v57  ;;  %1837 = vadd.xlane.f32.xlu1 %v6571_v38  ;;  %vm2636_vm8 = vcmp.eq.f32.partialorder %v2635_v63, 8.507059e+37  ;;  %v2610_v20 = vor.u32 1.1754944e-38, %v2609_v14 }
 0x2ad   : > { %v2629_v48 = vmul.f32 %v3697_v27, %v2628_v31  ;;  %v2371_v15 = vpop.f32.mrf.mxu0  ;;  %vm2608_vm13 = vcmp.eq.f32.partialorder %v2607_v36, 8.507059e+37 }
 0x2ae   : > { %v5371_v1 = vadd.f32 %v2368_v23, %v2256_v0  ;;  %v2602_v0 = vadd.f32 %v5347_v40, %v2601_v53  ;;  %v2250_v23 = vadd.f32 %v5336_v49, %v2137_v52  ;;  %v2131_v52 = vadd.f32 %v5303_v59, %v5297_v50  ;;  %v6576_v59 = vld [vmem:[#allocation6_spill] sm:$0xff] }
 0x2af   : > { %v2630_v32 = vadd.f32 %v3697_v27, %v2629_v48  ;;  %v6578_v48 = vld [vmem:[#allocation34_spill] sm:$0xff] }
 0x2b0   : > { %6570 = vst [vmem:[#allocation32_spill] sm:$0xff] %v5371_v1  ;;  %v2606_v34 = vsel %vm5399_vm11, %v5347_v40, %v2602_v0  ;;  %v2363_v39 = vadd.f32 %v5330_v37, %v2250_v23  ;;  %v2593_v40 = vand.u32 2147483647, %v5338_v54  ;;  %v2244_v28 = vadd.f32 %v5305_v7, %v2131_v52 }
 0x2b1   : > { %v2634_v30 = vsel %vm2633_vm7, %v3697_v27, %v2630_v32  ;;  %v2145_v44 = vpop.f32.mrf.mxu2  ;;  %v2247_v27 = vadd.f32 %v5320_v9, %v2134_v33  ;;  %v2595_v9 = vand.u32 2147483648, %v5338_v54  ;;  %v2611_v63 = vsel %vm2608_vm13, %v2610_v20, %v2606_v34 }
 0x2b2   : > { %v2639_v51 = vsel %vm2636_vm8, %v2638_v21, %v2634_v30  ;;  %v2146_v13 = vadd.f32 %v2145_v44, %v2032_v2  ;;  %v2258_v49 = vpop.f32.mrf.mxu3  ;;  %v2035_v57 = vpop.f32.mrf.mxu1  ;;  %v2625_v2 = vsel %vm2622_vm10, %v2624_v41, %v2620_v12  ;;  %vm2594_vm1 = vcmp.eq.f32.partialorder %v2593_v40, 8.507059e+37  ;;  %v6581_v41 = vld [vmem:[#allocation31_spill] sm:$0xff]  ;;  %v6589_v40 = vld [vmem:[#allocation24_spill] sm:$0xff] }
 0x2b3   : > { %v2879_v53 = vmul.f32 %v2639_v51, %v2366_v4  ;;  %1847 = vadd.xlane.f32.xlu0 %v6578_v48  ;;  %v2878_v37 = vmul.f32 %v2625_v2, %v2363_v39  ;;  %v2360_v38 = vadd.f32 %v5313_v55, %v2247_v27  ;;  %v2596_v18 = vor.u32 1.1754944e-38, %v2595_v9  ;;  %v6580_v55 = vld [vmem:[#allocation27_spill] sm:$0xff]  ;;  %v6583_v51 = vld [vmem:[#allocation29_spill] sm:$0xff] }
 0x2b4   : > { %v2259_v31 = vadd.f32 %v2258_v49, %v2146_v13  ;;  %1857 = vadd.xlane.f32.xlu2 %v6576_v59  ;;  %1902 = vadd.xlane.f32.xlu1 %v5213_v56  ;;  %v2357_v54 = vadd.f32 %v5299_v17, %v2244_v28 }
 0x2b5   : > { %v2374_v50 = vpop.f32.mrf.mxu0  ;;  %3339 = vmatpush.xpose.msk.msrb.mxu1 %vm310_vm0, %v2879_v53  ;;  %v2877_v0 = vmul.f32 %v2611_v63, %v2360_v38 }
 0x2b6   : > { %v5413_v43 = vadd.f32 %v2371_v15, %v2259_v31  ;;  %v2592_v15 = vsel %vm2591_vm15, %v5355_v42, %v2588_v8  ;;  %v6585_v8 = vld [vmem:[#allocation28_spill] sm:$0xff] }
 0x2b7   : > { %v2597_v12 = vsel %vm2594_vm1, %v2596_v18, %v2592_v15  ;;  %v6590_v18 = vld [vmem:[#allocation25_spill] sm:$0xff] }
 0x2b8   : > { %6577 = vst [vmem:[#allocation35_spill] sm:$0xff] %v5413_v43  ;;  %v2876_v42 = vmul.f32 %v2597_v12, %v2357_v54 }
 0x2b9   : > { %v2148_v33 = vpop.f32.mrf.mxu2  ;;  %3340 = vmatpush.xpose.msk.msrb.mxu1 %vm310_vm0, %v2878_v37 }
 0x2ba   : > { %v2149_v35 = vadd.f32 %v2148_v33, %v2035_v57  ;;  %v2261_v56 = vpop.f32.mrf.mxu3  ;;  %v2038_v32 = vpop.f32.mrf.mxu1 }
 0x2bb   : > { %1912 = vadd.xlane.f32.xlu0 %v5229_v62 }
 0x2bc   : > { %v2262_v23 = vadd.f32 %v2261_v56, %v2149_v35  ;;  %1922 = vadd.xlane.f32.xlu2 %v5245_v26  ;;  %1822 = vadd.xlane.f32.xlu1 %v6580_v55 }
 0x2bd   : > { %v2377_v21 = vpop.f32.mrf.mxu0  ;;  %3341 = vmatpush.xpose.msk.msrb.mxu1 %vm310_vm0, %v2877_v0 }
 0x2be   : > { %v5426_v7 = vadd.f32 %v2374_v50, %v2262_v23  ;;  %v6587_v50 = vld [vmem:[#allocation26_spill] sm:$0xff] }
 0x2c0   : > { %6579 = vst [vmem:[#allocation36_spill] sm:$0xff] %v5426_v7 }
 0x2c1   : > { %v2151_v19 = vpop.f32.mrf.mxu2  ;;  %3342 = vmatpush.xpose.msk.msrb.mxu1 %vm310_vm0, %v2876_v42 }
 0x2c2   : > { %v2152_v4 = vadd.f32 %v2151_v19, %v2038_v32  ;;  %v2264_v30 = vpop.f32.mrf.mxu3  ;;  %v2041_v44 = vpop.f32.mrf.mxu1 }
 0x2c3   : > { %1832 = vadd.xlane.f32.xlu0 %v6583_v51 }
 0x2c4   : > { %v2265_v14 = vadd.f32 %v2264_v30, %v2152_v4  ;;  %1842 = vadd.xlane.f32.xlu2 %v6581_v41  ;;  %1887 = vadd.xlane.f32.xlu1 %v5189_v46 }
 0x2c5   : > { %v2380_v17 = vpop.f32.mrf.mxu0 }
 0x2c6   : > { %v5432_v26 = vadd.f32 %v2377_v21, %v2265_v14 }
 0x2c8   : > { %6582 = vst [vmem:[#allocation33_spill] sm:$0xff] %v5432_v26 }
 0x2c9   : > { %v2154_v62 = vpop.f32.mrf.mxu2 }
 0x2ca   : > { %v2155_v13 = vadd.f32 %v2154_v62, %v2041_v44  ;;  %v2267_v49 = vpop.f32.mrf.mxu3  ;;  %v2044_v57 = vpop.f32.mrf.mxu1 }
 0x2cb   : > { %1897 = vadd.xlane.f32.xlu0 %v5205_v25 }
 0x2cc   : > { %v2268_v36 = vadd.f32 %v2267_v49, %v2155_v13  ;;  %1907 = vadd.xlane.f32.xlu2 %v5221_v60 }
 0x2cd   : > { %v2383_v53 = vpop.f32.mrf.mxu0 }
 0x2ce   : > { %v5437_v52 = vadd.f32 %v2380_v17, %v2268_v36 }
 0x2d0   : > { %6584 = vst [vmem:[#allocation37_spill] sm:$0xff] %v5437_v52 }
 0x2d1   : > { %v2157_v10 = vpop.f32.mrf.mxu2 }
 0x2d2   : > { %v2158_v27 = vadd.f32 %v2157_v10, %v2044_v57  ;;  %v2270_v2 = vpop.f32.mrf.mxu3  ;;  %v2047_v31 = vpop.f32.mrf.mxu1 }
 0x2d3   : > { %1817 = vadd.xlane.f32.xlu0 %v6587_v50 }
 0x2d4   : > { %v2271_v34 = vadd.f32 %v2270_v2, %v2158_v27  ;;  %1827 = vadd.xlane.f32.xlu2 %v6585_v8 }
 0x2d5   : > { %v2386_v39 = vpop.f32.mrf.mxu0 }
 0x2d6   : > { %v5441_v46 = vadd.f32 %v2383_v53, %v2271_v34 }
 0x2d8   : > { %6586 = vst [vmem:[#allocation39_spill] sm:$0xff] %v5441_v46 }
 0x2d9   : > { %v2160_v59 = vpop.f32.mrf.mxu2 }
 0x2da   : > { %v2161_v20 = vadd.f32 %v2160_v59, %v2047_v31  ;;  %v2273_v9 = vpop.f32.mrf.mxu3  ;;  %v2050_v60 = vpop.f32.mrf.mxu1 }
 0x2db   : > { %1807 = vadd.xlane.f32.xlu0 %v6589_v40 }
 0x2dc   : > { %v2274_v48 = vadd.f32 %v2273_v9, %v2161_v20  ;;  %1892 = vadd.xlane.f32.xlu2 %v5197_v6 }
 0x2dd   : > { %v2389_v37 = vpop.f32.mrf.mxu0 }
 0x2de   : > { %v5445_v25 = vadd.f32 %v2386_v39, %v2274_v48 }
 0x2e0   : > { %6588 = vst [vmem:[#allocation40_spill] sm:$0xff] %v5445_v25 }
 0x2e1   : > { %v2163_v63 = vpop.f32.mrf.mxu2 }
 0x2e2   : > { %v2164_v28 = vadd.f32 %v2163_v63, %v2050_v60  ;;  %v2276_v38 = vpop.f32.mrf.mxu3  ;;  %v2053_v33 = vpop.f32.mrf.mxu1 }
 0x2e4   : > { %v2277_v15 = vadd.f32 %v2276_v38, %v2164_v28  ;;  %1812 = vadd.xlane.f32.xlu2 %v6590_v18 }
 0x2e5   : > { %v2392_v56 = vpop.f32.mrf.mxu0 }
 0x2e6   : > { %v5449_v35 = vadd.f32 %v2389_v37, %v2277_v15 }
 0x2e8   : > { %6591 = vst [vmem:[#allocation5_spill] sm:$0xff] %v5449_v35 }
 0x2e9   : > { %v2166_v32 = vpop.f32.mrf.mxu2 }
 0x2ea   : > { %v2167_v0 = vadd.f32 %v2166_v32, %v2053_v33  ;;  %v2279_v23 = vpop.f32.mrf.mxu3  ;;  %v2056_v54 = vpop.f32.mrf.mxu1 }
 0x2ec   : > { %v2280_v12 = vadd.f32 %v2279_v23, %v2167_v0 }
 0x2ed   : > { %v2395_v21 = vpop.f32.mrf.mxu0 }
 0x2ee   : > { %v5451_v6 = vadd.f32 %v2392_v56, %v2280_v12 }
 0x2f0   : > { %6592 = vst [vmem:[#allocation41_spill] sm:$0xff] %v5451_v6 }
 0x2f1   : > { %v2169_v55 = vpop.f32.mrf.mxu2 }
 0x2f2   : > { %v2170_v42 = vadd.f32 %v2169_v55, %v2056_v54  ;;  %v2282_v19 = vpop.f32.mrf.mxu3  ;;  %v2059_v44 = vpop.f32.mrf.mxu1 }
 0x2f4   : > { %v2283_v4 = vadd.f32 %v2282_v19, %v2170_v42 }
 0x2f5   : > { %v2398_v51 = vpop.f32.mrf.mxu0 }
 0x2f6   : > { %v5453_v30 = vadd.f32 %v2395_v21, %v2283_v4 }
 0x2f8   : > { %v1943_v49 = vpop.xlane.xlu0 %1942 }
 0x2f9   : > { %v2172_v14 = vpop.f32.mrf.mxu2  ;;  %3698 = vrcp.f32 %v1943_v49  ;;  %v2805_v12 = vand.u32 2147483648, %v1943_v49  ;;  %vm2799_vm3 = vweird.f32 %v1943_v49  ;;  %v2803_v55 = vand.u32 2147483647, %v1943_v49 }
 0x2fa   : > { %v2173_v17 = vadd.f32 %v2172_v14, %v2059_v44  ;;  %v2285_v41 = vpop.f32.mrf.mxu3  ;;  %v2062_v57 = vpop.f32.mrf.mxu1 }
 0x2fb   : > { %vm2804_vm5 = vcmp.eq.f32.partialorder %v2803_v55, 8.507059e+37 }
 0x2fc   : > { %v2286_v62 = vadd.f32 %v2285_v41, %v2173_v17  ;;  %v2806_v17 = vor.u32 1.1754944e-38, %v2805_v12 }
 0x2fd   : > { %v2401_v27 = vpop.f32.mrf.mxu0 }
 0x2fe   : > { %v5455_v13 = vadd.f32 %v2398_v51, %v2286_v62 }
 0x2ff   : > { %v5457_v36 = vpop.xlane.xlu1 %1947  ;;  %v3699_v31 = vpop.eup %3698 }
 0x300   : > { %3700 = vrcp.f32 %v5457_v36  ;;  %v2795_v8 = vmul.f32 %v3699_v31, %v1943_v49  ;;  %vm2800_vm2 = vweird.f32 %v3699_v31  ;;  %v2819_v51 = vand.u32 2147483648, %v5457_v36 }
 0x301   : > { %v2175_v53 = vpop.f32.mrf.mxu2  ;;  %vm2801_vm4 = vmor %vm2799_vm3, %vm2800_vm2  ;;  %vm2813_vm7 = vweird.f32 %v5457_v36 }
 0x302   : > { %v2288_v10 = vpop.f32.mrf.mxu3  ;;  %v2065_v39 = vpop.f32.mrf.mxu1  ;;  %v2796_v9 = vsub.f32 1.0, %v2795_v8  ;;  %v2176_v33 = vadd.f32 %v2175_v53, %v2062_v57  ;;  %v5523_v55 = vor.u32 1.1754944e-38, %v2819_v51 }
 0x304   : > { %v2797_v63 = vmul.f32 %v3699_v31, %v2796_v9  ;;  %v2289_v21 = vadd.f32 %v2288_v10, %v2176_v33 }
 0x305   : > { %v5464_v59 = vpop.f32.mrf.mxu0 }
 0x306   : > { %v5470_v48 = vpop.eup %3700  ;;  %v2798_v32 = vadd.f32 %v3699_v31, %v2797_v63  ;;  %v2402_v62 = vadd.f32 %v2401_v27, %v2289_v21 }
 0x307   : > { %v5459_v2 = vpop.xlane.xlu1 %1932  ;;  %v2809_v28 = vmul.f32 %v5470_v48, %v5457_v36  ;;  %vm2814_vm6 = vweird.f32 %v5470_v48 }
 0x308   : > { %v5466_v20 = vpop.xlane.xlu2 %1952  ;;  %v2802_v44 = vsel %vm2801_vm4, %v3699_v31, %v2798_v32  ;;  %v2777_v9 = vand.u32 2147483648, %v5459_v2  ;;  %v2817_v32 = vand.u32 2147483647, %v5457_v36  ;;  %vm5534_vm8 = vmor %vm2813_vm7, %vm2814_vm6 }
 0x309   : > { %v2178_v34 = vpop.f32.mrf.mxu2  ;;  %v2810_v56 = vsub.f32 1.0, %v2809_v28  ;;  %v2807_v57 = vsel %vm2804_vm5, %v2806_v17, %v2802_v44  ;;  %v2833_v10 = vand.u32 2147483648, %v5466_v20  ;;  %v2831_v51 = vand.u32 2147483647, %v5466_v20 }
 0x30a   : > { %v5462_v50 = vpop.f32.mrf.mxu3  ;;  %v5478_v38 = vpop.f32.mrf.mxu1  ;;  %v2179_v63 = vadd.f32 %v2178_v34, %v2065_v39  ;;  %v5525_v44 = vmul.f32 %v2807_v57, %v2402_v62  ;;  %v5543_v57 = vor.u32 1.1754944e-38, %v2777_v9  ;;  %vm2827_vm11 = vweird.f32 %v5466_v20 }
 0x30b   : > { %v2811_v4 = vmul.f32 %v5470_v48, %v2810_v56  ;;  %vm5571_vm13 = vcmp.eq.f32.partialorder %v2817_v32, 8.507059e+37  ;;  %vm5594_vm2 = vcmp.eq.f32.partialorder %v2831_v51, 8.507059e+37 }
 0x30c   : > { %v5546_v34 = vadd.f32 %v5462_v50, %v2179_v63 }
 0x30d   : > { %v5486_v0 = vpop.f32.mrf.mxu0  ;;  %v5513_v28 = vadd.f32 %v5470_v48, %v2811_v4 }
 0x30e   : > { %v5468_v60 = vpop.xlane.xlu0 %1957 }
 0x30f   : > { %v5472_v37 = vpop.xlane.xlu1 %1852  ;;  %3702 = vrcp.f32 %v5468_v60  ;;  %vm2841_vm10 = vweird.f32 %v5468_v60  ;;  %v2847_v9 = vand.u32 2147483648, %v5468_v60 }
 0x310   : > { %3704 = vrcp.f32 %v5466_v20 }
 0x311   : > { %v5474_v40 = vpop.f32.mrf.mxu2  ;;  %v2848_v16 = vor.u32 1.1754944e-38, %v2847_v9 }
 0x312   : > { %v5482_v15 = vpop.f32.mrf.mxu3  ;;  %v2071_v49 = vpop.f32.mrf.mxu1 }
 0x315   : > { %v5490_v54 = vpop.eup %3702  ;;  %v5528_v39 = vpop.f32.mrf.mxu0 }
 0x316   : > { %v5488_v23 = vpop.xlane.xlu0 %1862  ;;  %v5496_v19 = vpop.eup %3704  ;;  %v2837_v41 = vmul.f32 %v5490_v54, %v5468_v60  ;;  %vm2842_vm14 = vweird.f32 %v5490_v54 }
 0x317   : > { %v5484_v18 = vpop.xlane.xlu2 %1962  ;;  %3706 = vrcp.f32 %v5488_v23  ;;  %v5494_v42 = vpop.xlane.xlu1 %1917  ;;  %v2823_v53 = vmul.f32 %v5496_v19, %v5466_v20  ;;  %vm2828_vm9 = vweird.f32 %v5496_v19  ;;  %vm5606_vm4 = vmor %vm2841_vm10, %vm2842_vm14  ;;  %v6608_v20 = vsel %vm5534_vm8, %v5470_v48, %v5513_v28 }
 0x318   : > { %3708 = vrcp.f32 %v5484_v18  ;;  %v2838_v12 = vsub.f32 1.0, %v2837_v41  ;;  %v5538_v41 = vor.u32 1.1754944e-38, %v2833_v10  ;;  %vm2855_vm15 = vweird.f32 %v5484_v18  ;;  %vm5641_vm7 = vmor %vm2827_vm11, %vm2828_vm9 }
 0x319   : > { %3710 = vrcp.f32 %v5459_v2  ;;  %v2184_v14 = vpop.f32.mrf.mxu2  ;;  %v2824_v36 = vsub.f32 1.0, %v2823_v53  ;;  %vm2575_vm9 = vweird.f32 %v5488_v23  ;;  %v2553_v48 = vand.u32 2147483648, %v5472_v37 }
 0x31a   : > { %v2297_v27 = vpop.f32.mrf.mxu3  ;;  %v2839_v10 = vmul.f32 %v5490_v54, %v2838_v12  ;;  %3712 = vrcp.f32 %v5472_v37  ;;  %v2185_v1 = vadd.f32 %v2184_v14, %v2071_v49  ;;  %v2859_v12 = vand.u32 2147483647, %v5484_v18  ;;  %v2074_v49 = vpop.f32.mrf.mxu1 }
 0x31b   : > { %v2825_v7 = vmul.f32 %v5496_v19, %v2824_v36  ;;  %3714 = vrcp.f32 %v5494_v42  ;;  %v2845_v14 = vand.u32 2147483647, %v5468_v60 }
 0x31c   : > { %vm2860_vm3 = vcmp.eq.f32.partialorder %v2859_v12, 8.507059e+37 }
 0x31d   : > { %v5508_v31 = vpop.eup %3706  ;;  %v2826_v51 = vadd.f32 %v5496_v19, %v2825_v7  ;;  %vm5616_vm5 = vcmp.eq.f32.partialorder %v2845_v14, 8.507059e+37 }
 0x31e   : > { %v5515_v33 = vpop.xlane.xlu0 %1927  ;;  %v5517_v56 = vpop.eup %3708  ;;  %v2571_v62 = vmul.f32 %v5508_v31, %v5488_v23  ;;  %vm2576_vm6 = vweird.f32 %v5508_v31 }
 0x31f   : > { %v5506_v8 = vpop.xlane.xlu2 %1937  ;;  %v5521_v21 = vpop.eup %3710  ;;  %v2851_v4 = vmul.f32 %v5517_v56, %v5484_v18  ;;  %vm2856_vm12 = vweird.f32 %v5517_v56  ;;  %3716 = vrcp.f32 %v5515_v33  ;;  %vm2577_vm8 = vmor %vm2575_vm9, %vm2576_vm6 }
 0x320   : > { %v5555_v53 = vmul.f32 %v5521_v21, %v5459_v2  ;;  %v5560_v50 = vpop.xlane.xlu1 %1837  ;;  %v2572_v5 = vsub.f32 1.0, %v2571_v62  ;;  %v2840_v62 = vadd.f32 %v5490_v54, %v2839_v10  ;;  %vm5587_vm1 = vmor %vm2855_vm15, %vm2856_vm12  ;;  %v5592_v25 = vpop.eup %3712  ;;  %3718 = vrcp.f32 %v5506_v8 }
 0x321   : > { %v2852_v24 = vsub.f32 1.0, %v2851_v4  ;;  %v2861_v4 = vand.u32 2147483648, %v5484_v18  ;;  %v2187_v43 = vpop.f32.mrf.mxu2  ;;  %v5621_v60 = vpop.eup %3714  ;;  %v2543_v7 = vmul.f32 %v5592_v25, %v5472_v37  ;;  %v2551_v18 = vand.u32 2147483647, %v5472_v37 }
 0x322   : > { %v2188_v32 = vadd.f32 %v2187_v43, %v2074_v49  ;;  %v2300_v22 = vpop.f32.mrf.mxu3  ;;  %v2573_v43 = vmul.f32 %v5508_v31, %v2572_v5  ;;  %vm2548_vm11 = vweird.f32 %v5592_v25  ;;  %vm2785_vm15 = vweird.f32 %v5506_v8 }
 0x323   : > { %v2853_v63 = vmul.f32 %v5517_v56, %v2852_v24  ;;  %v2182_v24 = vadd.f32 %v5474_v40, %v5478_v38  ;;  %v2862_v40 = vor.u32 1.1754944e-38, %v2861_v4  ;;  %v2298_v38 = vadd.f32 %v2297_v27, %v2185_v1 }
 0x324   : > { %v2301_v10 = vadd.f32 %v2300_v22, %v2188_v32  ;;  %v2844_v22 = vsel %vm5606_vm4, %v5490_v54, %v2840_v62  ;;  %v2574_v54 = vadd.f32 %v5508_v31, %v2573_v43  ;;  %v2768_v32 = vsub.f32 1.0, %v5555_v53 }
 0x325   : > { %v2854_v52 = vadd.f32 %v5517_v56, %v2853_v63  ;;  %v2295_v27 = vadd.f32 %v5482_v15, %v2182_v24  ;;  %v2413_v63 = vpop.f32.mrf.mxu0  ;;  %v2579_v15 = vand.u32 2147483647, %v5488_v23  ;;  %v2411_v4 = vadd.f32 %v5528_v39, %v2298_v38  ;;  %v5635_v49 = vpop.eup %3716 }
 0x326   : > { %v5580_v36 = vpop.xlane.xlu0 %1847  ;;  %v2414_v46 = vadd.f32 %v2413_v63, %v2301_v10  ;;  %v2405_v39 = vadd.f32 %v5464_v59, %v5546_v34  ;;  %v2821_v43 = vsel %vm5571_vm13, %v5523_v55, %v6608_v20  ;;  %v2830_v59 = vsel %vm5641_vm7, %v5496_v19, %v2826_v51  ;;  %v5668_v34 = vpop.eup %3718 }
 0x327   : > { %v5569_v26 = vpop.xlane.xlu2 %1857  ;;  %v2858_v9 = vsel %vm5587_vm1, %v5517_v56, %v2854_v52  ;;  %v2581_v56 = vand.u32 2147483648, %v5488_v23  ;;  %v2544_v17 = vsub.f32 1.0, %v2543_v7  ;;  %v2408_v28 = vadd.f32 %v5486_v0, %v2295_v27 }
 0x328   : > { %v2863_v5 = vsel %vm2860_vm3, %v2862_v40, %v2858_v9  ;;  %3720 = vrcp.f32 %v5569_v26  ;;  %v5631_v24 = vpop.xlane.xlu1 %1902  ;;  %v2849_v40 = vsel %vm5616_vm5, %v2848_v16, %v2844_v22  ;;  %v2725_v16 = vmul.f32 %v5621_v60, %v5494_v42 }
 0x329   : > { %3722 = vrcp.f32 %v5560_v50  ;;  %v2895_v12 = vmul.f32 %v2863_v5, %v2414_v46  ;;  %6605 = vst [vmem:[#allocation9_spill] sm:$0xff] %v5631_v24  ;;  %v2582_v29 = vor.u32 1.1754944e-38, %v2581_v56  ;;  %vm2580_vm10 = vcmp.eq.f32.partialorder %v2579_v15, 8.507059e+37 }
 0x32a   : > { %3724 = vrcp.f32 %v5580_v36  ;;  %v2894_v23 = vmul.f32 %v2849_v40, %v2411_v4  ;;  %v2753_v19 = vmul.f32 %v5635_v49, %v5515_v33  ;;  %v2578_v53 = vsel %vm2577_vm8, %v5508_v31, %v2574_v54 }
 0x32b   : > { %3356 = vmatpush.xpose.msk.msrb.mxu2 %vm310_vm0, %v2895_v12  ;;  %v2769_v10 = vmul.f32 %v5521_v21, %v2768_v32  ;;  %v2835_v9 = vsel %vm5594_vm2, %v5538_v41, %v2830_v59  ;;  %v2735_v0 = vand.u32 2147483648, %v5494_v42  ;;  %v2583_v1 = vsel %vm2580_vm10, %v2582_v29, %v2578_v53 }
 0x32c   : > { %v2726_v51 = vsub.f32 1.0, %v2725_v16  ;;  %3726 = vrcp.f32 %v5631_v24  ;;  %v2875_v5 = vmul.f32 %v2583_v1, %v5301_v47  ;;  %v2892_v22 = vmul.f32 %v2821_v43, %v2405_v39 }
 0x32d   : > { %v2545_v41 = vmul.f32 %v5592_v25, %v2544_v17  ;;  %v2781_v52 = vmul.f32 %v5668_v34, %v5506_v8  ;;  %v5697_v46 = vor.u32 1.1754944e-38, %v2553_v48  ;;  %v2893_v7 = vmul.f32 %v2835_v9, %v2408_v28 }
 0x32e   : > { %v5651_v38 = vpop.xlane.xlu0 %1912  ;;  %v5674_v55 = vpop.eup %3720  ;;  %v2754_v15 = vsub.f32 1.0, %v2753_v19  ;;  %v2763_v56 = vand.u32 2147483648, %v5515_v33  ;;  %3343 = vmatpush.xpose.msk.msrb.mxu1 %vm310_vm0, %v2875_v5  ;;  %v5704_v54 = vadd.f32 %v5521_v21, %v2769_v10  ;;  %v2791_v12 = vand.u32 2147483648, %v5506_v8 }
 0x32f   : > { %v5633_v14 = vpop.xlane.xlu2 %1922  ;;  %v5684_v27 = vpop.eup %3722  ;;  %v2557_v63 = vmul.f32 %v5674_v55, %v5569_v26  ;;  %3357 = vmatpush.xpose.msk.msrb.mxu2 %vm310_vm0, %v2894_v23  ;;  %v2727_v39 = vmul.f32 %v5621_v60, %v2726_v51  ;;  %v5713_v40 = vor.u32 1.1754944e-38, %v2735_v0  ;;  %v5721_v16 = vadd.f32 %v5592_v25, %v2545_v41 }
 0x330   : > { %v5691_v31 = vpop.eup %3724  ;;  %v2501_v62 = vmul.f32 %v5684_v27, %v5560_v50  ;;  %v5717_v59 = vpop.xlane.xlu1 %1822  ;;  %v2782_v48 = vsub.f32 1.0, %v2781_v52  ;;  %v2511_v28 = vand.u32 2147483648, %v5560_v50  ;;  %v2755_v23 = vmul.f32 %v5635_v49, %v2754_v15 }
 0x331   : > { %6609 = vst [vmem:[#allocation7_spill] sm:$0xff] %v5713_v40  ;;  %v2529_v20 = vmul.f32 %v5691_v31, %v5580_v36  ;;  %v2558_v43 = vsub.f32 1.0, %v2557_v63  ;;  %v5728_v19 = vor.u32 1.1754944e-38, %v2763_v56  ;;  %v2789_v53 = vand.u32 2147483647, %v5506_v8 }
 0x332   : > { %v5725_v29 = vpop.eup %3726  ;;  %3728 = vrcp.f32 %v5651_v38  ;;  %v5732_v10 = vor.u32 1.1754944e-38, %v2791_v12  ;;  %v2502_v9 = vsub.f32 1.0, %v2501_v62  ;;  %v2539_v1 = vand.u32 2147483648, %v5580_v36 }
 0x333   : > { %3358 = vmatpush.xpose.msk.msrb.mxu2 %vm310_vm0, %v2893_v7  ;;  %6610 = vst [vmem:[#allocation8_spill] sm:$0xff] %v5728_v19  ;;  %v5737_v51 = vadd.f32 %v5621_v60, %v2727_v39  ;;  %v2530_v63 = vsub.f32 1.0, %v2529_v20  ;;  %v2559_v5 = vmul.f32 %v5674_v55, %v2558_v43  ;;  %3730 = vrcp.f32 %v5633_v14 }
 0x334   : > { %v2783_v41 = vmul.f32 %v5668_v34, %v2782_v48  ;;  %v5744_v52 = vor.u32 1.1754944e-38, %v2511_v28  ;;  %v2565_v7 = vand.u32 2147483647, %v5569_v26  ;;  %v2683_v15 = vmul.f32 %v5725_v29, %v5631_v24 }
 0x335   : > { %6611 = vst [vmem:[#allocation10_spill] sm:$0xff] %v5737_v51  ;;  %v5750_v56 = vadd.f32 %v5635_v49, %v2755_v23  ;;  %vm2786_vm12 = vweird.f32 %v5668_v34  ;;  %v2537_v12 = vand.u32 2147483647, %v5580_v36  ;;  %vm2547_vm13 = vweird.f32 %v5472_v37 }
 0x336   : > { %v5710_v32 = vpop.xlane.xlu0 %1832  ;;  %6612 = vst [vmem:[#allocation11_spill] sm:$0xff] %v5744_v52  ;;  %v2503_v62 = vmul.f32 %v5684_v27, %v2502_v9  ;;  %v5758_v39 = vor.u32 1.1754944e-38, %v2539_v1  ;;  %vm2561_vm14 = vweird.f32 %v5569_v26  ;;  %v2693_v20 = vand.u32 2147483648, %v5631_v24 }
 0x337   : > { %v5701_v47 = vpop.xlane.xlu2 %1842  ;;  %3359 = vmatpush.xpose.msk.msrb.mxu2 %vm310_vm0, %v2892_v22  ;;  %v2567_v22 = vand.u32 2147483648, %v5569_v26  ;;  %v2531_v23 = vmul.f32 %v5691_v31, %v2530_v63  ;;  %v2560_v4 = vadd.f32 %v5674_v55, %v2559_v5  ;;  %vm2562_vm1 = vweird.f32 %v5674_v55 }
 0x338   : > { %3732 = vrcp.f32 %v5701_v47  ;;  %v5766_v28 = vpop.eup %3728  ;;  %v5776_v9 = vadd.f32 %v5668_v34, %v2783_v41  ;;  %vm2533_vm2 = vweird.f32 %v5580_v36  ;;  %vm2534_vm3 = vweird.f32 %v5691_v31  ;;  %v5790_v41 = vpop.xlane.xlu1 %1887  ;;  %vm5809_vm9 = vmor %vm2561_vm14, %vm2562_vm1 }
 0x339   : > { %3734 = vrcp.f32 %v5717_v59  ;;  %vm5780_vm4 = vcmp.eq.f32.partialorder %v2565_v7, 8.507059e+37  ;;  %v2684_v63 = vsub.f32 1.0, %v2683_v15  ;;  %v5784_v5 = vpop.eup %3730  ;;  %vm2772_vm5 = vweird.f32 %v5521_v21  ;;  %vm5877_vm14 = vmor %vm2785_vm15, %vm2786_vm12 }
 0x33a   : > { %v2568_v0 = vor.u32 1.1754944e-38, %v2567_v22  ;;  %3736 = vrcp.f32 %v5710_v32  ;;  %vm5794_vm6 = vcmp.eq.f32.partialorder %v2551_v18, 8.507059e+37  ;;  %vm5798_vm7 = vcmp.eq.f32.partialorder %v2789_v53, 8.507059e+37 }
 0x33b   : > { %3360 = vmatpush.xpose.msk.msrb.mxu2 %vm310_vm0, %v5525_v44  ;;  %v2721_v44 = vand.u32 2147483648, %v5651_v38  ;;  %v5803_v22 = vadd.f32 %v5684_v27, %v2503_v62  ;;  %v5813_v40 = vor.u32 1.1754944e-38, %v2693_v20  ;;  %v2711_v18 = vmul.f32 %v5766_v28, %v5651_v38 }
 0x33c   : > { %v2749_v53 = vand.u32 2147483648, %v5633_v14  ;;  %vm2771_vm8 = vweird.f32 %v5459_v2  ;;  %v2532_v62 = vadd.f32 %v5691_v31, %v2531_v23  ;;  %v2469_v26 = vand.u32 2147483648, %v5717_v59 }
 0x33d   : > { %6619 = vst [vmem:[#allocation42_spill] sm:$0xff] %v5803_v22  ;;  %v2564_v20 = vsel %vm5809_vm9, %v5674_v55, %v2560_v4  ;;  %vm5827_vm10 = vcmp.eq.f32.partialorder %v2537_v12, 8.507059e+37  ;;  %v2685_v52 = vmul.f32 %v5725_v29, %v2684_v63  ;;  %v2739_v22 = vmul.f32 %v5784_v5, %v5633_v14 }
 0x33e   : > { %v5762_v43 = vpop.xlane.xlu0 %1897  ;;  %6622 = vst [vmem:[#allocation13_spill] sm:$0xff] %v5813_v40  ;;  %v5818_v11 = vpop.eup %3732  ;;  %3738 = vrcp.f32 %v5790_v41  ;;  %v5840_v17 = vor.u32 1.1754944e-38, %v2721_v44  ;;  %v2747_v55 = vand.u32 2147483647, %v5633_v14  ;;  %v2497_v4 = vand.u32 2147483648, %v5710_v32 }
 0x33f   : > { %v5764_v48 = vpop.xlane.xlu2 %1907  ;;  %v2515_v23 = vmul.f32 %v5818_v11, %v5701_v47  ;;  %v5837_v51 = vpop.eup %3734  ;;  %v2569_v12 = vsel %vm5780_vm4, %v2568_v0, %v2564_v20  ;;  %v6626_v63 = vand.u32 2147483647, %v5459_v2  ;;  %v2712_v24 = vsub.f32 1.0, %v2711_v18  ;;  %vm5863_vm4 = vmor %vm2547_vm13, %vm2548_vm11 }
 0x340   : > { %6625 = vst [vmem:[#allocation14_spill] sm:$0xff] %v5840_v17  ;;  %v5852_v3 = vor.u32 1.1754944e-38, %v2749_v53  ;;  %v5857_v19 = vpop.eup %3736  ;;  %vm2757_vm9 = vweird.f32 %v5515_v33  ;;  %v5868_v1 = vor.u32 1.1754944e-38, %v2469_v26  ;;  %v2495_v18 = vand.u32 2147483647, %v5710_v32  ;;  %vm5893_vm11 = vmor %vm2533_vm2, %vm2534_vm3 }
 0x341   : > { %vm5848_vm1 = vcmp.eq.f32.partialorder %v6626_v63, 8.507059e+37  ;;  %v2516_v44 = vsub.f32 1.0, %v2515_v23  ;;  %v2874_v53 = vmul.f32 %v2569_v12, %v5291_v61  ;;  %3740 = vrcp.f32 %v5764_v48  ;;  %vm5938_vm3 = vmor %vm2771_vm8, %vm2772_vm5 }
 0x342   : > { %v5882_v20 = vadd.f32 %v5725_v29, %v2685_v52  ;;  %v2740_v23 = vsub.f32 1.0, %v2739_v22  ;;  %v2459_v26 = vmul.f32 %v5837_v51, %v5717_v59  ;;  %3742 = vrcp.f32 %v5762_v43 }
 0x343   : > { %vm2744_vm12 = vweird.f32 %v5784_v5  ;;  %v5898_v52 = vor.u32 1.1754944e-38, %v2497_v4  ;;  %vm2519_vm13 = vweird.f32 %v5701_v47  ;;  %3344 = vmatpush.xpose.msk.msrb.mxu1 %vm310_vm0, %v2874_v53  ;;  %v2550_v22 = vsel %vm5863_vm4, %v5592_v25, %v5721_v16 }
 0x344   : > { %v2788_v36 = vsel %vm5877_vm14, %v5668_v34, %v5776_v9  ;;  %v5910_v12 = vpop.eup %3738  ;;  %v6635_v63 = vand.u32 2147483647, %v5515_v33  ;;  %v2713_v53 = vmul.f32 %v5766_v28, %v2712_v24  ;;  %v2487_v6 = vmul.f32 %v5857_v19, %v5710_v32 }
 0x345   : > { %v2517_v25 = vmul.f32 %v5818_v11, %v2516_v44  ;;  %v2536_v16 = vsel %vm5893_vm11, %v5691_v31, %v2532_v62  ;;  %vm2743_vm2 = vweird.f32 %v5633_v14  ;;  %v2523_v34 = vand.u32 2147483647, %v5701_v47 }
 0x346   : > { %v5855_v17 = vpop.xlane.xlu0 %1817  ;;  %vm5914_vm15 = vcmp.eq.f32.partialorder %v6635_v63, 8.507059e+37  ;;  %v2525_v9 = vand.u32 2147483648, %v5701_v47  ;;  %v2555_v0 = vsel %vm5794_vm6, %v5697_v46, %v2550_v22  ;;  %v2793_v24 = vsel %vm5798_vm7, %v5732_v10, %v2788_v36 }
 0x347   : > { %v5887_v61 = vpop.xlane.xlu2 %1827  ;;  %v2741_v62 = vmul.f32 %v5784_v5, %v2740_v23  ;;  %v2460_v44 = vsub.f32 1.0, %v2459_v26  ;;  %v2873_v37 = vmul.f32 %v2555_v0, %v5277_v45  ;;  %v2890_v7 = vmul.f32 %v2793_v24, %v5455_v13  ;;  %v5945_v46 = vpop.eup %3740 }
 0x348   : > { %vm5947_vm6 = vcmp.eq.f32.partialorder %v2747_v55, 8.507059e+37  ;;  %v2641_v2 = vmul.f32 %v5910_v12, %v5790_v41  ;;  %v2541_v10 = vsel %vm5827_vm10, %v5758_v39, %v2536_v16  ;;  %v2774_v45 = vsel %vm5938_vm3, %v5521_v21, %v5704_v54  ;;  %v5961_v13 = vpop.eup %3742 }
 0x349   : > { %3744 = vrcp.f32 %v5855_v17  ;;  %vm2506_vm5 = vweird.f32 %v5684_v27  ;;  %v5965_v55 = vadd.f32 %v5766_v28, %v2713_v53  ;;  %v2488_v23 = vsub.f32 1.0, %v2487_v6  ;;  %3345 = vmatpush.xpose.msk.msrb.mxu1 %vm310_vm0, %v2873_v37  ;;  %3361 = vmatpush.xpose.msk.msrb.mxu2 %vm310_vm0, %v2890_v7  ;;  %v6655_v37 = vld [vmem:[#allocation8_spill] sm:$0xff] }
 0x34a   : > { %v2518_v26 = vadd.f32 %v5818_v11, %v2517_v25  ;;  %vm2520_vm7 = vweird.f32 %v5818_v11  ;;  %vm2730_vm8 = vweird.f32 %v5621_v60  ;;  %vm5972_vm10 = vcmp.eq.f32.partialorder %v2523_v34, 8.507059e+37 }
 0x34b   : > { %v2697_v54 = vmul.f32 %v5945_v46, %v5764_v48  ;;  %v2779_v6 = vsel %vm5848_vm1, %v5543_v57, %v2774_v45  ;;  %3746 = vrcp.f32 %v5887_v61  ;;  %vm6644_vm14 = vweird.f32 %v5635_v49  ;;  %v6660_v45 = vld [vmem:[#allocation41_spill] sm:$0xff] }
 0x34c   : > { %vm5986_vm4 = vmor %vm2757_vm9, %vm6644_vm14  ;;  %vm2505_vm11 = vweird.f32 %v5560_v50  ;;  %v2461_v39 = vmul.f32 %v5837_v51, %v2460_v44  ;;  %v2526_v8 = vor.u32 1.1754944e-38, %v2525_v9  ;;  %v2872_v35 = vmul.f32 %v2541_v10, %v5259_v58 }
 0x34d   : > { %v2889_v57 = vmul.f32 %v2779_v6, %v5453_v30  ;;  %vm2729_vm1 = vweird.f32 %v5494_v42  ;;  %v2742_v33 = vadd.f32 %v5784_v5, %v2741_v62  ;;  %vm6004_vm14 = vmor %vm2519_vm13, %vm2520_vm7  ;;  %v2642_v63 = vsub.f32 1.0, %v2641_v2  ;;  %v6664_v6 = vld [vmem:[#allocation43_spill] sm:$0xff]  ;;  %v6690_v62 = vld [vmem:[#allocation40_spill] sm:$0xff] }
 0x34e   : > { %v5995_v22 = vpop.xlane.xlu0 %1807  ;;  %v2651_v58 = vand.u32 2147483648, %v5790_v41  ;;  %v2669_v30 = vmul.f32 %v5961_v13, %v5762_v43  ;;  %v6649_v53 = vand.u32 2147483647, %v5560_v50  ;;  %v2489_v16 = vmul.f32 %v5857_v19, %v2488_v23  ;;  %3346 = vmatpush.xpose.msk.msrb.mxu1 %vm310_vm0, %v2872_v35 }
 0x34f   : > { %vm2491_vm9 = vweird.f32 %v5710_v32  ;;  %v2679_v47 = vand.u32 2147483648, %v5762_v43  ;;  %3362 = vmatpush.xpose.msk.msrb.mxu2 %vm310_vm0, %v2889_v57  ;;  %v2760_v34 = vsel %vm5986_vm4, %v5635_v49, %v5750_v56  ;;  %v2522_v9 = vsel %vm6004_vm14, %v5818_v11, %v2518_v26  ;;  %v6029_v0 = vpop.xlane.xlu2 %1892  ;;  %v6031_v24 = vpop.eup %3744  ;;  %vm6050_vm4 = vmor %vm2743_vm2, %vm2744_vm12 }
 0x350   : > { %vm6013_vm3 = vcmp.eq.f32.partialorder %v6649_v53, 8.507059e+37  ;;  %v6652_v31 = vand.u32 2147483647, %v5494_v42  ;;  %vm2715_vm7 = vweird.f32 %v5651_v38  ;;  %v2698_v44 = vsub.f32 1.0, %v2697_v54 }
 0x351   : > { %v2765_v49 = vsel %vm5914_vm15, %v6655_v37, %v2760_v34  ;;  %v2527_v11 = vsel %vm5972_vm10, %v2526_v8, %v2522_v9  ;;  %3748 = vrcp.f32 %v5995_v22  ;;  %v6055_v7 = vadd.f32 %v5837_v51, %v2461_v39  ;;  %v6066_v14 = vpop.eup %3746 }
 0x352   : > { %vm6035_vm13 = vcmp.eq.f32.partialorder %v6652_v31, 8.507059e+37  ;;  %vm6059_vm14 = vcmp.eq.f32.partialorder %v2495_v18, 8.507059e+37  ;;  %v2705_v2 = vand.u32 2147483647, %v5764_v48  ;;  %v2707_v10 = vand.u32 2147483648, %v5764_v48 }
 0x353   : > { %v2888_v23 = vmul.f32 %v2765_v49, %v6660_v45  ;;  %v6661_v26 = vand.u32 2147483647, %v5651_v38  ;;  %v2643_v54 = vmul.f32 %v5910_v12, %v2642_v63  ;;  %v2670_v18 = vsub.f32 1.0, %v2669_v30  ;;  %v6665_v30 = vld [vmem:[#allocation9_spill] sm:$0xff] }
 0x354   : > { %v2871_v40 = vmul.f32 %v2527_v11, %v6664_v6  ;;  %v2746_v39 = vsel %vm6050_vm4, %v5784_v5, %v2742_v33  ;;  %v2677_v8 = vand.u32 2147483647, %v5762_v43  ;;  %v2445_v35 = vmul.f32 %v6031_v24, %v5855_v17 }
 0x355   : > { %vm6070_vm12 = vcmp.eq.f32.partialorder %v6661_v26, 8.507059e+37  ;;  %v2473_v57 = vmul.f32 %v6066_v14, %v5887_v61  ;;  %3363 = vmatpush.xpose.msk.msrb.mxu2 %vm310_vm0, %v2888_v23  ;;  %v2751_v36 = vsel %vm5947_vm6, %v5852_v3, %v2746_v39  ;;  %v2490_v5 = vadd.f32 %v5857_v19, %v2489_v16  ;;  %v6666_v3 = vld [vmem:[#allocation5_spill] sm:$0xff]  ;;  %vm6107_vm6 = vmor %vm2505_vm11, %vm2506_vm5  ;;  %v6677_v23 = vld [vmem:[#allocation11_spill] sm:$0xff] }
 0x356   : > { %v6091_v33 = vor.u32 1.1754944e-38, %v2679_v47  ;;  %v2699_v63 = vmul.f32 %v5945_v46, %v2698_v44  ;;  %3347 = vmatpush.xpose.msk.msrb.mxu1 %vm310_vm0, %v2871_v40  ;;  %3750 = vrcp.f32 %v6029_v0  ;;  %vm2701_vm4 = vweird.f32 %v5764_v48  ;;  %vm6126_vm5 = vmor %vm2729_vm1, %vm2730_vm8  ;;  %v6686_v39 = vld [vmem:[#allocation7_spill] sm:$0xff]  ;;  %v6730_v44 = vld [vmem:[#allocation32_spill] sm:$0xff] }
 0x357   : > { %v6098_v53 = vor.u32 1.1754944e-38, %v2707_v10  ;;  %v2474_v15 = vsub.f32 1.0, %v2473_v57  ;;  %v2887_v34 = vmul.f32 %v2751_v36, %v6666_v3  ;;  %v6101_v9 = vpop.eup %3748  ;;  %v6113_v47 = vadd.f32 %v5910_v12, %v2643_v54  ;;  %v6678_v54 = vld [vmem:[#allocation10_spill] sm:$0xff]  ;;  %v6179_v57 = vpop.xlane.xlu2 %1812 }
 0x358   : > { %v2671_v31 = vmul.f32 %v5961_v13, %v2670_v18  ;;  %vm2702_vm10 = vweird.f32 %v5945_v46  ;;  %vm6117_vm15 = vcmp.eq.f32.partialorder %v2705_v2, 8.507059e+37  ;;  %v2481_v37 = vand.u32 2147483647, %v5887_v61  ;;  %v6673_v2 = vld [vmem:[#allocation42_spill] sm:$0xff] }
 0x359   : > { %v2446_v49 = vsub.f32 1.0, %v2445_v35  ;;  %v2475_v11 = vmul.f32 %v6066_v14, %v2474_v15  ;;  %v2483_v56 = vand.u32 2147483648, %v5887_v61  ;;  %3364 = vmatpush.xpose.msk.msrb.mxu2 %vm310_vm0, %v2887_v34  ;;  %v2508_v10 = vsel %vm6107_vm6, %v5684_v27, %v6673_v2 }
 0x35a   : > { %vm6674_vm11 = vweird.f32 %v5857_v19  ;;  %vm2674_vm1 = vweird.f32 %v5961_v13  ;;  %v2700_v45 = vadd.f32 %v5945_v46, %v2699_v63  ;;  %vm2478_vm2 = vweird.f32 %v6066_v14 }
 0x35b   : > { %vm6141_vm8 = vmor %vm2491_vm9, %vm6674_vm11  ;;  %v2513_v26 = vsel %vm6013_vm3, %v6677_v23, %v2508_v10  ;;  %v2732_v27 = vsel %vm6126_vm5, %v5621_v60, %v6678_v54  ;;  %vm6679_vm9 = vweird.f32 %v5766_v28  ;;  %v6682_v18 = vand.u32 2147483647, %v5717_v59  ;;  %v6685_v60 = vld [vmem:[#allocation23_spill] sm:$0xff] }
 0x35c   : > { %vm6159_vm6 = vmor %vm2715_vm7, %vm6679_vm9  ;;  %vm2449_vm3 = vweird.f32 %v5855_v17  ;;  %v2417_v25 = vmul.f32 %v6101_v9, %v5995_v22  ;;  %v2870_v40 = vmul.f32 %v2513_v26, %v6685_v60  ;;  %v2737_v38 = vsel %vm6035_vm13, %v6686_v39, %v2732_v27  ;;  %v6181_v36 = vpop.eup %3750  ;;  %v6703_v54 = vld [vmem:[#allocation39_spill] sm:$0xff] }
 0x35d   : > { %vm6165_vm11 = vcmp.eq.f32.partialorder %v6682_v18, 8.507059e+37  ;;  %v2494_v35 = vsel %vm6141_vm8, %v5857_v19, %v2490_v5  ;;  %v6687_v63 = vand.u32 2147483647, %v6665_v30  ;;  %vm2673_vm5 = vweird.f32 %v5762_v43  ;;  %vm6214_vm13 = vmor %vm2701_vm4, %vm2702_vm10 }
 0x35e   : > { %v2476_v3 = vadd.f32 %v6066_v14, %v2475_v11  ;;  %v2886_v34 = vmul.f32 %v2737_v38, %v6690_v62  ;;  %v2499_v19 = vsel %vm6059_vm14, %v5898_v52, %v2494_v35  ;;  %v2718_v5 = vsel %vm6159_vm6, %v5766_v28, %v5965_v55  ;;  %3348 = vmatpush.xpose.msk.msrb.mxu1 %vm310_vm0, %v2870_v40  ;;  %v6691_v11 = vld [vmem:[#allocation14_spill] sm:$0xff]  ;;  %v6716_v35 = vld [vmem:[#allocation13_spill] sm:$0xff] }
 0x35f   : > { %vm6185_vm7 = vcmp.eq.f32.partialorder %v6687_v63, 8.507059e+37  ;;  %v2447_v16 = vmul.f32 %v6031_v24, %v2446_v49  ;;  %v2453_v50 = vand.u32 2147483647, %v5855_v17  ;;  %v2655_v2 = vmul.f32 %v6181_v36, %v6029_v0 }
 0x360   : > { %v2723_v10 = vsel %vm6070_vm12, %v6691_v11, %v2718_v5  ;;  %v6208_v52 = vadd.f32 %v5961_v13, %v2671_v31  ;;  %v2455_v55 = vand.u32 2147483648, %v5855_v17  ;;  %vm2477_vm14 = vweird.f32 %v5887_v61  ;;  %3365 = vmatpush.xpose.msk.msrb.mxu2 %vm310_vm0, %v2886_v34  ;;  %v6696_v31 = vld [vmem:[#allocation22_spill] sm:$0xff]  ;;  %v2897_v5 = vld [vmem:[%s6425_s4] sm:$0xff] }
 0x361   : > { %3752 = vrcp.f32 %v6179_v57  ;;  %vm6224_vm12 = vmor %vm2477_vm14, %vm2478_vm2  ;;  %v2418_v21 = vsub.f32 1.0, %v2417_v25  ;;  %v2656_v48 = vsub.f32 1.0, %v2655_v2  ;;  %v2869_v49 = vmul.f32 %v2499_v19, %v6696_v31  ;;  %v6710_v25 = vld [vmem:[#allocation21_spill] sm:$0xff] }
 0x362   : > { %v2704_v42 = vsel %vm6214_vm13, %v5945_v46, %v2700_v45  ;;  %vm6697_vm10 = vweird.f32 %v5725_v29  ;;  %vm6698_vm4 = vweird.f32 %v6665_v30  ;;  %vm6242_vm2 = vcmp.eq.f32.partialorder %v2677_v8, 8.507059e+37 }
 0x363   : > { %vm6236_vm8 = vmor %vm6698_vm4, %vm6697_vm10  ;;  %vm2482_vm9 = vcmp.eq.f32.partialorder %v2481_v37, 8.507059e+37  ;;  %v2484_v26 = vor.u32 1.1754944e-38, %v2483_v56  ;;  %v2885_v27 = vmul.f32 %v2723_v10, %v6703_v54  ;;  %v2480_v46 = vsel %vm6224_vm12, %v6066_v14, %v2476_v3  ;;  %3349 = vmatpush.xpose.msk.msrb.mxu1 %vm310_vm0, %v2869_v49 }
 0x364   : > { %vm6704_vm6 = vweird.f32 %v5837_v51  ;;  %vm6705_vm13 = vweird.f32 %v5717_v59  ;;  %v2448_v8 = vadd.f32 %v6031_v24, %v2447_v16  ;;  %vm2450_vm10 = vweird.f32 %v6031_v24  ;;  %v6720_v16 = vld [vmem:[#allocation33_spill] sm:$0xff] }
 0x365   : > { %vm6254_vm14 = vmor %vm6705_vm13, %vm6704_vm6  ;;  %v2657_v37 = vmul.f32 %v6181_v36, %v2656_v48  ;;  %v2709_v14 = vsel %vm6117_vm15, %v6098_v53, %v2704_v42  ;;  %vm2646_vm12 = vweird.f32 %v5910_v12  ;;  %v2665_v59 = vand.u32 2147483648, %v6029_v0  ;;  %3366 = vmatpush.xpose.msk.msrb.mxu2 %vm310_vm0, %v2885_v27  ;;  %v6724_v42 = vld [vmem:[#allocation36_spill] sm:$0xff]  ;;  %v6727_v27 = vld [vmem:[#allocation35_spill] sm:$0xff] }
 0x366   : > { %v2485_v56 = vsel %vm2482_vm9, %v2484_v26, %v2480_v46  ;;  %v2690_v45 = vsel %vm6236_vm8, %v5725_v29, %v5882_v20  ;;  %v2466_v32 = vsel %vm6254_vm14, %v5837_v51, %v6055_v7  ;;  %vm6276_vm4 = vcmp.eq.f32.partialorder %v2453_v50, 8.507059e+37  ;;  %vm6286_vm15 = vmor %vm2449_vm3, %vm2450_vm10  ;;  %v6713_v20 = vld [vmem:[#allocation37_spill] sm:$0xff] }
 0x367   : > { %v2456_v53 = vor.u32 1.1754944e-38, %v2455_v55  ;;  %v2419_v18 = vmul.f32 %v6101_v9, %v2418_v21  ;;  %v2868_v60 = vmul.f32 %v2485_v56, %v6710_v25  ;;  %v3753_v40 = vpop.eup %3752  ;;  %v2658_v51 = vadd.f32 %v6181_v36, %v2657_v37  ;;  %vm6300_vm9 = vmor %vm2673_vm5, %vm2674_vm1 }
 0x368   : > { %vm2660_vm8 = vweird.f32 %v6181_v36  ;;  %v2884_v7 = vmul.f32 %v2709_v14, %v6713_v20  ;;  %v2471_v39 = vsel %vm6165_vm11, %v5868_v1, %v2466_v32  ;;  %vm2659_vm3 = vweird.f32 %v6029_v0 }
 0x369   : > { %v2431_v38 = vmul.f32 %v3753_v40, %v6179_v57  ;;  %3350 = vmatpush.xpose.msk.msrb.mxu1 %vm310_vm0, %v2868_v60  ;;  %v2695_v63 = vsel %vm6185_vm7, %v6716_v35, %v2690_v45  ;;  %v2452_v1 = vsel %vm6286_vm15, %v6031_v24, %v2448_v8  ;;  %vm2422_vm11 = vweird.f32 %v6101_v9  ;;  %vm6323_vm1 = vmor %vm2659_vm3, %vm2660_vm8  ;;  %v6729_v45 = vld [vmem:[#allocation15_spill] sm:$0xff] }
 0x36a   : > { %v2663_v43 = vand.u32 2147483647, %v6029_v0  ;;  %v2666_v6 = vor.u32 1.1754944e-38, %v2665_v59  ;;  %3367 = vmatpush.xpose.msk.msrb.mxu2 %vm310_vm0, %v2884_v7  ;;  %v2676_v3 = vsel %vm6300_vm9, %v5961_v13, %v6208_v52  ;;  %v2420_v62 = vadd.f32 %v6101_v9, %v2419_v18  ;;  %v6719_v0 = vld [vmem:[#allocation20_spill] sm:$0xff] }
 0x36b   : > { %v2432_v24 = vsub.f32 1.0, %v2431_v38  ;;  %v2441_v34 = vand.u32 2147483648, %v6179_v57  ;;  %v2867_v19 = vmul.f32 %v2471_v39, %v6719_v0  ;;  %v2883_v50 = vmul.f32 %v2695_v63, %v6720_v16 }
 0x36c   : > { %v2457_v13 = vsel %vm6276_vm4, %v2456_v53, %v2452_v1  ;;  %v2662_v2 = vsel %vm6323_vm1, %v6181_v36, %v2658_v51  ;;  %vm2436_vm7 = vweird.f32 %v3753_v40  ;;  %v2439_v10 = vand.u32 2147483647, %v6179_v57 }
 0x36d   : > { %v2433_v11 = vmul.f32 %v3753_v40, %v2432_v24  ;;  %3351 = vmatpush.xpose.msk.msrb.mxu1 %vm310_vm0, %v2867_v19  ;;  %v2681_v52 = vsel %vm6242_vm2, %v6091_v33, %v2676_v3  ;;  %v3818_v28 = vmov 0   ;;  %vm2421_vm5 = vweird.f32 %v5995_v22  ;;  %v6723_v33 = vld [vmem:[#allocation19_spill] sm:$0xff] }
 0x36e   : > { %3431 = vset.pattern.permute.xlu1 %v3818_v28  ;;  %v2425_v55 = vand.u32 2147483647, %v5995_v22  ;;  %v2427_v4 = vand.u32 2147483648, %v5995_v22  ;;  %vm2664_vm6 = vcmp.eq.f32.partialorder %v2663_v43, 8.507059e+37  ;;  %3368 = vmatpush.xpose.msk.msrb.mxu2 %vm310_vm0, %v2883_v50  ;;  %vm6349_vm13 = vmor %vm2421_vm5, %vm2422_vm11  ;;  %vm2435_vm2 = vweird.f32 %v6179_v57 }
 0x36f   : > { %2900 = vperm.xlu1 %3431, %v2897_v5   ;;  %v2434_v21 = vadd.f32 %v3753_v40, %v2433_v11  ;;  %v2866_v48 = vmul.f32 %v2457_v13, %v6723_v33  ;;  %v2667_v31 = vsel %vm2664_vm6, %v2666_v6, %v2662_v2  ;;  %3432 = vset.pattern.permute.xlu0 %v3818_v28  ;;  %vm2645_vm14 = vweird.f32 %v5790_v41  ;;  %vm2437_vm10 = vmor %vm2435_vm2, %vm2436_vm7 }
 0x370   : > { %v2649_v22 = vand.u32 2147483647, %v5790_v41  ;;  %v2442_v49 = vor.u32 1.1754944e-38, %v2441_v34  ;;  %v2882_v61 = vmul.f32 %v2681_v52, %v6724_v42  ;;  %vm6361_vm4 = vmor %vm2645_vm14, %vm2646_vm12  ;;  %v2424_v57 = vsel %vm6349_vm13, %v6101_v9, %v2420_v62  ;;  %v6728_v9 = vld [vmem:[#allocation18_spill] sm:$0xff]  ;;  %v2896_v41 = vld [vmem:[%s6424_s3] sm:$0xff] }
 0x371   : > { %v2438_v26 = vsel %vm2437_vm10, %v3753_v40, %v2434_v21  ;;  %vm2440_vm15 = vcmp.eq.f32.partialorder %v2439_v10, 8.507059e+37  ;;  %3352 = vmatpush.xpose.msk.msrb.mxu1 %vm310_vm0, %v2866_v48  ;;  %v2428_v54 = vor.u32 1.1754944e-38, %v2427_v4  ;;  %v2881_v46 = vmul.f32 %v2667_v31, %v6727_v27 }
 0x372   : > { %3369 = vmatpush.xpose.msk.msrb.mxu2 %vm310_vm0, %v2882_v61  ;;  %v2648_v30 = vsel %vm6361_vm4, %v5910_v12, %v6113_v47  ;;  %v2443_v8 = vsel %vm2440_vm15, %v2442_v49, %v2438_v26  ;;  %v2652_v37 = vor.u32 1.1754944e-38, %v2651_v58  ;;  %vm2426_vm12 = vcmp.eq.f32.partialorder %v2425_v55, 8.507059e+37 }
 0x373   : > { %v2865_v14 = vmul.f32 %v2443_v8, %v6728_v9  ;;  %vm2650_vm8 = vcmp.eq.f32.partialorder %v2649_v22, 8.507059e+37  ;;  %v2429_v59 = vsel %vm2426_vm12, %v2428_v54, %v2424_v57 }
 0x374   : > { %v2653_v56 = vsel %vm2650_vm8, %v2652_v37, %v2648_v30  ;;  %v2864_v32 = vmul.f32 %v2429_v59, %v6729_v45 }
 0x375   : > { %3353 = vmatpush.xpose.msk.msrb.mxu1 %vm310_vm0, %v2865_v14  ;;  %v2880_v12 = vmul.f32 %v2653_v56, %v6730_v44 }
 0x376   : > { %3370 = vmatpush.xpose.msk.msrb.mxu2 %vm310_vm0, %v2881_v46 }
 0x379   : > { %3354 = vmatpush.xpose.msk.msrb.mxu1 %vm310_vm0, %v2864_v32 }
 0x37a   : > { %3371 = vmatpush.xpose.msk.msrb.mxu2 %vm310_vm0, %v2880_v12 }
 0x37c   : > { %3355 = vmatmul.msk.f32.vlgmr.msrb.gmra.mxu1 %vm310_vm0, %v2896_v41 }
 0x37d   : > { %3372 = vmatmul.msk.f32.vlgmr.msrb.gmra.mxu2 %vm310_vm0, %v2896_v41 }
 0x3e1   : > { %v2901_v58 = vpop.permute.xlu1 %2900 }
 0x3f9   : > { %v3019_v47 = vpop.f32.mrf.mxu1 }
 0x3fa   : > { %v3020_v53 = vadd.f32 %v3019_v47, %v2901_v58 }
 0x3fc   : > { %3042 = vst [vmem:[%s202_s30] sm:$0xff] %v3020_v53 }
 0x400   : > { %v3039_v18 = vpop.f32.mrf.mxu2 }
 0x401   : > { %v3040_v25 = vadd.f32 %v3039_v18, %v2901_v58 }
 0x403   : > { %3043 = vst [vmem:[%s202_s30 + $0x8] sm:$0xff] %v3040_v25 }
 0x404   : > { %3781 = shalt.err (!%p3778_p2)
}
 0x405   : > { %3391 = dma.vmem_to_hbm [thread:$0]  (%p3887_p5), %s3059_s6, 256, %s3061_s14, %s3045_s7  }
 0x406 PF: > { %p3397_p3 = scmp.ge.s32.totalorder %s3816_s21, 2  ;;  %s3072_s15 = sand.u32 1, %s3804_s18  }
 0x407   : > { %s3073_s16 = scalar_lea.sflag [#allocation3], %s3072_s15 }
 0x408   : > { %p3394_p4 = pnand %p3397_p3, %p3891_p6 }
 0x40a   : > { %p3395_p7 = pneg %p3394_p4 }
 0x40c   : > { %3799 = dma.done.wait (%p3395_p7), %s3073_s16, 256  }
 0x40d   : > { %3801 = vsyncadd (%p3395_p7), %s3073_s16, 4294967040  ;;  %p15_p8 = scmp.ge.s32.totalorder %s3874_s24, 4   ;;  %s6731_s18 = smov %s3808_s19 }
 0x40e   : > { %s6732_s19 = smov %s3812_s20  ;;  %s6733_s20 = smov %s3885_s27 }
 0x40f   : > { %s6734_s21 = smov %s3874_s24  ;;  %17 = sbr.rel (!%p15_p8) target bundleno = 3 (0x3), region = 73 }
 0x414   :  { %3079 = vsyncpa [#allocation3], 1 }
 0x415   :  { %3081 = vsyncpa [#allocation3 + $0x1], 1 }

</bundles_post_ra>
